<compile_context>
chip_gen: v5e
topology: v5e:2x2
jax: 0.10.0
libtpu: 0.0.40
codegen_flags: <defaults>
</compile_context>

<pallas_src>
import jax
import jax.numpy as jnp
import numpy as np
from jax import lax
from jax.experimental import pallas as pl
from jax.experimental.pallas import tpu as pltpu

KH = KW = 3   # 3x3 convolution
LANE = 128    # lane width: pad channels to a multiple of this
TN = 128      # output-channel tile of the f32 accumulator (<= 32 vregs)


def _round_up(x, m):
    return (x + m - 1) // m * m


def _pick_sr(H, W):
    """Rows per strip: smallest multiple of 8 dividing H with SR*W >= 256
    (fills the v6e/v7x MXU); otherwise the largest such divisor; else H."""
    best = None
    for sr in range(8, H + 1, 8):
        if H % sr:
            continue
        best = sr
        if sr * W >= 256:
            return sr
    return best if best is not None else H


def basic_block_kernel(xpad_ref, w1_ref, b1_ref, w2_ref, b2_ref, out_ref,
                       mid_ref):
    # xpad_ref: (1, H+2, W, Cpi) bf16  zero halo rows, channel-padded input
    # w1_ref  : (9, Cpi, Cpo)    bf16  conv1 weights, BN1 scale folded in
    # b1_ref  : (1, Cpo)         f32   folded BN1 bias
    # w2_ref  : (9, Cpo, Cpo)    bf16  conv2 weights, BN2 scale folded in
    # b2_ref  : (1, Cpo)         f32   folded BN2 bias
    # out_ref : (1, H, W, Cpo)   bf16
    # mid_ref : (H+2, W, Cpo)    bf16  VMEM scratch: conv1 activation + halo rows
    H, W, Cpo = out_ref.shape[1], out_ref.shape[2], out_ref.shape[3]
    Cpi = xpad_ref.shape[3]

    SR = _pick_sr(H, W)
    n_strips = H // SR
    M = SR * W                  # matmul M per strip
    MS = (SR + 2) * W           # flattened halo-strip rows
    n_ctiles = Cpo // TN
    # TODO(synk): for W not a multiple of 16 (14x14 / 7x7 stages) the
    # (SR, W, C)->(SR*W, C) reshape crosses bf16 tile boundaries; pad W
    # upstream for those stages.

    b1v = b1_ref[...]           # (1, Cpo) f32, loaded once
    b2v = b2_ref[...]

    # Column-position masks over the flattened halo strip (lane-broadcast).
    col = lax.broadcasted_iota(jnp.int32, (MS, 1), 0) % W
    maskL = col == 0            # dx=-1 neighbour is the left zero pad
    maskR = col == W - 1        # dx=+1 neighbour is the right zero pad

    # Zero only the two halo rows of the conv1 scratch (dense full-width
    # stores).  Scratch is uninitialised and per-core, so do it every grid
    # step; the interior rows are always fully overwritten by conv1 below.
    zrow = jnp.zeros((1, W, Cpo), mid_ref.dtype)
    mid_ref[0:1, :, :] = zrow
    mid_ref[H + 1:H + 2, :, :] = zrow

    def shifted_taps(flat):
        # flat: (MS, C) bf16.  Build the dx = 0 / 1 / 2 column-shifted taps.
        # The +-1 shifts are circular sublane rolls (XLU) on an exact f32
        # upcast; the wrapped edge column is masked to zero, which supplies
        # the 3x3 conv zero padding.  No misaligned slices, no masked stores.
        f32 = flat.astype(jnp.float32)
        left = jnp.where(maskL, 0.0, pltpu.roll(f32, 1, axis=0))
        right = jnp.where(maskR, 0.0, pltpu.roll(f32, MS - 1, axis=0))
        return (left.astype(flat.dtype), flat, right.astype(flat.dtype))

    def conv_strip(taps, w_ref, bias, extra):
        # 9 shifted (M, C) @ (C, TN) MXU matmuls per output-channel tile; the
        # accumulator is initialised with the folded BN bias (and residual).
        tiles = []
        for t in range(n_ctiles):
            n0 = t * TN
            acc = jnp.broadcast_to(bias[:, n0:n0 + TN], (M, TN))
            if extra is not None:
                acc = acc + extra[:, n0:n0 + TN]
            for k in range(KH * KW):
                dy, dx = divmod(k, KW)
                tap = taps[dx][dy * W:dy * W + M, :]
                acc = acc + jnp.dot(tap, w_ref[k, :, n0:n0 + TN],
                                    preferred_element_type=jnp.float32)
            tiles.append(acc)
        return tiles

    # ---- conv1 (BN1 scale pre-folded) + bias + ReLU ----
    def conv1_strip(r0):
        xs = xpad_ref[0, pl.ds(r0, SR + 2), :, :]        # (SR+2, W, Cpi)
        taps = shifted_taps(xs.reshape(MS, Cpi))
        for t, acc in enumerate(conv_strip(taps, w1_ref, b1v, None)):
            n0 = t * TN
            y = jnp.maximum(acc, 0.0).astype(mid_ref.dtype)
            mid_ref[pl.ds(r0 + 1, SR), :, n0:n0 + TN] = y.reshape(SR, W, TN)

    # ---- conv2 (BN2 scale pre-folded) + bias + identity residual + ReLU ----
    def conv2_strip(r0):
        ms = mid_ref[pl.ds(r0, SR + 2), :, :]            # (SR+2, W, Cpo)
        taps = shifted_taps(ms.reshape(MS, Cpo))
        # identity shortcut (Cpi == Cpo is asserted in the wrapper)
        resid = xpad_ref[0, pl.ds(r0 + 1, SR), :, :]
        resid = resid.reshape(M, Cpi).astype(jnp.float32)
        for t, acc in enumerate(conv_strip(taps, w2_ref, b2v, resid)):
            n0 = t * TN
            z = jnp.maximum(acc, 0.0).astype(out_ref.dtype)
            out_ref[0, pl.ds(r0, SR), :, n0:n0 + TN] = z.reshape(SR, W, TN)

    if n_strips == 1:
        conv1_strip(0)
        conv2_strip(0)
    else:
        def _c1(s, carry):
            conv1_strip(pl.multiple_of(s * SR, SR))
            return carry

        def _c2(s, carry):
            conv2_strip(pl.multiple_of(s * SR, SR))
            return carry

        lax.fori_loop(0, n_strips, _c1, 0)
        lax.fori_loop(0, n_strips, _c2, 0)


def _fold_bn(gamma, beta, mean, var, eps=1e-5):
    inv = gamma / jnp.sqrt(var + eps)
    return inv, beta - mean * inv


def basic_block_pallas(x_nchw, params, eps=1e-5):
    """Forward of BasicBlock(in_planes=planes, stride=1, downsample=None)."""
    N, Cin, H, W = x_nchw.shape
    Cout = params["w1"].shape[-1]
    assert Cin == Cout, "identity shortcut requires in_planes == planes"
    Cpi = _round_up(Cin, LANE)
    Cpo = _round_up(Cout, LANE)
    # TODO(synk): small-C blocks pay heavily for the 128-lane channel padding
    # (C=4 here, C=64 in ResNet stage 1); the real fix is channel packing /
    # space-to-depth upstream, not kernel tweaks.

    # NCHW -> NHWC, pad rows by 1 (zero halo rows), channel-pad to 128, bf16.
    # No column padding: the kernel builds column shifts with pltpu.roll.
    x = jnp.transpose(x_nchw, (0, 2, 3, 1))
    xp = jnp.pad(x, ((0, 0), (1, 1), (0, 0), (0, Cpi - Cin))).astype(jnp.bfloat16)

    # Fold BN scale into conv weights (trace-time constants); keep bias only.
    s1, b1 = _fold_bn(params["g1"], params["be1"], params["m1"], params["v1"], eps)
    s2, b2 = _fold_bn(params["g2"], params["be2"], params["m2"], params["v2"], eps)
    w1p = jnp.pad(params["w1"] * s1[None, None, None, :],
                  ((0, 0), (0, 0), (0, Cpi - Cin), (0, Cpo - Cout)))
    w2p = jnp.pad(params["w2"] * s2[None, None, None, :],
                  ((0, 0), (0, 0), (0, Cpo - Cout), (0, Cpo - Cout)))
    w1p = w1p.reshape(KH * KW, Cpi, Cpo).astype(jnp.bfloat16)
    w2p = w2p.reshape(KH * KW, Cpo, Cpo).astype(jnp.bfloat16)
    b1p = jnp.pad(b1, (0, Cpo - Cout)).reshape(1, Cpo).astype(jnp.float32)
    b2p = jnp.pad(b2, (0, Cpo - Cout)).reshape(1, Cpo).astype(jnp.float32)

    # VMEM budget derived from actual (double-buffered) block sizes + scratch.
    x_blk = (H + 2) * W * Cpi * 2
    o_blk = H * W * Cpo * 2
    w_blk = (w1p.size + w2p.size) * 2 + (b1p.size + b2p.size) * 4
    mid_blk = (H + 2) * W * Cpo * 2
    vmem_limit = min(64 * 1024 * 1024,
                     max(32 * 1024 * 1024,
                         2 * (2 * (x_blk + o_blk + w_blk) + mid_blk)))
    # TODO(synk): for Cpo >= 384, single-buffer the constant weight blocks
    # (pipeline_mode=pl.Buffered(1)) to cut dead VMEM on v7x's 64 MiB.
    # TODO(synk): on v7x with N=1, verify both TensorCores are used; if not,
    # add a core-parallel leading grid axis over row strips.

    # Padded-channel MACs (useful fraction is (Cin*Cout)/(Cpi*Cpo)).
    flops = int(2 * 2 * N * H * W * KH * KW * Cpi * Cpo)
    bytes_accessed = int(xp.size * 2 + w1p.size * 2 + w2p.size * 2
                         + b1p.size * 4 + b2p.size * 4 + N * H * W * Cpo * 2)

    out_nhwc = pl.pallas_call(
        basic_block_kernel,
        out_shape=jax.ShapeDtypeStruct((N, H, W, Cpo), jnp.bfloat16),
        grid_spec=pltpu.PrefetchScalarGridSpec(
            num_scalar_prefetch=0,
            grid=(N,),
            in_specs=[
                pl.BlockSpec((1, H + 2, W, Cpi), lambda n: (n, 0, 0, 0)),
                pl.BlockSpec((KH * KW, Cpi, Cpo), lambda n: (0, 0, 0)),
                pl.BlockSpec((1, Cpo), lambda n: (0, 0)),
                pl.BlockSpec((KH * KW, Cpo, Cpo), lambda n: (0, 0, 0)),
                pl.BlockSpec((1, Cpo), lambda n: (0, 0)),
            ],
            out_specs=pl.BlockSpec((1, H, W, Cpo), lambda n: (n, 0, 0, 0)),
            scratch_shapes=[pltpu.VMEM((H + 2, W, Cpo), jnp.bfloat16)],
        ),
        compiler_params=pltpu.CompilerParams(
            dimension_semantics=("parallel",),
            vmem_limit_bytes=int(vmem_limit)),
        cost_estimate=pl.CostEstimate(flops=flops, transcendentals=0,
                                      bytes_accessed=bytes_accessed),
    )(xp, w1p, b1p, w2p, b2p)

    # TODO(synk): when chaining blocks, keep the padded bf16 NHWC layout; the
    # slice/transpose/f32 cast here only matches the module's NCHW interface.
    return jnp.transpose(out_nhwc[..., :Cout], (0, 3, 1, 2)).astype(jnp.float32)


def basic_block_ref(x_nchw, params, eps=1e-5):
    """Pure-JAX f32 reference (inference-mode BN), for correctness check."""
    def conv(x, w):
        return jax.lax.conv_general_dilated(
            x, w, window_strides=(1, 1), padding=((1, 1), (1, 1)),
            dimension_numbers=("NCHW", "HWIO", "NCHW"),
            precision=jax.lax.Precision.HIGHEST)

    def bn(x, g, b, m, v):
        inv = g / jnp.sqrt(v + eps)
        return x * inv[None, :, None, None] + (b - m * inv)[None, :, None, None]

    out = jax.nn.relu(bn(conv(x_nchw, params["w1"]),
                         params["g1"], params["be1"], params["m1"], params["v1"]))
    out = bn(conv(out, params["w2"]),
             params["g2"], params["be2"], params["m2"], params["v2"])
    return jax.nn.relu(out + x_nchw)


def init_params(key, in_planes, planes):
    k1, k2, k3, k4 = jax.random.split(key, 4)
    return dict(
        w1=0.1 * jax.random.normal(k1, (KH, KW, in_planes, planes), jnp.float32),
        w2=0.1 * jax.random.normal(k2, (KH, KW, planes, planes), jnp.float32),
        g1=1.0 + 0.1 * jax.random.normal(k3, (planes,), jnp.float32),
        be1=0.05 * jnp.arange(planes, dtype=jnp.float32),
        m1=0.02 * jnp.arange(planes, dtype=jnp.float32),
        v1=1.0 + 0.10 * jnp.arange(planes, dtype=jnp.float32),
        g2=1.0 + 0.1 * jax.random.normal(k4, (planes,), jnp.float32),
        be2=-0.03 * jnp.arange(planes, dtype=jnp.float32),
        m2=0.01 * jnp.arange(planes, dtype=jnp.float32),
        v2=1.0 + 0.05 * jnp.arange(planes, dtype=jnp.float32),
    )


if __name__ == "__main__":
    key = jax.random.PRNGKey(0)
    kx, kp = jax.random.split(key)

    N, C, H, W = 2, 4, 16, 16          # in_planes = planes = 4, stride = 1
    x = jax.random.normal(kx, (N, C, H, W), jnp.float32)
    params = init_params(kp, in_planes=C, planes=C)

    out = jax.block_until_ready(basic_block_pallas(x, params))
    ref = jax.block_until_ready(basic_block_ref(x, params))

    # Kernel uses bf16 activations/weights/output with f32 accumulation;
    # compare to the full-f32 reference with a relaxed tolerance.
    np.testing.assert_allclose(np.asarray(out), np.asarray(ref),
                               rtol=5e-2, atol=5e-2)
    assert out.shape == (N, C, H, W)

    print("KERNEL_OK")
</pallas_src>

<mosaic_0001>
module attributes {stable_mosaic.version = 11 : i64} {
  func.func @basic_block_kernel(%arg0: i32, %arg1: memref<1x18x16x128xbf16, #tpu.memory_space<vmem>>, %arg2: memref<9x128x128xbf16, #tpu.memory_space<vmem>>, %arg3: memref<1x128xf32, #tpu.memory_space<vmem>>, %arg4: memref<9x128x128xbf16, #tpu.memory_space<vmem>>, %arg5: memref<1x128xf32, #tpu.memory_space<vmem>>, %arg6: memref<1x16x16x128xbf16, #tpu.memory_space<vmem>>, %arg7: memref<18x16x128xbf16, #tpu.memory_space<vmem>>) attributes {dimension_semantics = [#tpu.dimension_semantics<parallel>], iteration_bounds = array<i64: 2>, scalar_prefetch = 0 : i64, scratch_operands = 1 : i64, tpu.core_type = #tpu.core_type<tc>, window_params = [{transform_indices = @transform_0, window_bounds = array<i64: 1, 18, 16, 128>}, {pipeline_mode = #tpu.pipeline_mode<synchronous>, transform_indices = @transform_1, window_bounds = array<i64: 9, 128, 128>}, {pipeline_mode = #tpu.pipeline_mode<synchronous>, transform_indices = @transform_2, window_bounds = array<i64: 1, 128>}, {pipeline_mode = #tpu.pipeline_mode<synchronous>, transform_indices = @transform_3, window_bounds = array<i64: 9, 128, 128>}, {pipeline_mode = #tpu.pipeline_mode<synchronous>, transform_indices = @transform_4, window_bounds = array<i64: 1, 128>}, {transform_indices = @transform_5, window_bounds = array<i64: 1, 16, 16, 128>}]} {
    %c0 = arith.constant 0 : index
    %c0_0 = arith.constant 0 : index
    %0 = vector.load %arg3[%c0, %c0_0] : memref<1x128xf32, #tpu.memory_space<vmem>>, vector<1x128xf32>
    %c0_1 = arith.constant 0 : index
    %c0_2 = arith.constant 0 : index
    %1 = vector.load %arg5[%c0_1, %c0_2] : memref<1x128xf32, #tpu.memory_space<vmem>>, vector<1x128xf32>
    %2 = tpu.iota {dimensions = array<i32: 0>} : vector<288x1xi32>
    %c16_i32 = arith.constant 16 : i32
    %c0_i32 = arith.constant 0 : i32
    %3 = arith.cmpi eq, %c16_i32, %c0_i32 : i32
    %c1_i32 = arith.constant 1 : i32
    %4 = arith.select %3, %c1_i32, %c16_i32 : i32
    %5 = vector.broadcast %4 : i32 to vector<288x1xi32>
    %6 = arith.remsi %2, %5 : vector<288x1xi32>
    %c0_i32_3 = arith.constant 0 : i32
    %7 = vector.broadcast %c0_i32_3 : i32 to vector<288x1xi32>
    %8 = arith.cmpi ne, %6, %7 : vector<288x1xi32>
    %c0_i32_4 = arith.constant 0 : i32
    %9 = vector.broadcast %c0_i32_4 : i32 to vector<288x1xi32>
    %10 = arith.cmpi slt, %6, %9 : vector<288x1xi32>
    %c0_i32_5 = arith.constant 0 : i32
    %11 = arith.cmpi slt, %4, %c0_i32_5 : i32
    %12 = vector.broadcast %11 : i1 to vector<288x1xi1>
    %13 = vector.broadcast %12 : vector<288x1xi1> to vector<288x1xi1>
    %14 = arith.xori %10, %13 : vector<288x1xi1>
    %15 = arith.andi %14, %8 : vector<288x1xi1>
    %16 = vector.broadcast %4 : i32 to vector<288x1xi32>
    %17 = arith.addi %6, %16 : vector<288x1xi32>
    %18 = arith.select %15, %17, %6 : vector<288x1xi1>, vector<288x1xi32>
    %c0_i32_6 = arith.constant 0 : i32
    %19 = vector.broadcast %c0_i32_6 : i32 to vector<288x1xi32>
    %20 = arith.cmpi eq, %18, %19 : vector<288x1xi32>
    %c15_i32 = arith.constant 15 : i32
    %21 = vector.broadcast %c15_i32 : i32 to vector<288x1xi32>
    %22 = arith.cmpi eq, %18, %21 : vector<288x1xi32>
    %cst = arith.constant 0.000000e+00 : bf16
    %23 = vector.broadcast %cst : bf16 to vector<1x16x128xbf16>
    %c0_7 = arith.constant 0 : index
    %c0_8 = arith.constant 0 : index
    %c0_9 = arith.constant 0 : index
    %24 = vector.load %arg7[%c0_7, %c0_8, %c0_9] : memref<18x16x128xbf16, #tpu.memory_space<vmem>>, vector<1x16x128xbf16>
    tpu.vector_store %arg7[%c0_7, %c0_8, %c0_9], %23 {strides = array<i32>} : memref<18x16x128xbf16, #tpu.memory_space<vmem>>, vector<1x16x128xbf16>,
    %c17 = arith.constant 17 : index
    %c0_10 = arith.constant 0 : index
    %c0_11 = arith.constant 0 : index
    %25 = vector.load %arg7[%c17, %c0_10, %c0_11] : memref<18x16x128xbf16, #tpu.memory_space<vmem>>, vector<1x16x128xbf16>
    tpu.vector_store %arg7[%c17, %c0_10, %c0_11], %23 {strides = array<i32>} : memref<18x16x128xbf16, #tpu.memory_space<vmem>>, vector<1x16x128xbf16>,
    %c0_12 = arith.constant 0 : index
    %c0_13 = arith.constant 0 : index
    %c0_14 = arith.constant 0 : index
    %c0_15 = arith.constant 0 : index
    %26 = vector.load %arg1[%c0_12, %c0_13, %c0_14, %c0_15] : memref<1x18x16x128xbf16, #tpu.memory_space<vmem>>, vector<1x18x16x128xbf16>
    %27 = vector.shape_cast %26 : vector<1x18x16x128xbf16> to vector<18x16x128xbf16>
    %28 = vector.shape_cast %27 : vector<18x16x128xbf16> to vector<288x128xbf16>
    %29 = arith.extf %28 : vector<288x128xbf16> to vector<288x128xf32>
    %c1_i32_16 = arith.constant 1 : i32
    %30 = tpu.dynamic_rotate %29 by %c1_i32_16 dim 0 : vector<288x128xf32>, i32 -> vector<288x128xf32>
    %cst_17 = arith.constant 0.000000e+00 : f32
    %31 = vector.shape_cast %20 : vector<288x1xi1> to vector<288x1xi1>
    %32 = vector.broadcast %31 : vector<288x1xi1> to vector<288x128xi1>
    %33 = vector.broadcast %cst_17 : f32 to vector<288x128xf32>
    %34 = arith.select %32, %33, %30 : vector<288x128xi1>, vector<288x128xf32>
    %c287_i32 = arith.constant 287 : i32
    %35 = tpu.dynamic_rotate %29 by %c287_i32 dim 0 : vector<288x128xf32>, i32 -> vector<288x128xf32>
    %cst_18 = arith.constant 0.000000e+00 : f32
    %36 = vector.shape_cast %22 : vector<288x1xi1> to vector<288x1xi1>
    %37 = vector.broadcast %36 : vector<288x1xi1> to vector<288x128xi1>
    %38 = vector.broadcast %cst_18 : f32 to vector<288x128xf32>
    %39 = arith.select %37, %38, %35 : vector<288x128xi1>, vector<288x128xf32>
    %40 = arith.truncf %34 : vector<288x128xf32> to vector<288x128xbf16>
    %41 = arith.truncf %39 : vector<288x128xf32> to vector<288x128xbf16>
    %42 = vector.shape_cast %0 : vector<1x128xf32> to vector<1x128xf32>
    %43 = vector.broadcast %42 : vector<1x128xf32> to vector<256x128xf32>
    %44 = vector.extract_strided_slice %40 {offsets = [0, 0], sizes = [256, 128], strides = [1, 1]} : vector<288x128xbf16> to vector<256x128xbf16>
    %c0_19 = arith.constant 0 : index
    %c0_20 = arith.constant 0 : index
    %c0_21 = arith.constant 0 : index
    %45 = vector.load %arg2[%c0_19, %c0_20, %c0_21] : memref<9x128x128xbf16, #tpu.memory_space<vmem>>, vector<1x128x128xbf16>
    %46 = vector.shape_cast %45 : vector<1x128x128xbf16> to vector<128x128xbf16>
    %cst_22 = arith.constant dense<0.000000e+00> : vector<256x128xf32>
    %47 = tpu.matmul %44, %46, %cst_22 {dimension_numbers = #tpu.dot_dimension_numbers<[1], [0], [0], [1], [0, 0, 1, 1], [], []>} : vector<256x128xbf16>, vector<128x128xbf16>, vector<256x128xf32> -> vector<256x128xf32>
    %48 = arith.addf %43, %47 : vector<256x128xf32>
    %49 = vector.extract_strided_slice %28 {offsets = [0, 0], sizes = [256, 128], strides = [1, 1]} : vector<288x128xbf16> to vector<256x128xbf16>
    %c1 = arith.constant 1 : index
    %c0_23 = arith.constant 0 : index
    %c0_24 = arith.constant 0 : index
    %50 = vector.load %arg2[%c1, %c0_23, %c0_24] : memref<9x128x128xbf16, #tpu.memory_space<vmem>>, vector<1x128x128xbf16>
    %51 = vector.shape_cast %50 : vector<1x128x128xbf16> to vector<128x128xbf16>
    %cst_25 = arith.constant dense<0.000000e+00> : vector<256x128xf32>
    %52 = tpu.matmul %49, %51, %cst_25 {dimension_numbers = #tpu.dot_dimension_numbers<[1], [0], [0], [1], [0, 0, 1, 1], [], []>} : vector<256x128xbf16>, vector<128x128xbf16>, vector<256x128xf32> -> vector<256x128xf32>
    %53 = arith.addf %48, %52 : vector<256x128xf32>
    %54 = vector.extract_strided_slice %41 {offsets = [0, 0], sizes = [256, 128], strides = [1, 1]} : vector<288x128xbf16> to vector<256x128xbf16>
    %c2 = arith.constant 2 : index
    %c0_26 = arith.constant 0 : index
    %c0_27 = arith.constant 0 : index
    %55 = vector.load %arg2[%c2, %c0_26, %c0_27] : memref<9x128x128xbf16, #tpu.memory_space<vmem>>, vector<1x128x128xbf16>
    %56 = vector.shape_cast %55 : vector<1x128x128xbf16> to vector<128x128xbf16>
    %cst_28 = arith.constant dense<0.000000e+00> : vector<256x128xf32>
    %57 = tpu.matmul %54, %56, %cst_28 {dimension_numbers = #tpu.dot_dimension_numbers<[1], [0], [0], [1], [0, 0, 1, 1], [], []>} : vector<256x128xbf16>, vector<128x128xbf16>, vector<256x128xf32> -> vector<256x128xf32>
    %58 = arith.addf %53, %57 : vector<256x128xf32>
    %59 = vector.extract_strided_slice %40 {offsets = [16, 0], sizes = [256, 128], strides = [1, 1]} : vector<288x128xbf16> to vector<256x128xbf16>
    %c3 = arith.constant 3 : index
    %c0_29 = arith.constant 0 : index
    %c0_30 = arith.constant 0 : index
    %60 = vector.load %arg2[%c3, %c0_29, %c0_30] : memref<9x128x128xbf16, #tpu.memory_space<vmem>>, vector<1x128x128xbf16>
    %61 = vector.shape_cast %60 : vector<1x128x128xbf16> to vector<128x128xbf16>
    %cst_31 = arith.constant dense<0.000000e+00> : vector<256x128xf32>
    %62 = tpu.matmul %59, %61, %cst_31 {dimension_numbers = #tpu.dot_dimension_numbers<[1], [0], [0], [1], [0, 0, 1, 1], [], []>} : vector<256x128xbf16>, vector<128x128xbf16>, vector<256x128xf32> -> vector<256x128xf32>
    %63 = arith.addf %58, %62 : vector<256x128xf32>
    %64 = vector.extract_strided_slice %28 {offsets = [16, 0], sizes = [256, 128], strides = [1, 1]} : vector<288x128xbf16> to vector<256x128xbf16>
    %c4 = arith.constant 4 : index
    %c0_32 = arith.constant 0 : index
    %c0_33 = arith.constant 0 : index
    %65 = vector.load %arg2[%c4, %c0_32, %c0_33] : memref<9x128x128xbf16, #tpu.memory_space<vmem>>, vector<1x128x128xbf16>
    %66 = vector.shape_cast %65 : vector<1x128x128xbf16> to vector<128x128xbf16>
    %cst_34 = arith.constant dense<0.000000e+00> : vector<256x128xf32>
    %67 = tpu.matmul %64, %66, %cst_34 {dimension_numbers = #tpu.dot_dimension_numbers<[1], [0], [0], [1], [0, 0, 1, 1], [], []>} : vector<256x128xbf16>, vector<128x128xbf16>, vector<256x128xf32> -> vector<256x128xf32>
    %68 = arith.addf %63, %67 : vector<256x128xf32>
    %69 = vector.extract_strided_slice %41 {offsets = [16, 0], sizes = [256, 128], strides = [1, 1]} : vector<288x128xbf16> to vector<256x128xbf16>
    %c5 = arith.constant 5 : index
    %c0_35 = arith.constant 0 : index
    %c0_36 = arith.constant 0 : index
    %70 = vector.load %arg2[%c5, %c0_35, %c0_36] : memref<9x128x128xbf16, #tpu.memory_space<vmem>>, vector<1x128x128xbf16>
    %71 = vector.shape_cast %70 : vector<1x128x128xbf16> to vector<128x128xbf16>
    %cst_37 = arith.constant dense<0.000000e+00> : vector<256x128xf32>
    %72 = tpu.matmul %69, %71, %cst_37 {dimension_numbers = #tpu.dot_dimension_numbers<[1], [0], [0], [1], [0, 0, 1, 1], [], []>} : vector<256x128xbf16>, vector<128x128xbf16>, vector<256x128xf32> -> vector<256x128xf32>
    %73 = arith.addf %68, %72 : vector<256x128xf32>
    %74 = vector.extract_strided_slice %40 {offsets = [32, 0], sizes = [256, 128], strides = [1, 1]} : vector<288x128xbf16> to vector<256x128xbf16>
    %c6 = arith.constant 6 : index
    %c0_38 = arith.constant 0 : index
    %c0_39 = arith.constant 0 : index
    %75 = vector.load %arg2[%c6, %c0_38, %c0_39] : memref<9x128x128xbf16, #tpu.memory_space<vmem>>, vector<1x128x128xbf16>
    %76 = vector.shape_cast %75 : vector<1x128x128xbf16> to vector<128x128xbf16>
    %cst_40 = arith.constant dense<0.000000e+00> : vector<256x128xf32>
    %77 = tpu.matmul %74, %76, %cst_40 {dimension_numbers = #tpu.dot_dimension_numbers<[1], [0], [0], [1], [0, 0, 1, 1], [], []>} : vector<256x128xbf16>, vector<128x128xbf16>, vector<256x128xf32> -> vector<256x128xf32>
    %78 = arith.addf %73, %77 : vector<256x128xf32>
    %79 = vector.extract_strided_slice %28 {offsets = [32, 0], sizes = [256, 128], strides = [1, 1]} : vector<288x128xbf16> to vector<256x128xbf16>
    %c7 = arith.constant 7 : index
    %c0_41 = arith.constant 0 : index
    %c0_42 = arith.constant 0 : index
    %80 = vector.load %arg2[%c7, %c0_41, %c0_42] : memref<9x128x128xbf16, #tpu.memory_space<vmem>>, vector<1x128x128xbf16>
    %81 = vector.shape_cast %80 : vector<1x128x128xbf16> to vector<128x128xbf16>
    %cst_43 = arith.constant dense<0.000000e+00> : vector<256x128xf32>
    %82 = tpu.matmul %79, %81, %cst_43 {dimension_numbers = #tpu.dot_dimension_numbers<[1], [0], [0], [1], [0, 0, 1, 1], [], []>} : vector<256x128xbf16>, vector<128x128xbf16>, vector<256x128xf32> -> vector<256x128xf32>
    %83 = arith.addf %78, %82 : vector<256x128xf32>
    %84 = vector.extract_strided_slice %41 {offsets = [32, 0], sizes = [256, 128], strides = [1, 1]} : vector<288x128xbf16> to vector<256x128xbf16>
    %c8 = arith.constant 8 : index
    %c0_44 = arith.constant 0 : index
    %c0_45 = arith.constant 0 : index
    %85 = vector.load %arg2[%c8, %c0_44, %c0_45] : memref<9x128x128xbf16, #tpu.memory_space<vmem>>, vector<1x128x128xbf16>
    %86 = vector.shape_cast %85 : vector<1x128x128xbf16> to vector<128x128xbf16>
    %cst_46 = arith.constant dense<0.000000e+00> : vector<256x128xf32>
    %87 = tpu.matmul %84, %86, %cst_46 {dimension_numbers = #tpu.dot_dimension_numbers<[1], [0], [0], [1], [0, 0, 1, 1], [], []>} : vector<256x128xbf16>, vector<128x128xbf16>, vector<256x128xf32> -> vector<256x128xf32>
    %88 = arith.addf %83, %87 : vector<256x128xf32>
    %cst_47 = arith.constant 0.000000e+00 : f32
    %89 = vector.broadcast %cst_47 : f32 to vector<256x128xf32>
    %90 = arith.maximumf %88, %89 : vector<256x128xf32>
    %91 = arith.truncf %90 : vector<256x128xf32> to vector<256x128xbf16>
    %92 = vector.shape_cast %91 : vector<256x128xbf16> to vector<16x16x128xbf16>
    %c1_48 = arith.constant 1 : index
    %c0_49 = arith.constant 0 : index
    %c0_50 = arith.constant 0 : index
    %93 = vector.load %arg7[%c1_48, %c0_49, %c0_50] : memref<18x16x128xbf16, #tpu.memory_space<vmem>>, vector<16x16x128xbf16>
    tpu.vector_store %arg7[%c1_48, %c0_49, %c0_50], %92 {strides = array<i32>} : memref<18x16x128xbf16, #tpu.memory_space<vmem>>, vector<16x16x128xbf16>,
    %c0_51 = arith.constant 0 : index
    %c0_52 = arith.constant 0 : index
    %c0_53 = arith.constant 0 : index
    %94 = vector.load %arg7[%c0_51, %c0_52, %c0_53] : memref<18x16x128xbf16, #tpu.memory_space<vmem>>, vector<18x16x128xbf16>
    %95 = vector.shape_cast %94 : vector<18x16x128xbf16> to vector<288x128xbf16>
    %96 = arith.extf %95 : vector<288x128xbf16> to vector<288x128xf32>
    %c1_i32_54 = arith.constant 1 : i32
    %97 = tpu.dynamic_rotate %96 by %c1_i32_54 dim 0 : vector<288x128xf32>, i32 -> vector<288x128xf32>
    %cst_55 = arith.constant 0.000000e+00 : f32
    %98 = vector.shape_cast %20 : vector<288x1xi1> to vector<288x1xi1>
    %99 = vector.broadcast %98 : vector<288x1xi1> to vector<288x128xi1>
    %100 = vector.broadcast %cst_55 : f32 to vector<288x128xf32>
    %101 = arith.select %99, %100, %97 : vector<288x128xi1>, vector<288x128xf32>
    %c287_i32_56 = arith.constant 287 : i32
    %102 = tpu.dynamic_rotate %96 by %c287_i32_56 dim 0 : vector<288x128xf32>, i32 -> vector<288x128xf32>
    %cst_57 = arith.constant 0.000000e+00 : f32
    %103 = vector.shape_cast %22 : vector<288x1xi1> to vector<288x1xi1>
    %104 = vector.broadcast %103 : vector<288x1xi1> to vector<288x128xi1>
    %105 = vector.broadcast %cst_57 : f32 to vector<288x128xf32>
    %106 = arith.select %104, %105, %102 : vector<288x128xi1>, vector<288x128xf32>
    %107 = arith.truncf %101 : vector<288x128xf32> to vector<288x128xbf16>
    %108 = arith.truncf %106 : vector<288x128xf32> to vector<288x128xbf16>
    %c0_58 = arith.constant 0 : index
    %c1_59 = arith.constant 1 : index
    %c0_60 = arith.constant 0 : index
    %c0_61 = arith.constant 0 : index
    %109 = vector.load %arg1[%c0_58, %c1_59, %c0_60, %c0_61] : memref<1x18x16x128xbf16, #tpu.memory_space<vmem>>, vector<1x16x16x128xbf16>
    %110 = vector.shape_cast %109 : vector<1x16x16x128xbf16> to vector<16x16x128xbf16>
    %111 = vector.shape_cast %110 : vector<16x16x128xbf16> to vector<256x128xbf16>
    %112 = arith.extf %111 : vector<256x128xbf16> to vector<256x128xf32>
    %113 = vector.shape_cast %1 : vector<1x128xf32> to vector<1x128xf32>
    %114 = vector.broadcast %113 : vector<1x128xf32> to vector<256x128xf32>
    %115 = arith.addf %114, %112 : vector<256x128xf32>
    %116 = vector.extract_strided_slice %107 {offsets = [0, 0], sizes = [256, 128], strides = [1, 1]} : vector<288x128xbf16> to vector<256x128xbf16>
    %c0_62 = arith.constant 0 : index
    %c0_63 = arith.constant 0 : index
    %c0_64 = arith.constant 0 : index
    %117 = vector.load %arg4[%c0_62, %c0_63, %c0_64] : memref<9x128x128xbf16, #tpu.memory_space<vmem>>, vector<1x128x128xbf16>
    %118 = vector.shape_cast %117 : vector<1x128x128xbf16> to vector<128x128xbf16>
    %cst_65 = arith.constant dense<0.000000e+00> : vector<256x128xf32>
    %119 = tpu.matmul %116, %118, %cst_65 {dimension_numbers = #tpu.dot_dimension_numbers<[1], [0], [0], [1], [0, 0, 1, 1], [], []>} : vector<256x128xbf16>, vector<128x128xbf16>, vector<256x128xf32> -> vector<256x128xf32>
    %120 = arith.addf %115, %119 : vector<256x128xf32>
    %121 = vector.extract_strided_slice %95 {offsets = [0, 0], sizes = [256, 128], strides = [1, 1]} : vector<288x128xbf16> to vector<256x128xbf16>
    %c1_66 = arith.constant 1 : index
    %c0_67 = arith.constant 0 : index
    %c0_68 = arith.constant 0 : index
    %122 = vector.load %arg4[%c1_66, %c0_67, %c0_68] : memref<9x128x128xbf16, #tpu.memory_space<vmem>>, vector<1x128x128xbf16>
    %123 = vector.shape_cast %122 : vector<1x128x128xbf16> to vector<128x128xbf16>
    %cst_69 = arith.constant dense<0.000000e+00> : vector<256x128xf32>
    %124 = tpu.matmul %121, %123, %cst_69 {dimension_numbers = #tpu.dot_dimension_numbers<[1], [0], [0], [1], [0, 0, 1, 1], [], []>} : vector<256x128xbf16>, vector<128x128xbf16>, vector<256x128xf32> -> vector<256x128xf32>
    %125 = arith.addf %120, %124 : vector<256x128xf32>
    %126 = vector.extract_strided_slice %108 {offsets = [0, 0], sizes = [256, 128], strides = [1, 1]} : vector<288x128xbf16> to vector<256x128xbf16>
    %c2_70 = arith.constant 2 : index
    %c0_71 = arith.constant 0 : index
    %c0_72 = arith.constant 0 : index
    %127 = vector.load %arg4[%c2_70, %c0_71, %c0_72] : memref<9x128x128xbf16, #tpu.memory_space<vmem>>, vector<1x128x128xbf16>
    %128 = vector.shape_cast %127 : vector<1x128x128xbf16> to vector<128x128xbf16>
    %cst_73 = arith.constant dense<0.000000e+00> : vector<256x128xf32>
    %129 = tpu.matmul %126, %128, %cst_73 {dimension_numbers = #tpu.dot_dimension_numbers<[1], [0], [0], [1], [0, 0, 1, 1], [], []>} : vector<256x128xbf16>, vector<128x128xbf16>, vector<256x128xf32> -> vector<256x128xf32>
    %130 = arith.addf %125, %129 : vector<256x128xf32>
    %131 = vector.extract_strided_slice %107 {offsets = [16, 0], sizes = [256, 128], strides = [1, 1]} : vector<288x128xbf16> to vector<256x128xbf16>
    %c3_74 = arith.constant 3 : index
    %c0_75 = arith.constant 0 : index
    %c0_76 = arith.constant 0 : index
    %132 = vector.load %arg4[%c3_74, %c0_75, %c0_76] : memref<9x128x128xbf16, #tpu.memory_space<vmem>>, vector<1x128x128xbf16>
    %133 = vector.shape_cast %132 : vector<1x128x128xbf16> to vector<128x128xbf16>
    %cst_77 = arith.constant dense<0.000000e+00> : vector<256x128xf32>
    %134 = tpu.matmul %131, %133, %cst_77 {dimension_numbers = #tpu.dot_dimension_numbers<[1], [0], [0], [1], [0, 0, 1, 1], [], []>} : vector<256x128xbf16>, vector<128x128xbf16>, vector<256x128xf32> -> vector<256x128xf32>
    %135 = arith.addf %130, %134 : vector<256x128xf32>
    %136 = vector.extract_strided_slice %95 {offsets = [16, 0], sizes = [256, 128], strides = [1, 1]} : vector<288x128xbf16> to vector<256x128xbf16>
    %c4_78 = arith.constant 4 : index
    %c0_79 = arith.constant 0 : index
    %c0_80 = arith.constant 0 : index
    %137 = vector.load %arg4[%c4_78, %c0_79, %c0_80] : memref<9x128x128xbf16, #tpu.memory_space<vmem>>, vector<1x128x128xbf16>
    %138 = vector.shape_cast %137 : vector<1x128x128xbf16> to vector<128x128xbf16>
    %cst_81 = arith.constant dense<0.000000e+00> : vector<256x128xf32>
    %139 = tpu.matmul %136, %138, %cst_81 {dimension_numbers = #tpu.dot_dimension_numbers<[1], [0], [0], [1], [0, 0, 1, 1], [], []>} : vector<256x128xbf16>, vector<128x128xbf16>, vector<256x128xf32> -> vector<256x128xf32>
    %140 = arith.addf %135, %139 : vector<256x128xf32>
    %141 = vector.extract_strided_slice %108 {offsets = [16, 0], sizes = [256, 128], strides = [1, 1]} : vector<288x128xbf16> to vector<256x128xbf16>
    %c5_82 = arith.constant 5 : index
    %c0_83 = arith.constant 0 : index
    %c0_84 = arith.constant 0 : index
    %142 = vector.load %arg4[%c5_82, %c0_83, %c0_84] : memref<9x128x128xbf16, #tpu.memory_space<vmem>>, vector<1x128x128xbf16>
    %143 = vector.shape_cast %142 : vector<1x128x128xbf16> to vector<128x128xbf16>
    %cst_85 = arith.constant dense<0.000000e+00> : vector<256x128xf32>
    %144 = tpu.matmul %141, %143, %cst_85 {dimension_numbers = #tpu.dot_dimension_numbers<[1], [0], [0], [1], [0, 0, 1, 1], [], []>} : vector<256x128xbf16>, vector<128x128xbf16>, vector<256x128xf32> -> vector<256x128xf32>
    %145 = arith.addf %140, %144 : vector<256x128xf32>
    %146 = vector.extract_strided_slice %107 {offsets = [32, 0], sizes = [256, 128], strides = [1, 1]} : vector<288x128xbf16> to vector<256x128xbf16>
    %c6_86 = arith.constant 6 : index
    %c0_87 = arith.constant 0 : index
    %c0_88 = arith.constant 0 : index
    %147 = vector.load %arg4[%c6_86, %c0_87, %c0_88] : memref<9x128x128xbf16, #tpu.memory_space<vmem>>, vector<1x128x128xbf16>
    %148 = vector.shape_cast %147 : vector<1x128x128xbf16> to vector<128x128xbf16>
    %cst_89 = arith.constant dense<0.000000e+00> : vector<256x128xf32>
    %149 = tpu.matmul %146, %148, %cst_89 {dimension_numbers = #tpu.dot_dimension_numbers<[1], [0], [0], [1], [0, 0, 1, 1], [], []>} : vector<256x128xbf16>, vector<128x128xbf16>, vector<256x128xf32> -> vector<256x128xf32>
    %150 = arith.addf %145, %149 : vector<256x128xf32>
    %151 = vector.extract_strided_slice %95 {offsets = [32, 0], sizes = [256, 128], strides = [1, 1]} : vector<288x128xbf16> to vector<256x128xbf16>
    %c7_90 = arith.constant 7 : index
    %c0_91 = arith.constant 0 : index
    %c0_92 = arith.constant 0 : index
    %152 = vector.load %arg4[%c7_90, %c0_91, %c0_92] : memref<9x128x128xbf16, #tpu.memory_space<vmem>>, vector<1x128x128xbf16>
    %153 = vector.shape_cast %152 : vector<1x128x128xbf16> to vector<128x128xbf16>
    %cst_93 = arith.constant dense<0.000000e+00> : vector<256x128xf32>
    %154 = tpu.matmul %151, %153, %cst_93 {dimension_numbers = #tpu.dot_dimension_numbers<[1], [0], [0], [1], [0, 0, 1, 1], [], []>} : vector<256x128xbf16>, vector<128x128xbf16>, vector<256x128xf32> -> vector<256x128xf32>
    %155 = arith.addf %150, %154 : vector<256x128xf32>
    %156 = vector.extract_strided_slice %108 {offsets = [32, 0], sizes = [256, 128], strides = [1, 1]} : vector<288x128xbf16> to vector<256x128xbf16>
    %c8_94 = arith.constant 8 : index
    %c0_95 = arith.constant 0 : index
    %c0_96 = arith.constant 0 : index
    %157 = vector.load %arg4[%c8_94, %c0_95, %c0_96] : memref<9x128x128xbf16, #tpu.memory_space<vmem>>, vector<1x128x128xbf16>
    %158 = vector.shape_cast %157 : vector<1x128x128xbf16> to vector<128x128xbf16>
    %cst_97 = arith.constant dense<0.000000e+00> : vector<256x128xf32>
    %159 = tpu.matmul %156, %158, %cst_97 {dimension_numbers = #tpu.dot_dimension_numbers<[1], [0], [0], [1], [0, 0, 1, 1], [], []>} : vector<256x128xbf16>, vector<128x128xbf16>, vector<256x128xf32> -> vector<256x128xf32>
    %160 = arith.addf %155, %159 : vector<256x128xf32>
    %cst_98 = arith.constant 0.000000e+00 : f32
    %161 = vector.broadcast %cst_98 : f32 to vector<256x128xf32>
    %162 = arith.maximumf %160, %161 : vector<256x128xf32>
    %163 = arith.truncf %162 : vector<256x128xf32> to vector<256x128xbf16>
    %164 = vector.shape_cast %163 : vector<256x128xbf16> to vector<16x16x128xbf16>
    %c0_99 = arith.constant 0 : index
    %c0_100 = arith.constant 0 : index
    %c0_101 = arith.constant 0 : index
    %c0_102 = arith.constant 0 : index
    %165 = vector.load %arg6[%c0_99, %c0_100, %c0_101, %c0_102] : memref<1x16x16x128xbf16, #tpu.memory_space<vmem>>, vector<1x16x16x128xbf16>
    %166 = vector.shape_cast %165 : vector<1x16x16x128xbf16> to vector<16x16x128xbf16>
    %167 = vector.shape_cast %164 : vector<16x16x128xbf16> to vector<1x16x16x128xbf16>
    tpu.vector_store %arg6[%c0_99, %c0_100, %c0_101, %c0_102], %167 {strides = array<i32>} : memref<1x16x16x128xbf16, #tpu.memory_space<vmem>>, vector<1x16x16x128xbf16>,
    return
  }
  func.func @transform_0(%arg0: i32) -> (i32, i32, i32, i32) {
    %c0_i32 = arith.constant 0 : i32
    %c0_i32_0 = arith.constant 0 : i32
    %c0_i32_1 = arith.constant 0 : i32
    %c0_i32_2 = arith.constant 0 : i32
    return %arg0, %c0_i32, %c0_i32_0, %c0_i32_1 : i32, i32, i32, i32
  }
  func.func @transform_1(%arg0: i32) -> (i32, i32, i32) {
    %c0_i32 = arith.constant 0 : i32
    %c0_i32_0 = arith.constant 0 : i32
    %c0_i32_1 = arith.constant 0 : i32
    %c0_i32_2 = arith.constant 0 : i32
    return %c0_i32, %c0_i32_0, %c0_i32_1 : i32, i32, i32
  }
  func.func @transform_2(%arg0: i32) -> (i32, i32) {
    %c0_i32 = arith.constant 0 : i32
    %c0_i32_0 = arith.constant 0 : i32
    %c0_i32_1 = arith.constant 0 : i32
    return %c0_i32, %c0_i32_0 : i32, i32
  }
  func.func @transform_3(%arg0: i32) -> (i32, i32, i32) {
    %c0_i32 = arith.constant 0 : i32
    %c0_i32_0 = arith.constant 0 : i32
    %c0_i32_1 = arith.constant 0 : i32
    %c0_i32_2 = arith.constant 0 : i32
    return %c0_i32, %c0_i32_0, %c0_i32_1 : i32, i32, i32
  }
  func.func @transform_4(%arg0: i32) -> (i32, i32) {
    %c0_i32 = arith.constant 0 : i32
    %c0_i32_0 = arith.constant 0 : i32
    %c0_i32_1 = arith.constant 0 : i32
    return %c0_i32, %c0_i32_0 : i32, i32
  }
  func.func @transform_5(%arg0: i32) -> (i32, i32, i32, i32) {
    %c0_i32 = arith.constant 0 : i32
    %c0_i32_0 = arith.constant 0 : i32
    %c0_i32_1 = arith.constant 0 : i32
    %c0_i32_2 = arith.constant 0 : i32
    return %arg0, %c0_i32, %c0_i32_0, %c0_i32_1 : i32, i32, i32, i32
  }
}

</mosaic_0001>

<bundles_post_ra>
// kernel: tpu_custom_call.1
= control target key start
LH: loop header
LB: loop body
LE: loop exit
PB: predicated region body
PF: predicated region fallthrough
CT: control target
= control target key end

     0   :  { %s9909_s0 = inlined_call_operand.hbm [shape: bf16[2,18,16,128], index: 0, kind: input, shape index: {}]   ;;  %s9910_s1 = inlined_call_operand.hbm [shape: bf16[9,128,128], index: 1, kind: input, shape index: {}]   ;;  %s9911_s2 = inlined_call_operand.vmem [shape: f32[1,128], index: 2, kind: input, shape index: {}]   ;;  %s9912_s3 = inlined_call_operand.hbm [shape: bf16[9,128,128], index: 3, kind: input, shape index: {}]   ;;  %s9913_s4 = inlined_call_operand.vmem [shape: f32[1,128], index: 4, kind: input, shape index: {}]   ;;  %s9914_s5 = inlined_call_operand.hbm [shape: bf16[2,16,16,128], index: 5, kind: output, shape index: {}]  }
   0x1   :  { %10078 = sst [smem:[#allocation88_spill]] %s9910_s1 }
   0x2   :  { %10 = vsyncpa [#allocation4], 0 }
   0x3   :  { %12 = vsyncpa [#allocation4 + $0x1], 0 }
   0x4   :  { %13 = vsyncpa [#allocation7], 0 }
   0x5   :  { %14 = vsyncpa [#allocation5], 0 }
   0x6   :  { %16 = vsyncpa [#allocation5 + $0x1], 0  ;;  %s7622_s18 = smov 0   ;;  %s7624_s19 = smov 0  }
   0x7   :  { %s7626_s20 = smov 0   ;;  %s7628_s21 = smov 0  }
   0x8 LB: > { %s7643_s22 = sadd.s32 4294967295, %s7583_s21   ;;  %s6091_s23 = sadd.s32 4294967294, %s7583_s21   ;;  %s7583_s21 = sphi %s7628_s21, %s10543_s21   ;;  %s7579_s20 = sphi %s7626_s20, %s10542_s20   ;;  %s7575_s19 = sphi %s7624_s19, %s10541_s19   ;;  %s7571_s18 = sphi %s7622_s18, %s10540_s18  }
   0x9   : > { %p42_p0 = scmp.ne.s32.totalorder %s7575_s19, %s7571_s18  ;;  %p43_p1 = scmp.eq.s32.totalorder %s7643_s22, 0 }
   0xa   : > { %p150_p2 = scmp.eq.s32.totalorder %s7643_s22, 1  ;;  %p156_p3 = scmp.eq.s32.totalorder %s6091_s23, 1 }
   0xb   : > { %p7652_p4 = por %p43_p1, %p42_p0  ;;  %p6092_p5 = scmp.ge.s32.totalorder %s7583_s21, 1 }
   0xc   : > { %p7657_p6 = por %p156_p3, %p42_p0  ;;  %p163_p7 = scmp.lt.s32.totalorder %s7583_s21, 3 }
   0xd   : > { %s10081_s1 = sld [smem:[#allocation88_spill]]  ;;  %s7585_s30 = smov [#allocation6]  }
   0xe   : > { %p7665_p8 = pnand %p6092_p5, %p163_p7  ;;  %s176_s6 = sshll.u32 %s7585_s30, 4  ;;  %s177_s6 = int_to_ptr.vmem [resolvable:$true] %s176_s6 }
   0xf   : > { %s191_s9 = sshll.u32 %s9912_s3, 4  ;;  %s9915_s10 = smov 64   ;;  %s192_s9 = int_to_ptr.hbm [resolvable:$true] %s191_s9 }
  0x10   : > { %p7340_p9 = pneg %p7665_p8  ;;  %s9916_s11 = smov 4  }
  0x11   : > { %s7588_s12 = smov [#allocation8]   ;;  %s7684_s14 = sadd.s32 1, %s7583_s21  }
  0x12   : > { %p7341_p10 = pnand %p7340_p9, %p43_p1  ;;  %s193_s13 = sshll.u32 %s7588_s12, 4  ;;  %s194_s13 = int_to_ptr.vmem [resolvable:$true] %s193_s13 }
  0x13   : > { %s174_s28 = sshll.u32 %s10081_s1, 4  ;;  %s29_s15 = sadd.s32 1, %s7579_s20  ;;  %s175_s28 = int_to_ptr.hbm [resolvable:$true] %s174_s28 }
  0x14   : > { %7343 = dma.hbm_to_vmem [thread:$0]  (!%p7341_p10), %s175_s28, 9216, %s177_s6, [#allocation7], %s9915_s10, %s9915_s10, %s9916_s11  }
  0x15   : > { %7346 = dma.hbm_to_vmem [thread:$0]  (!%p7341_p10), %s192_s9, 9216, %s194_s13, [#allocation7], %s9915_s10, %s9915_s10, %s9916_s11  }
  0x16   : > { %s26_s16 = ssub.s32 %s7583_s21, %s7684_s14  ;;  %p36_p12 = scmp.ne.s32.totalorder %s7579_s20, %s7575_s19 }
  0x17   : > { %p27_p13 = scmp.eq.s32.totalorder %s26_s16, 0  ;;  %p37_p0 = scmp.eq.s32.totalorder %s7583_s21, 0 }
  0x18   : > { %p7694_p3 = por %p150_p2, %p36_p12  ;;  %p7357_p5 = scmp.lt.s32.totalorder %s7583_s21, 2 }
  0x19   : > { %s7700_s23 = scalar_select %p27_p13, %s7579_s20, %s29_s15  }
  0x1a   : > { %p38_p7 = por %p37_p0, %p36_p12  ;;  %s210_s26 = sand.u32 1, %s7579_s20  }
  0x1b   : > { %s7325_s27 = smul.u32 144, %s210_s26  ;;  %s211_s15 = scalar_lea.sflag [#allocation4], %s210_s26 }
  0x1c   : > { %s7326_s28 = smul.u32 144, %s7583_s21  ;;  %p7704_p9 = pnand %p7357_p5, %p38_p7 }
  0x1d   : > { %s214_s9 = scalar_lea.vmem [#allocation3], %s7325_s27  ;;  %s7490_s6 = scalar_lea.hbm %s9909_s0, 288 }
  0x1e   : > { %s219_s8 = scalar_lea.hbm %s9909_s0, %s7326_s28  ;;  %s222_s12 = sshll.u32 %s214_s9, 4  ;;  %s223_s12 = int_to_ptr.vmem [resolvable:$true] %s222_s12 }
  0x1f   : > { %s220_s13 = sshll.u32 %s219_s8, 4  ;;  %p7487_p10 = pneg %p7704_p9  ;;  %s221_s13 = int_to_ptr.hbm [resolvable:$true] %s220_s13 }
  0x20   : > { %s7483_s16 = sshra.s32 %s221_s13, 4  ;;  %s7484_s16 = int_to_ptr.hbm [resolvable:$true] %s7483_s16 }
  0x21   : > { %s7485_s10 = scalar_lea.hbm %s7484_s16, 144  ;;  %p7491_p0 = scmp.lt.s32.totalorder %s7484_s16, %s9909_s0 }
  0x22   : > { %p7486_p2 = scmp.ne.s32.totalorder %s7484_s16, %s7485_s10  ;;  %p7492_p5 = scmp.lt.s32.totalorder %s7490_s6, %s7485_s10 }
  0x24   : > { %p7488_p12 = pnand %p7487_p10, %p7486_p2  ;;  %p7493_p7 = por %p7492_p5, %p7491_p0 }
  0x26   : > { %p7489_p13 = pneg %p7488_p12 }
  0x28   : > { %p7494_p11 = pnand %p7493_p7, %p7489_p13 }
  0x2a   : > { %7497 = shalt.err (!%p7494_p11)
}
  0x2b   : > { %s10085_s26 = smov 4   ;;  %s10086_s27 = smov 64  }
  0x2c   : > { %7350 = dma.hbm_to_vmem [thread:$0]  (!%p7704_p9), %s221_s13, 2304, %s223_s12, %s211_s15, %s10086_s27, %s10086_s27, %s10085_s26  }
  0x2d   : > { %234 = sbr.rel (%p7665_p8) target bundleno = 1523 (0x5f3), region = 40 }
  0x32   : > { %s7727_s1 = sand.u32 1, %s7575_s19  }
  0x33   : > { %s7327_s11 = smul.u32 144, %s7727_s1  ;;  %s237_s10 = scalar_lea.sflag [#allocation4], %s7727_s1 }
  0x35   : > { %s7731_s8 = scalar_lea.vmem [#allocation3], %s7327_s11 }
  0x36   : > { %7558 = dma.done.wait (%p7652_p4), %s237_s10, 2304  }
  0x37   : > { %7560 = vsyncadd (%p7652_p4), %s237_s10, 4294964992 }
  0x38   : > { %7562 = dma.done.wait (%p43_p1), [#allocation7], 18432  }
  0x39   : > { %7564 = vsyncadd (%p43_p1), [#allocation7], 4294948864  ;;  %v281_v0 = vlaneseq  ;;  %v6883_v1 = vld [vmem:[#allocation6 + $0x38] sm:$0xff]  ;;  %v7589_v3 = vmov 0   ;;  %v6882_v4 = vld [vmem:[#allocation6 + $0x30] sm:$0xff]  ;;  %v10090_v32 = vmov 0 }
  0x3a   : > { %v6891_v2 = vld [vmem:[#allocation6 + $0x78] sm:$0xff]  ;;  %822 = vst [vmem:[#allocation2] sm:$0xf] %v7589_v3  ;;  %1496 = vmatpush.bf16.msra.mxu0 %v6883_v1  ;;  %7309 = vmatpush.bf16.msra.mxu2 %v6883_v1  ;;  %v6890_v6 = vld [vmem:[#allocation6 + $0x70] sm:$0xff]  ;;  %v6881_v9 = vld [vmem:[#allocation6 + $0x28] sm:$0xff]  ;;  %v10093_v34 = vmov 0 }
  0x3b   : > { %823 = vst [vmem:[#allocation2 + $0x4] sm:$0xf] %v7589_v3  ;;  %v7741_v5 = vshrl.u32 %v281_v0, 7  ;;  %7317 = vmatpush.bf16.msra.mxu3 %v6891_v2  ;;  %1778 = vmatpush.bf16.msra.mxu1 %v6891_v2  ;;  %v7744_v7 = vld [vmem:[%s7731_s8] sm:$0xff]   ;;  %v7747_v8 = vld [vmem:[%s7731_s8 + $0x8c] sm:$0xf] }
  0x3c   : > { %826 = vst [vmem:[#allocation2 + $0x8c] sm:$0xf] %v7589_v3  ;;  %v7751_v11 = vld [vmem:[%s7731_s8 + $0x3c] sm:$0xff]   ;;  %v9938_v13 = vunpack.c.l.bf16 %v7744_v7  ;;  %v9917_v14 = vunpack.c.l.bf16 %v7747_v8  ;;  %v7756_v15 = vld [vmem:[%s7731_s8 + $0x44] sm:$0xff]   ;;  %v9942_v20 = vunpack.c.h.bf16 %v7744_v7  ;;  %v7815_v52 = vld [vmem:[%s7731_s8 + $0x4c] sm:$0xff]   ;;  %s6100_s15 = sshll.u32 %s7727_s1, 7 }
  0x3d   : > { %10087 = vst [vmem:[#allocation13_spill] sm:$0xff] %v7741_v5  ;;  %v298_v10 = vadd.s32 128, %v7741_v5  ;;  %v6889_v12 = vld [vmem:[#allocation6 + $0x68] sm:$0xff]  ;;  %v9928_v16 = vunpack.c.l.bf16 %v7751_v11  ;;  %v9927_v17 = vunpack.c.h.bf16 %v7751_v11  ;;  %v322_v18 = vand.u32 15, %v7741_v5  ;;  %v6880_v19 = vld [vmem:[#allocation6 + $0x20] sm:$0xff]  ;;  %v6879_v28 = vld [vmem:[#allocation6 + $0x18] sm:$0xff] }
  0x3e   : > { %825 = vst [vmem:[#allocation2 + $0x88] sm:$0xf] %v7589_v3  ;;  %1497 = vmatpush.bf16.msra.mxu0 %v6882_v4  ;;  %7310 = vmatpush.bf16.msra.mxu2 %v6882_v4  ;;  %v9926_v22 = vunpack.c.l.bf16 %v7756_v15  ;;  %v6888_v23 = vld [vmem:[#allocation6 + $0x60] sm:$0xff]  ;;  %v899_v24 = vrot.slane %v9938_v13, 7  ;;  %v7767_v25 = vrot.slane %v9917_v14, 7  ;;  %vm9962_vm0 = vcmp.lt.s32.totalorder %v7741_v5, 1 }
  0x3f   : > { %10088 = vst [vmem:[#allocation14_spill] sm:$0xff] %v7747_v8  ;;  %7318 = vmatpush.bf16.msra.mxu3 %v6890_v6  ;;  %1779 = vmatpush.bf16.msra.mxu1 %v6890_v6  ;;  %v434_v21 = vand.u32 15, %v298_v10  ;;  %v7771_v26 = vrot.slane %v9928_v16, 7  ;;  %v915_v27 = vrot.slane %v9927_v17, 7  ;;  %v7778_v29 = vrot.slane %v9942_v20, 7  ;;  %v6887_v31 = vld [vmem:[#allocation6 + $0x58] sm:$0xff] }
  0x40   : > { %10089 = vst [vmem:[#allocation15_spill] sm:$0xff] %v7767_v25  ;;  %v7782_v30 = vrot.slane %v9926_v22, 7  ;;  %vm7784_vm1 = vcmp.eq.s32.totalorder %v322_v18, 0  ;;  %v971_v33 = vsel %vm9962_vm0, %v7767_v25, %v899_v24  ;;  %v6878_v36 = vld [vmem:[#allocation6 + $0x10] sm:$0xff]  ;;  %v7809_v42 = vld [vmem:[%s7731_s8 + $0x8] sm:$0xff]   ;;  %v284_v49 = vadd.s32 16, %v7741_v5 }
  0x41   : > { %v10091_v32 = vsel %vm7784_vm1, 4294967295, %v10090_v32  ;;  %vm7791_vm2 = vcmp.eq.s32.totalorder %v434_v21, 0  ;;  %v955_v35 = vsel %vm9962_vm0, %v7771_v26, %v915_v27  ;;  %v970_v37 = vsel %vm9962_vm0, %v899_v24, %v7778_v29  ;;  %v6886_v41 = vld [vmem:[#allocation6 + $0x50] sm:$0xff]  ;;  %v6877_v47 = vld [vmem:[#allocation6 + $0x8] sm:$0xff]  ;;  %v6876_v58 = vld [vmem:[#allocation6] sm:$0xff]  ;;  %s9808_s16 = scalar_lea.vmem [#allocation9], %s6100_s15 }
  0x42   : > { %1498 = vmatpush.bf16.msra.mxu0 %v6881_v9  ;;  %7311 = vmatpush.bf16.msra.mxu2 %v6881_v9  ;;  %10092 = vst [vmem:[#allocation16_spill] sm:$0xff] %v10091_v32  ;;  %v10094_v34 = vsel %vm7791_vm2, 4294967295, %v10093_v34  ;;  %v1044_v38 = vsel %vm7784_vm1, 0.0, %v971_v33  ;;  %v954_v39 = vsel %vm9962_vm0, %v915_v27, %v7782_v30  ;;  %v1060_v40 = vsel %vm7791_vm2, 0.0, %v955_v35  ;;  %v6885_v48 = vld [vmem:[#allocation6 + $0x48] sm:$0xff]  ;;  %v6884_v61 = vld [vmem:[#allocation6 + $0x40] sm:$0xff] }
  0x43   : > { %7319 = vmatpush.bf16.msra.mxu3 %v6889_v12  ;;  %1780 = vmatpush.bf16.msra.mxu1 %v6889_v12  ;;  %10095 = vst [vmem:[#allocation17_spill] sm:$0xff] %v10094_v34  ;;  %v1261_v43 = vpack.c.bf16 %v1044_v38, %v1044_v38  ;;  %v1262_v44 = vpack.c.bf16 %v970_v37, %v970_v37  ;;  %v9941_v50 = vunpack.c.l.bf16 %v7809_v42  ;;  %v300_v51 = vadd.s32 144, %v7741_v5  ;;  %v6899_v62 = vld [vmem:[#allocation6 + $0xb8] sm:$0xff]  ;;  %v6866_v9 = vld [vmem:[%s7731_s8 + $0x40] sm:$0xff]  ;;  %v7856_v37 = vld [vmem:[%s7731_s8 + $0x10] sm:$0xff]   ;;  %s7038_s6 = sshll.u32 %s7643_s22, 7 }
  0x44   : > { %v1277_v45 = vpack.c.bf16 %v1060_v40, %v1060_v40  ;;  %v1278_v46 = vpack.c.bf16 %v954_v39, %v954_v39  ;;  %v9925_v53 = vunpack.c.h.bf16 %v7756_v15  ;;  %v9940_v59 = vunpack.c.h.bf16 %v7809_v42  ;;  %v6907_v3 = vld [vmem:[#allocation6 + $0xf8] sm:$0xff]  ;;  %v6897_v38 = vld [vmem:[#allocation6 + $0xa8] sm:$0xff]  ;;  %s5995_s26 = scalar_lea.hbm %s9914_s5, %s7038_s6  ;;  %s5996_s27 = sshll.u32 %s9808_s16, 4  ;;  %s5997_s27 = int_to_ptr.vmem [resolvable:$true] %s5996_s27 }
  0x45   : > { %v1384_v54 = vunpack.c.l.b16 %v1261_v43  ;;  %v1385_v55 = vunpack.c.l.b16 %v1262_v44  ;;  %v9922_v60 = vunpack.c.l.bf16 %v7815_v52  ;;  %v336_v63 = vand.u32 15, %v284_v49  ;;  %v6915_v10 = vld [vmem:[#allocation6 + $0x138] sm:$0xff]  ;;  %v6905_v39 = vld [vmem:[#allocation6 + $0xe8] sm:$0xff]  ;;  %s5998_s11 = sshll.u32 %s5995_s26, 4  ;;  %s5984_s22 = scalar_lea.sflag [#allocation5], %s7727_s1  ;;  %s5999_s11 = int_to_ptr.hbm [resolvable:$true] %s5998_s11 }
  0x46   : > { %1499 = vmatpush.bf16.msra.mxu0 %v6880_v19  ;;  %7312 = vmatpush.bf16.msra.mxu2 %v6880_v19  ;;  %v1400_v56 = vunpack.c.l.b16 %v1277_v45  ;;  %v1401_v57 = vunpack.c.l.b16 %v1278_v46  ;;  %v901_v0 = vrot.slane %v9941_v50, 7  ;;  %v448_v1 = vand.u32 15, %v300_v51  ;;  %v6858_v19 = vld [vmem:[%s7731_s8] sm:$0xff]  ;;  %v7862_v49 = vld [vmem:[%s7731_s8 + $0x54] sm:$0xff]   ;;  %v8015_v17 = vld [vmem:[%s7731_s8 + $0x6c] sm:$0xff]   ;;  %s7527_s10 = sshra.s32 %s5999_s11, 4  ;;  %s7528_s10 = int_to_ptr.hbm [resolvable:$true] %s7527_s10 }
  0x47   : > { %7320 = vmatpush.bf16.msra.mxu3 %v6888_v23  ;;  %1781 = vmatpush.bf16.msra.mxu1 %v6888_v23  ;;  %v917_v2 = vrot.slane %v9925_v53, 7  ;;  %v1416_v4 = vpack.c.b16 %v1385_v55, %v1384_v54  ;;  %v902_v12 = vrot.slane %v9940_v59, 7  ;;  %v918_v18 = vrot.slane %v9922_v60, 7  ;;  %v8009_v53 = vld [vmem:[%s7731_s8 + $0x28] sm:$0xff]   ;;  %v6873_v25 = vld [vmem:[%s7731_s8 + $0x78] sm:$0xff]  ;;  %s7533_s30 = scalar_lea.hbm %s9914_s5, 256  ;;  %p7534_p11 = scmp.lt.s32.totalorder %s7528_s10, %s9914_s5 }
  0x48   : > { %v7824_v6 = vpack.c.b16 %v1401_v57, %v1400_v56  ;;  %vm7832_vm3 = vcmp.eq.s32.totalorder %v336_v63, 0  ;;  %v10097_v21 = vmov 0  ;;  %v969_v23 = vsel %vm9962_vm0, %v7778_v29, %v901_v0  ;;  %v6945_v32 = vld [vmem:[#allocation6 + $0x228] sm:$0xff] }
  0x49   : > { %v10098_v21 = vsel %vm7832_vm3, 4294967295, %v10097_v21  ;;  %vm7839_vm4 = vcmp.eq.s32.totalorder %v448_v1, 0  ;;  %v10100_v24 = vmov 0  ;;  %v953_v27 = vsel %vm9962_vm0, %v7782_v30, %v917_v2 }
  0x4a   : > { %1500 = vmatpush.bf16.msra.mxu0 %v6879_v28  ;;  %7313 = vmatpush.bf16.msra.mxu2 %v6879_v28  ;;  %10096 = vst [vmem:[#allocation18_spill] sm:$0xff] %v7824_v6  ;;  %v10101_v24 = vsel %vm7839_vm4, 4294967295, %v10100_v24  ;;  %v6898_v28 = vld [vmem:[#allocation6 + $0xb0] sm:$0xff]  ;;  %v968_v29 = vsel %vm9962_vm0, %v901_v0, %v902_v12  ;;  %v1046_v33 = vsel %vm7832_vm3, 0.0, %v969_v23  ;;  %v952_v35 = vsel %vm9962_vm0, %v917_v2, %v918_v18 }
  0x4b   : > { %7321 = vmatpush.bf16.msra.mxu3 %v6887_v31  ;;  %1782 = vmatpush.bf16.msra.mxu1 %v6887_v31  ;;  %10099 = vst [vmem:[#allocation19_spill] sm:$0xff] %v10098_v21  ;;  %v6906_v31 = vld [vmem:[#allocation6 + $0xf0] sm:$0xff]  ;;  %v1062_v30 = vsel %vm7839_vm4, 0.0, %v953_v27  ;;  %v1263_v40 = vpack.c.bf16 %v1046_v33, %v1046_v33  ;;  %v1280_v44 = vpack.c.bf16 %v952_v35, %v952_v35  ;;  %v286_v45 = vadd.s32 32, %v7741_v5  ;;  %v7887_v27 = vld [vmem:[%s7731_s8 + $0x8] sm:$0xff] }
  0x4c   : > { %10102 = vst [vmem:[#allocation20_spill] sm:$0xff] %v10101_v24  ;;  %v1279_v43 = vpack.c.bf16 %v1062_v30, %v1062_v30  ;;  %v9939_v46 = vunpack.c.l.bf16 %v7856_v37  ;;  %v9921_v51 = vunpack.c.h.bf16 %v7815_v52  ;;  %v9920_v63 = vunpack.c.l.bf16 %v7862_v49  ;;  %v6896_v30 = vld [vmem:[#allocation6 + $0xa0] sm:$0xff] }
  0x4d   : > { %v1386_v54 = vunpack.c.l.b16 %v1263_v40  ;;  %v1403_v57 = vunpack.c.l.b16 %v1280_v44  ;;  %v288_v44 = vadd.s32 48, %v7741_v5  ;;  %v9937_v22 = vunpack.c.l.bf16 %v8009_v53 }
  0x4e   : > { %1501 = vmatpush.bf16.msra.mxu0 %v6878_v36  ;;  %7314 = vmatpush.bf16.msra.mxu2 %v6878_v36  ;;  %v6914_v36 = vld [vmem:[#allocation6 + $0x130] sm:$0xff]  ;;  %v1402_v56 = vunpack.c.l.b16 %v1279_v43  ;;  %v919_v1 = vrot.slane %v9921_v51, 7  ;;  %v920_v23 = vrot.slane %v9920_v63, 7  ;;  %v310_v13 = vadd.s32 224, %v7741_v5 }
  0x4f   : > { %7322 = vmatpush.bf16.msra.mxu3 %v6886_v41  ;;  %1783 = vmatpush.bf16.msra.mxu1 %v6886_v41  ;;  %v1264_v41 = vpack.c.bf16 %v968_v29, %v968_v29 }
  0x50   : > { %v950_v33 = vsel %vm9962_vm0, %v919_v1, %v920_v23  ;;  %v518_v50 = vand.u32 15, %v310_v13 }
  0x51   : > { %v1387_v55 = vunpack.c.l.b16 %v1264_v41  ;;  %v1282_v43 = vpack.c.bf16 %v950_v33, %v950_v33 }
  0x52   : > { %1502 = vmatpush.bf16.msra.mxu0 %v6877_v47  ;;  %7315 = vmatpush.bf16.msra.mxu2 %v6877_v47  ;;  %v6913_v47 = vld [vmem:[#allocation6 + $0x128] sm:$0xff]  ;;  %vm8093_vm14 = vcmp.eq.s32.totalorder %v518_v50, 0 }
  0x53   : > { %7323 = vmatpush.bf16.msra.mxu3 %v6885_v48  ;;  %1784 = vmatpush.bf16.msra.mxu1 %v6885_v48  ;;  %v302_v48 = vadd.s32 160, %v7741_v5  ;;  %v7871_v2 = vpack.c.b16 %v1387_v55, %v1386_v54  ;;  %v9919_v54 = vunpack.c.h.bf16 %v7862_v49 }
  0x55   : > { %v462_v0 = vand.u32 15, %v302_v48  ;;  %v7913_v48 = vld [vmem:[%s7731_s8 + $0x5c] sm:$0xff]  }
  0x56   : > { %1503 = vmatpush.bf16.msra.mxu0 %v6876_v58  ;;  %7316 = vmatpush.bf16.msra.mxu2 %v6876_v58  ;;  %v350_v58 = vand.u32 15, %v286_v45  ;;  %v9924_v14 = vunpack.c.h.bf16 %v7913_v48 }
  0x57   : > { %7324 = vmatpush.bf16.msra.mxu3 %v6884_v61  ;;  %1785 = vmatpush.bf16.msra.mxu1 %v6884_v61  ;;  %v9933_v61 = vunpack.c.h.bf16 %v7856_v37  ;;  %vm7889_vm6 = vcmp.eq.s32.totalorder %v462_v0, 0  ;;  %v9918_v0 = vunpack.c.l.bf16 %v7913_v48 }
  0x58   : > { %vm7876_vm5 = vcmp.eq.s32.totalorder %v350_v58, 0  ;;  %v1405_v58 = vunpack.c.l.b16 %v1282_v43  ;;  %v923_v63 = vrot.slane %v9924_v14, 7 }
  0x59   : > { %1504 = vmatmul.bf16.vlgmr.msra.gmra.mxu0 %v1416_v4  ;;  %1544 = vmatmul.bf16.vlgmr.msra.gmra.mxu2 %v7824_v6  ;;  %v6867_v4 = vld [vmem:[%s7731_s8 + $0x48] sm:$0xff] }
  0x5a   : > { %2060 = vmatpush.bf16.msrb.mxu2 %v6899_v62  ;;  %1826 = vmatmul.bf16.vlgmr.msra.gmra.mxu3 %v6866_v9  ;;  %v903_v62 = vrot.slane %v9939_v46, 7  ;;  %v10104_v9 = vmov 0  ;;  %v8066_v46 = vld [vmem:[%s7731_s8 + $0x74] sm:$0xff]  }
  0x5b   : > { %2252 = vmatpush.bf16.msrb.mxu3 %v6907_v3  ;;  %2444 = vmatpush.bf16.msrb.mxu0 %v6915_v10  ;;  %v7873_v3 = vpack.c.b16 %v1403_v57, %v1402_v56  ;;  %v10105_v9 = vsel %vm7876_vm5, 4294967295, %v10104_v9  ;;  %v904_v10 = vrot.slane %v9933_v61, 7  ;;  %v9958_v24 = vunpack.c.h.bf16 %v8066_v46 }
  0x5c   : > { %1786 = vmatmul.bf16.vlgmr.msra.gmra.mxu1 %v6858_v19  ;;  %10106 = vst [vmem:[#allocation22_spill] sm:$0xff] %v10105_v9  ;;  %v967_v19 = vsel %vm9962_vm0, %v902_v12, %v903_v62 }
  0x5d   : > { %10103 = vst [vmem:[#allocation21_spill] sm:$0xff] %v7873_v3  ;;  %v1048_v12 = vsel %vm7876_vm5, 0.0, %v967_v19  ;;  %v966_v29 = vsel %vm9962_vm0, %v903_v62, %v904_v10 }
  0x5e   : > { %2061 = vmatpush.bf16.msrb.mxu2 %v6898_v28  ;;  %v10107_v28 = vmov 0  ;;  %v1266_v40 = vpack.c.bf16 %v966_v29, %v966_v29 }
  0x5f   : > { %2253 = vmatpush.bf16.msrb.mxu3 %v6906_v31  ;;  %2445 = vmatpush.bf16.msrb.mxu0 %v6914_v36  ;;  %v10108_v28 = vsel %vm7889_vm6, 4294967295, %v10107_v28  ;;  %v951_v31 = vsel %vm9962_vm0, %v918_v18, %v919_v1  ;;  %v6904_v18 = vld [vmem:[#allocation6 + $0xe0] sm:$0xff]  ;;  %v364_v1 = vand.u32 15, %v288_v44 }
  0x60   : > { %10109 = vst [vmem:[#allocation23_spill] sm:$0xff] %v10108_v28  ;;  %v1064_v35 = vsel %vm7889_vm6, 0.0, %v951_v31  ;;  %v6912_v36 = vld [vmem:[#allocation6 + $0x120] sm:$0xff]  ;;  %v1389_v56 = vunpack.c.l.b16 %v1266_v40  ;;  %v921_v31 = vrot.slane %v9919_v54, 7  ;;  %v10113_v40 = vmov 0 }
  0x61   : > { %v1281_v41 = vpack.c.bf16 %v1064_v35, %v1064_v35  ;;  %v6868_v35 = vld [vmem:[%s7731_s8 + $0x50] sm:$0xff]  ;;  %vm7934_vm7 = vcmp.eq.s32.totalorder %v364_v1, 0  ;;  %v8117_v28 = vld [vmem:[%s7731_s8 + $0x7c] sm:$0xf] }
  0x62   : > { %2062 = vmatpush.bf16.msrb.mxu2 %v6897_v38  ;;  %v1265_v38 = vpack.c.bf16 %v1048_v12, %v1048_v12 }
  0x63   : > { %2254 = vmatpush.bf16.msrb.mxu3 %v6905_v39  ;;  %2446 = vmatpush.bf16.msrb.mxu0 %v6913_v47  ;;  %v7907_v39 = vld [vmem:[%s7731_s8 + $0x18] sm:$0xff]   ;;  %v304_v47 = vadd.s32 176, %v7741_v5  ;;  %v1404_v57 = vunpack.c.l.b16 %v1281_v41  ;;  %v949_v41 = vsel %vm9962_vm0, %v920_v23, %v921_v31 }
  0x64   : > { %v9932_v45 = vunpack.c.l.bf16 %v7907_v39  ;;  %v1388_v55 = vunpack.c.l.b16 %v1265_v38  ;;  %v9931_v62 = vunpack.c.h.bf16 %v7907_v39  ;;  %v6903_v23 = vld [vmem:[#allocation6 + $0xd8] sm:$0xff] }
  0x65   : > { %v476_v19 = vand.u32 15, %v304_v47  ;;  %v7924_v29 = vpack.c.b16 %v1405_v58, %v1404_v57  ;;  %v7958_v58 = vld [vmem:[%s7731_s8 + $0x20] sm:$0xff]  }
  0x66   : > { %2063 = vmatpush.bf16.msrb.mxu2 %v6896_v30  ;;  %v7922_v12 = vpack.c.b16 %v1389_v56, %v1388_v55  ;;  %v906_v33 = vrot.slane %v9931_v62, 7  ;;  %v922_v30 = vrot.slane %v9918_v0, 7  ;;  %v6895_v55 = vld [vmem:[#allocation6 + $0x98] sm:$0xff] }
  0x67   : > { %2255 = vmatpush.bf16.msrb.mxu3 %v6904_v18  ;;  %2447 = vmatpush.bf16.msrb.mxu0 %v6912_v36  ;;  %v7932_v18 = vld [vmem:[%s7731_s8 + $0x10] sm:$0xff]  ;;  %v10110_v36 = vmov 0  ;;  %vm7940_vm8 = vcmp.eq.s32.totalorder %v476_v19, 0  ;;  %v6911_v56 = vld [vmem:[#allocation6 + $0x118] sm:$0xff] }
  0x68   : > { %v10111_v36 = vsel %vm7934_vm7, 4294967295, %v10110_v36  ;;  %v10114_v40 = vsel %vm7940_vm8, 4294967295, %v10113_v40  ;;  %v1066_v47 = vsel %vm7940_vm8, 0.0, %v949_v41  ;;  %v7964_v41 = vld [vmem:[%s7731_s8 + $0x64] sm:$0xff]  }
  0x69   : > { %1509 = vmatmul.bf16.gmra.mxu0 %v7871_v2  ;;  %1549 = vmatmul.bf16.gmra.mxu2 %v7873_v3  ;;  %10112 = vst [vmem:[#allocation24_spill] sm:$0xff] %v10111_v36  ;;  %v9935_v16 = vunpack.c.h.bf16 %v7964_v41 }
  0x6a   : > { %1831 = vmatmul.bf16.gmra.mxu3 %v6867_v4  ;;  %v905_v4 = vrot.slane %v9932_v45, 7  ;;  %10115 = vst [vmem:[#allocation25_spill] sm:$0xff] %v10114_v40  ;;  %2064 = vmatpush.bf16.msrb.mxu2 %v6895_v55 }
  0x6b   : > { %2256 = vmatpush.bf16.msrb.mxu3 %v6903_v23  ;;  %2448 = vmatpush.bf16.msrb.mxu0 %v6911_v56  ;;  %v925_v62 = vrot.slane %v9935_v16, 7  ;;  %v6923_v16 = vld [vmem:[#allocation6 + $0x178] sm:$0xff] }
  0x6c   : > { %1791 = vmatmul.bf16.gmra.mxu1 %v7887_v27  ;;  %v965_v38 = vsel %vm9962_vm0, %v904_v10, %v905_v4  ;;  %v964_v43 = vsel %vm9962_vm0, %v905_v4, %v906_v33  ;;  %v948_v10 = vsel %vm9962_vm0, %v921_v31, %v922_v30  ;;  %v1283_v4 = vpack.c.bf16 %v1066_v47, %v1066_v47 }
  0x6d   : > { %v1050_v44 = vsel %vm7934_vm7, 0.0, %v965_v38  ;;  %v1268_v57 = vpack.c.bf16 %v964_v43, %v964_v43  ;;  %v1284_v19 = vpack.c.bf16 %v948_v10, %v948_v10  ;;  %v290_v31 = vadd.s32 64, %v7741_v5  ;;  %2636 = vmatpush.bf16.msrb.mxu1 %v6923_v16 }
  0x6e   : > { %v1267_v1 = vpack.c.bf16 %v1050_v44, %v1050_v44  ;;  %v306_v38 = vadd.s32 192, %v7741_v5  ;;  %v1406_v55 = vunpack.c.l.b16 %v1283_v4  ;;  %v9929_v44 = vunpack.c.h.bf16 %v7958_v58 }
  0x6f   : > { %v1391_v43 = vunpack.c.l.b16 %v1268_v57  ;;  %v1407_v23 = vunpack.c.l.b16 %v1284_v19  ;;  %v9923_v10 = vunpack.c.l.bf16 %v7964_v41  ;;  %v378_v47 = vand.u32 15, %v290_v31  ;;  %v7983_v19 = vld [vmem:[%s7731_s8 + $0x18] sm:$0xff] }
  0x70   : > { %v1390_v0 = vunpack.c.l.b16 %v1267_v1  ;;  %v490_v54 = vand.u32 15, %v306_v38  ;;  %v908_v57 = vrot.slane %v9929_v44, 7  ;;  %v6869_v1 = vld [vmem:[%s7731_s8 + $0x58] sm:$0xff]  ;;  %v10116_v31 = vmov 0 }
  0x71   : > { %v7975_v60 = vpack.c.b16 %v1407_v23, %v1406_v55  ;;  %v924_v4 = vrot.slane %v9923_v10, 7  ;;  %vm7985_vm9 = vcmp.eq.s32.totalorder %v378_v47, 0  ;;  %v10119_v38 = vmov 0  ;;  %v6894_v47 = vld [vmem:[#allocation6 + $0x90] sm:$0xff] }
  0x72   : > { %v7973_v51 = vpack.c.b16 %v1391_v43, %v1390_v0  ;;  %v10117_v31 = vsel %vm7985_vm9, 4294967295, %v10116_v31  ;;  %vm7991_vm10 = vcmp.eq.s32.totalorder %v490_v54, 0  ;;  %v947_v43 = vsel %vm9962_vm0, %v922_v30, %v923_v63  ;;  %v6902_v30 = vld [vmem:[#allocation6 + $0xd0] sm:$0xff]  ;;  %2065 = vmatpush.bf16.msrb.mxu2 %v6894_v47 }
  0x73   : > { %10118 = vst [vmem:[#allocation26_spill] sm:$0xff] %v10117_v31  ;;  %v10120_v38 = vsel %vm7991_vm10, 4294967295, %v10119_v38  ;;  %v946_v54 = vsel %vm9962_vm0, %v923_v63, %v924_v4  ;;  %v6910_v10 = vld [vmem:[#allocation6 + $0x110] sm:$0xff]  ;;  %2257 = vmatpush.bf16.msrb.mxu3 %v6902_v30  ;;  %v292_v63 = vadd.s32 80, %v7741_v5  ;;  %v9945_v16 = vunpack.c.l.bf16 %v8066_v46 }
  0x74   : > { %10121 = vst [vmem:[#allocation27_spill] sm:$0xff] %v10120_v38  ;;  %2449 = vmatpush.bf16.msrb.mxu0 %v6910_v10  ;;  %v9934_v10 = vunpack.c.l.bf16 %v8015_v17  ;;  %v6946_v31 = vld [vmem:[#allocation6 + $0x230] sm:$0xff] }
  0x79   : > { %1514 = vmatmul.bf16.gmra.mxu0 %v7922_v12  ;;  %1554 = vmatmul.bf16.gmra.mxu2 %v7924_v29 }
  0x7a   : > { %1836 = vmatmul.bf16.gmra.mxu3 %v6868_v35  ;;  %v9930_v35 = vunpack.c.l.bf16 %v7958_v58 }
  0x7c   : > { %1796 = vmatmul.bf16.gmra.mxu1 %v7932_v18  ;;  %v907_v56 = vrot.slane %v9930_v35, 7 }
  0x7e   : > { %v963_v0 = vsel %vm9962_vm0, %v906_v33, %v907_v56  ;;  %v962_v55 = vsel %vm9962_vm0, %v907_v56, %v908_v57  ;;  %v1068_v33 = vsel %vm7991_vm10, 0.0, %v947_v43  ;;  %v308_v43 = vadd.s32 208, %v7741_v5 }
  0x7f   : > { %v1052_v23 = vsel %vm7985_vm9, 0.0, %v963_v0  ;;  %v1270_v14 = vpack.c.bf16 %v962_v55, %v962_v55  ;;  %v1286_v0 = vpack.c.bf16 %v946_v54, %v946_v54  ;;  %v392_v54 = vand.u32 15, %v292_v63 }
  0x80   : > { %v1269_v56 = vpack.c.bf16 %v1052_v23, %v1052_v23  ;;  %v9936_v23 = vunpack.c.h.bf16 %v8009_v53  ;;  %v504_v35 = vand.u32 15, %v308_v43  ;;  %v10123_v63 = vmov 0 }
  0x81   : > { %v1393_v55 = vunpack.c.l.b16 %v1270_v14  ;;  %v1409_v30 = vunpack.c.l.b16 %v1286_v0  ;;  %v8034_v0 = vld [vmem:[%s7731_s8 + $0x20] sm:$0xff]  ;;  %vm8036_vm11 = vcmp.eq.s32.totalorder %v392_v54, 0  ;;  %v6893_v54 = vld [vmem:[#allocation6 + $0x88] sm:$0xff]  ;;  %vm10160_vm10 = vcmp.lt.s32.totalorder %v7741_v5, 7 }
  0x82   : > { %v1392_v44 = vunpack.c.l.b16 %v1269_v56  ;;  %v910_v14 = vrot.slane %v9936_v23, 7  ;;  %v6870_v56 = vld [vmem:[%s7731_s8 + $0x60] sm:$0xff]  ;;  %v10124_v63 = vsel %vm8036_vm11, 4294967295, %v10123_v63  ;;  %vm8042_vm12 = vcmp.eq.s32.totalorder %v504_v35, 0  ;;  %2066 = vmatpush.bf16.msrb.mxu2 %v6893_v54  ;;  %vm10161_vm8 = vmmov %vm10160_vm10 }
  0x83   : > { %10125 = vst [vmem:[#allocation29_spill] sm:$0xff] %v10124_v63  ;;  %vm10167_vm6 = vmmov %vm10160_vm10 }
  0x84   : > { %v8024_v45 = vpack.c.b16 %v1393_v55, %v1392_v44  ;;  %v10126_v44 = vmov 0  ;;  %v945_v55 = vsel %vm9962_vm0, %v924_v4, %v925_v62  ;;  %v6909_v4 = vld [vmem:[#allocation6 + $0x108] sm:$0xff]  ;;  %vm10173_vm4 = vmmov %vm10160_vm10 }
  0x85   : > { %v10127_v44 = vsel %vm8042_vm12, 4294967295, %v10126_v44  ;;  %2450 = vmatpush.bf16.msrb.mxu0 %v6909_v4  ;;  %vm10181_vm2 = vmmov %vm10160_vm10 }
  0x86   : > { %10122 = vst [vmem:[#allocation28_spill] sm:$0xff] %v8024_v45 }
  0x87   : > { %10128 = vst [vmem:[#allocation30_spill] sm:$0xff] %v10127_v44 }
  0x89   : > { %1519 = vmatmul.bf16.gmra.mxu0 %v7973_v51  ;;  %1559 = vmatmul.bf16.gmra.mxu2 %v7975_v60 }
  0x8a   : > { %1841 = vmatmul.bf16.gmra.mxu3 %v6869_v1  ;;  %v1285_v1 = vpack.c.bf16 %v1068_v33, %v1068_v33  ;;  %v909_v33 = vrot.slane %v9937_v22, 7  ;;  %v8060_v22 = vld [vmem:[%s7731_s8 + $0x30] sm:$0xff]  }
  0x8c   : > { %1801 = vmatmul.bf16.gmra.mxu1 %v7983_v19  ;;  %v1408_v47 = vunpack.c.l.b16 %v1285_v1  ;;  %v926_v1 = vrot.slane %v9934_v10, 7  ;;  %v961_v43 = vsel %vm9962_vm0, %v908_v57, %v909_v33  ;;  %v1070_v57 = vsel %vm8042_vm12, 0.0, %v945_v55  ;;  %v6901_v10 = vld [vmem:[#allocation6 + $0xc8] sm:$0xff] }
  0x8d   : > { %2258 = vmatpush.bf16.msrb.mxu3 %v6901_v10  ;;  %v9948_v55 = vunpack.c.l.bf16 %v8060_v22 }
  0x8e   : > { %v8026_v61 = vpack.c.b16 %v1409_v30, %v1408_v47  ;;  %v960_v47 = vsel %vm9962_vm0, %v909_v33, %v910_v14  ;;  %v1054_v30 = vsel %vm8036_vm11, 0.0, %v961_v43  ;;  %v944_v35 = vsel %vm9962_vm0, %v925_v62, %v926_v1 }
  0x8f   : > { %v1272_v23 = vpack.c.bf16 %v960_v47, %v960_v47  ;;  %v1271_v33 = vpack.c.bf16 %v1054_v30, %v1054_v30  ;;  %v1288_v43 = vpack.c.bf16 %v944_v35, %v944_v35  ;;  %v294_v62 = vadd.s32 96, %v7741_v5 }
  0x90   : > { %v9946_v47 = vunpack.c.h.bf16 %v8015_v17  ;;  %v9947_v35 = vunpack.c.h.bf16 %v8060_v22  ;;  %v911_v4 = vrot.slane %v9948_v55, 7 }
  0x91   : > { %v1395_v59 = vunpack.c.l.b16 %v1272_v23  ;;  %v1394_v54 = vunpack.c.l.b16 %v1271_v33  ;;  %v1411_v30 = vunpack.c.l.b16 %v1288_v43  ;;  %v6871_v33 = vld [vmem:[%s7731_s8 + $0x68] sm:$0xff] }
  0x92   : > { %v927_v20 = vrot.slane %v9946_v47, 7  ;;  %v912_v23 = vrot.slane %v9947_v35, 7  ;;  %v8085_v43 = vld [vmem:[%s7731_s8 + $0x28] sm:$0xff]  ;;  %v959_v13 = vsel %vm9962_vm0, %v910_v14, %v911_v4  ;;  %v8111_v47 = vld [vmem:[%s7731_s8 + $0x38] sm:$0xf]  ;;  %v6908_v35 = vld [vmem:[#allocation6 + $0x100] sm:$0xff] }
  0x93   : > { %v8075_v44 = vpack.c.b16 %v1395_v59, %v1394_v54  ;;  %v10132_v59 = vmov 0  ;;  %2451 = vmatpush.bf16.msrb.mxu0 %v6908_v35 }
  0x94   : > { %v10133_v59 = vsel %vm8093_vm14, 4294967295, %v10132_v59  ;;  %v943_v54 = vsel %vm9962_vm0, %v926_v1, %v927_v20  ;;  %v6900_v1 = vld [vmem:[#allocation6 + $0xc0] sm:$0xff] }
  0x95   : > { %10134 = vst [vmem:[#allocation32_spill] sm:$0xff] %v10133_v59  ;;  %v1072_v14 = vsel %vm8093_vm14, 0.0, %v943_v54  ;;  %2259 = vmatpush.bf16.msrb.mxu3 %v6900_v1  ;;  %v9959_v54 = vunpack.c.l.bf16 %v8111_v47  ;;  %v312_v59 = vadd.s32 240, %v7741_v5  ;;  %v9957_v1 = vunpack.c.l.bf16 %v8117_v28 }
  0x97   : > { %v913_v35 = vrot.slane %v9959_v54, 7  ;;  %v532_v34 = vand.u32 15, %v312_v59  ;;  %v8138_v59 = vrot.slane %v9957_v1, 7 }
  0x99   : > { %1524 = vmatmul.bf16.gmra.mxu0 %v8024_v45  ;;  %1564 = vmatmul.bf16.gmra.mxu2 %v8026_v61  ;;  %vm8143_vm14 = vcmp.eq.s32.totalorder %v532_v34, 0 }
  0x9a   : > { %1846 = vmatmul.bf16.gmra.mxu3 %v6870_v56  ;;  %v1287_v56 = vpack.c.bf16 %v1070_v57, %v1070_v57  ;;  %v406_v57 = vand.u32 15, %v294_v62  ;;  %v10129_v62 = vmov 0 }
  0x9c   : > { %1806 = vmatmul.bf16.gmra.mxu1 %v8034_v0  ;;  %v1410_v10 = vunpack.c.l.b16 %v1287_v56  ;;  %v928_v56 = vrot.slane %v9945_v16, 7  ;;  %vm8087_vm13 = vcmp.eq.s32.totalorder %v406_v57, 0  ;;  %v6892_v16 = vld [vmem:[#allocation6 + $0x80] sm:$0xff] }
  0x9d   : > { %v10130_v62 = vsel %vm8087_vm13, 4294967295, %v10129_v62  ;;  %v1056_v57 = vsel %vm8087_vm13, 0.0, %v959_v13  ;;  %2067 = vmatpush.bf16.msrb.mxu2 %v6892_v16  ;;  %v1289_v13 = vpack.c.bf16 %v1072_v14, %v1072_v14  ;;  %v6920_v16 = vld [vmem:[#allocation6 + $0x160] sm:$0xff] }
  0x9e   : > { %v8077_v38 = vpack.c.b16 %v1411_v30, %v1410_v10  ;;  %10131 = vst [vmem:[#allocation31_spill] sm:$0xff] %v10130_v62  ;;  %v958_v10 = vsel %vm9962_vm0, %v911_v4, %v912_v23  ;;  %v6922_v30 = vld [vmem:[#allocation6 + $0x170] sm:$0xff]  ;;  %v942_v50 = vsel %vm9962_vm0, %v927_v20, %v928_v56  ;;  %v1273_v55 = vpack.c.bf16 %v1056_v57, %v1056_v57 }
  0x9f   : > { %v1274_v4 = vpack.c.bf16 %v958_v10, %v958_v10  ;;  %2637 = vmatpush.bf16.msrb.mxu1 %v6922_v30  ;;  %v1290_v40 = vpack.c.bf16 %v942_v50, %v942_v50  ;;  %v296_v20 = vadd.s32 112, %v7741_v5  ;;  %v1412_v57 = vunpack.c.l.b16 %v1289_v13 }
  0xa0   : > { %v1396_v10 = vunpack.c.l.b16 %v1273_v55  ;;  %v929_v62 = vrot.slane %v9958_v24, 7  ;;  %v6919_v55 = vld [vmem:[#allocation6 + $0x158] sm:$0xff]  ;;  %v10136_v13 = vmov 0 }
  0xa1   : > { %v1397_v30 = vunpack.c.l.b16 %v1274_v4  ;;  %v1413_v50 = vunpack.c.l.b16 %v1290_v40  ;;  %v420_v14 = vand.u32 15, %v296_v20  ;;  %v6872_v4 = vld [vmem:[%s7731_s8 + $0x70] sm:$0xff]  ;;  %v957_v40 = vsel %vm9962_vm0, %v912_v23, %v913_v35 }
  0xa2   : > { %v8141_v20 = vld [vmem:[%s7731_s8 + $0x30] sm:$0xff]  ;;  %v956_v23 = vsel %vm9962_vm0, %v913_v35, %v7771_v26  ;;  %v940_v34 = vsel %vm9962_vm0, %v929_v62, %v8138_v59 }
  0xa3   : > { %v8125_v63 = vpack.c.b16 %v1397_v30, %v1396_v10  ;;  %vm8130_vm15 = vcmp.eq.s32.totalorder %v420_v14, 0  ;;  %v941_v10 = vsel %vm9962_vm0, %v928_v56, %v929_v62  ;;  %v6939_v14 = vld [vmem:[#allocation6 + $0x1f8] sm:$0xff]  ;;  %v1276_v1 = vpack.c.bf16 %v956_v23, %v956_v23 }
  0xa4   : > { %v10137_v13 = vsel %vm8130_vm15, 4294967295, %v10136_v13  ;;  %v1058_v30 = vsel %vm8130_vm15, 0.0, %v957_v40  ;;  %v1074_v56 = vsel %vm8143_vm14, 0.0, %v941_v10  ;;  %v1292_v35 = vpack.c.bf16 %v940_v34, %v940_v34  ;;  %3020 = vmatpush.bf16.msra.mxu3 %v6939_v14  ;;  %v6917_v40 = vld [vmem:[#allocation6 + $0x148] sm:$0xff]  ;;  %vm10189_vm15 = vmmov %vm10160_vm10 }
  0xa5   : > { %10135 = vst [vmem:[#allocation33_spill] sm:$0xff] %v8125_v63  ;;  %v1291_v26 = vpack.c.bf16 %v1074_v56, %v1074_v56  ;;  %v1399_v54 = vunpack.c.l.b16 %v1276_v1  ;;  %v10143_v34 = vunpack.c.l.bf16 %v7809_v42  ;;  %vm9969_vm0 = vcmp.lt.s32.totalorder %v7741_v5, 7 }
  0xa6   : > { %10138 = vst [vmem:[#allocation34_spill] sm:$0xff] %v10137_v13  ;;  %v1415_v10 = vunpack.c.l.b16 %v1292_v35  ;;  %v6947_v13 = vld [vmem:[#allocation6 + $0x238] sm:$0xff] }
  0xa7   : > { %v1414_v62 = vunpack.c.l.b16 %v1291_v26  ;;  %3212 = vmatpush.bf16.msra.mxu0 %v6947_v13  ;;  %v10145_v26 = vunpack.c.h.bf16 %v7809_v42  ;;  %v8183_v13 = vld [vmem:[%s7731_s8 + $0x38] sm:$0xff]  ;;  %v10152_v42 = vmov 0 }
  0xa9   : > { %1529 = vmatmul.bf16.gmra.mxu0 %v8075_v44  ;;  %1569 = vmatmul.bf16.gmra.mxu2 %v8077_v38  ;;  %v8171_v1 = vpack.c.b16 %v1415_v10, %v1414_v62  ;;  %v1083_v35 = vrot.slane %v10145_v26, 1 }
  0xaa   : > { %1851 = vmatmul.bf16.gmra.mxu3 %v6871_v33  ;;  %v6921_v33 = vld [vmem:[#allocation6 + $0x168] sm:$0xff] }
  0xab   : > { %2638 = vmatpush.bf16.msrb.mxu1 %v6921_v33  ;;  %v8127_v33 = vpack.c.b16 %v1413_v50, %v1412_v57  ;;  %v6918_v57 = vld [vmem:[#allocation6 + $0x150] sm:$0xff]  ;;  %v6931_v50 = vld [vmem:[#allocation6 + $0x1b8] sm:$0xff]  ;;  %3213 = vmatpush.bf16.msra.mxu0 %v6946_v31 }
  0xac   : > { %1811 = vmatmul.bf16.gmra.mxu1 %v8085_v43  ;;  %2828 = vmatpush.bf16.msra.mxu2 %v6931_v50  ;;  %v1082_v50 = vrot.slane %v10143_v34, 1 }
  0xae   : > { %v1149_v10 = vsel %vm9969_vm0, %v1082_v50, %v1083_v35 }
  0xaf   : > { %2639 = vmatpush.bf16.msrb.mxu1 %v6920_v16  ;;  %v10139_v16 = vmov 0  ;;  %3214 = vmatpush.bf16.msra.mxu0 %v6945_v32 }
  0xb0   : > { %v10140_v16 = vsel %vm8143_vm14, 4294967295, %v10139_v16 }
  0xb1   : > { %10141 = vst [vmem:[#allocation35_spill] sm:$0xff] %v10140_v16  ;;  %v6916_v16 = vld [vmem:[#allocation6 + $0x140] sm:$0xff] }
  0xb3   : > { %2640 = vmatpush.bf16.msrb.mxu1 %v6919_v55  ;;  %v1275_v55 = vpack.c.bf16 %v1058_v30, %v1058_v30  ;;  %v285_v30 = vadd.s32 24, %v7741_v5 }
  0xb5   : > { %v1398_v24 = vunpack.c.l.b16 %v1275_v55  ;;  %v343_v55 = vand.u32 15, %v285_v30 }
  0xb7   : > { %2641 = vmatpush.bf16.msrb.mxu1 %v6918_v57  ;;  %v10142_v57 = vunpack.c.h.bf16 %v7744_v7  ;;  %v8168_v14 = vpack.c.b16 %v1399_v54, %v1398_v24  ;;  %v10149_v24 = vmov 0  ;;  %vm8193_vm12 = vcmp.eq.s32.totalorder %v343_v55, 15 }
  0xb8   : > { %v10153_v42 = vsel %vm8193_vm12, 4294967295, %v10152_v42  ;;  %v1299_v55 = vpack.c.bf16 %v1149_v10, %v1149_v10 }
  0xb9   : > { %1534 = vmatmul.bf16.gmra.mxu0 %v8125_v63  ;;  %1574 = vmatmul.bf16.gmra.mxu2 %v8127_v33  ;;  %v1081_v56 = vrot.slane %v10142_v57, 1  ;;  %10144 = vst [vmem:[#allocation36_spill] sm:$0xff] %v8168_v14  ;;  %v10147_v57 = vunpack.c.l.bf16 %v7744_v7 }
  0xba   : > { %1856 = vmatmul.bf16.gmra.mxu3 %v6872_v4  ;;  %v283_v4 = vadd.s32 8, %v7741_v5  ;;  %10154 = vst [vmem:[#allocation39_spill] sm:$0xff] %v10153_v42  ;;  %v10168_v42 = vunpack.c.h.bf16 %v7958_v58 }
  0xbb   : > { %2642 = vmatpush.bf16.msrb.mxu1 %v6917_v40  ;;  %v10146_v40 = vunpack.c.l.bf16 %v7856_v37  ;;  %v8180_v8 = vrot.slane %v10147_v57, 1  ;;  %v1150_v54 = vsel %vm9969_vm0, %v1081_v56, %v1082_v50  ;;  %v287_v57 = vadd.s32 40, %v7741_v5 }
  0xbc   : > { %1816 = vmatmul.bf16.gmra.mxu1 %v8141_v20  ;;  %v329_v23 = vand.u32 15, %v283_v4 }
  0xbd   : > { %v1084_v4 = vrot.slane %v10146_v40, 1  ;;  %10148 = vst [vmem:[#allocation37_spill] sm:$0xff] %v8180_v8  ;;  %v357_v50 = vand.u32 15, %v287_v57 }
  0xbe   : > { %vm8185_vm14 = vcmp.eq.s32.totalorder %v329_v23, 15 }
  0xbf   : > { %2643 = vmatpush.bf16.msrb.mxu1 %v6916_v16  ;;  %v10150_v24 = vsel %vm8185_vm14, 4294967295, %v10149_v24  ;;  %v1148_v7 = vsel %vm9969_vm0, %v1083_v35, %v1084_v4  ;;  %v1151_v16 = vsel %vm9969_vm0, %v8180_v8, %v1081_v56  ;;  %v1226_v62 = vsel %vm8185_vm14, 0.0, %v1150_v54  ;;  %v8213_v54 = vld [vmem:[%s9911_s2] ss:$0 sm:$0xff] }
  0xc0   : > { %10151 = vst [vmem:[#allocation38_spill] sm:$0xff] %v10150_v24  ;;  %v1228_v30 = vsel %vm8193_vm12, 0.0, %v1148_v7  ;;  %v1297_v23 = vpack.c.bf16 %v1151_v16, %v1151_v16  ;;  %v1298_v34 = vpack.c.bf16 %v1226_v62, %v1226_v62  ;;  %v1950_v56 = vunpack.c.l.b16 %v1299_v55 }
  0xc1   : > { %v1300_v26 = vpack.c.bf16 %v1228_v30, %v1228_v30  ;;  %v10155_v35 = vunpack.c.h.bf16 %v7856_v37  ;;  %v10156_v16 = vunpack.c.l.bf16 %v7907_v39  ;;  %vm8223_vm0 = vcmp.eq.s32.totalorder %v357_v50, 15 }
  0xc2   : > { %v1949_v40 = vunpack.c.l.b16 %v1298_v34  ;;  %vm10275_vm14 = vcmp.lt.s32.totalorder %v7741_v5, 7 }
  0xc3   : > { %v1951_v8 = vunpack.c.l.b16 %v1300_v26  ;;  %v1085_v7 = vrot.slane %v10155_v35, 1  ;;  %v1086_v62 = vrot.slane %v10156_v16, 1  ;;  %v10157_v26 = vmov 0 }
  0xc4   : > { %v10158_v26 = vsel %vm8223_vm0, 4294967295, %v10157_v26 }
  0xc5   : > { %10159 = vst [vmem:[#allocation40_spill] sm:$0xff] %v10158_v26  ;;  %v1146_v37 = vsel %vm10160_vm10, %v1085_v7, %v1086_v62 }
  0xc9   : > { %1539 = vmatmul.bf16.gmra.mxu0 %v8168_v14  ;;  %1579 = vmatmul.bf16.gmra.mxu2 %v8171_v1 }
  0xca   : > { %1861 = vmatmul.bf16.gmra.mxu3 %v6873_v25  ;;  %v1948_v25 = vunpack.c.l.b16 %v1297_v23  ;;  %v1981_v23 = vpack.c.b16 %v1951_v8, %v1950_v56  ;;  %v1147_v8 = vsel %vm10161_vm8, %v1084_v4, %v1085_v7  ;;  %v289_v4 = vadd.s32 56, %v7741_v5 }
  0xcb   : > { %v1301_v16 = vpack.c.bf16 %v1147_v8, %v1147_v8  ;;  %v10163_v8 = vunpack.c.l.bf16 %v7958_v58  ;;  %v10170_v58 = vmov 0 }
  0xcc   : > { %1821 = vmatmul.bf16.gmra.mxu1 %v8183_v13  ;;  %v1980_v24 = vpack.c.b16 %v1949_v40, %v1948_v25  ;;  %v6930_v25 = vld [vmem:[#allocation6 + $0x1b0] sm:$0xff]  ;;  %v371_v26 = vand.u32 15, %v289_v4 }
  0xcd   : > { %v6938_v40 = vld [vmem:[#allocation6 + $0x1f0] sm:$0xff]  ;;  %2829 = vmatpush.bf16.msra.mxu2 %v6930_v25  ;;  %v1952_v7 = vunpack.c.l.b16 %v1301_v16 }
  0xce   : > { %3021 = vmatpush.bf16.msra.mxu3 %v6938_v40  ;;  %vm8254_vm8 = vcmp.eq.s32.totalorder %v371_v26, 15 }
  0xd6   : > { %v1505_v10 = vpop.f32.mrf.mxu0 }
  0xd7   : > { %v1585_v30 = vadd.f32 %v8213_v54, %v1505_v10 }
  0xd9   : > { %v1787_v34 = vpop.f32.mrf.mxu1  ;;  %2068 = vmatmul.bf16.vlgmr.msrb.gmra.mxu2 %v1980_v24  ;;  %2452 = vmatmul.bf16.vlgmr.msrb.gmra.mxu0 %v7887_v27  ;;  %v1230_v27 = vsel %vm8223_vm0, 0.0, %v1146_v37 }
  0xda   : > { %v8221_v55 = vadd.f32 %v1787_v34, %v1585_v30  ;;  %2260 = vmatmul.bf16.vlgmr.msrb.gmra.mxu3 %v7871_v2  ;;  %v1302_v10 = vpack.c.bf16 %v1230_v27, %v1230_v27  ;;  %v1088_v27 = vrot.slane %v10163_v8, 1 }
  0xdc   : > { %2644 = vmatmul.bf16.vlgmr.msrb.gmra.mxu1 %v1981_v23  ;;  %v1545_v57 = vpop.f32.mrf.mxu2  ;;  %v1953_v37 = vunpack.c.l.b16 %v1302_v10  ;;  %v10164_v10 = vmov 0 }
  0xdd   : > { %v1601_v24 = vadd.f32 %v8213_v54, %v1545_v57  ;;  %v1827_v56 = vpop.f32.mrf.mxu3  ;;  %v10165_v10 = vsel %vm8254_vm8, 4294967295, %v10164_v10 }
  0xde   : > { %v1507_v50 = vpop.f32.mrf.mxu0  ;;  %v8249_v36 = vpack.c.b16 %v1953_v37, %v1952_v7  ;;  %10166 = vst [vmem:[#allocation41_spill] sm:$0xff] %v10165_v10 }
  0xdf   : > { %v8235_v35 = vadd.f32 %v1827_v56, %v1601_v24  ;;  %v1586_v2 = vadd.f32 %v8213_v54, %v1507_v50  ;;  %v10162_v24 = vunpack.c.h.bf16 %v7907_v39 }
  0xe1   : > { %v1789_v30 = vpop.f32.mrf.mxu1  ;;  %v1087_v56 = vrot.slane %v10162_v24, 1 }
  0xe2   : > { %v8238_v34 = vadd.f32 %v1789_v30, %v1586_v2 }
  0xe3   : > { %v1144_v39 = vsel %vm10160_vm10, %v1087_v56, %v1088_v27  ;;  %v1145_v7 = vsel %vm10167_vm6, %v1086_v62, %v1087_v56 }
  0xe4   : > { %v1547_v25 = vpop.f32.mrf.mxu2 }
  0xe5   : > { %v1602_v40 = vadd.f32 %v8213_v54, %v1547_v25  ;;  %v1829_v57 = vpop.f32.mrf.mxu3 }
  0xe6   : > { %v1510_v50 = vpop.f32.mrf.mxu0 }
  0xe7   : > { %v8246_v2 = vadd.f32 %v1829_v57, %v1602_v40  ;;  %v1587_v30 = vadd.f32 %v8213_v54, %v1510_v50  ;;  %v1303_v57 = vpack.c.bf16 %v1145_v7, %v1145_v7 }
  0xe9   : > { %v1792_v16 = vpop.f32.mrf.mxu1  ;;  %2073 = vmatmul.bf16.gmra.mxu2 %v1981_v23  ;;  %2457 = vmatmul.bf16.gmra.mxu0 %v7932_v18  ;;  %v1232_v18 = vsel %vm8254_vm8, 0.0, %v1144_v39 }
  0xea   : > { %v8252_v31 = vadd.f32 %v1792_v16, %v1587_v30  ;;  %2265 = vmatmul.bf16.gmra.mxu3 %v7922_v12  ;;  %v1304_v24 = vpack.c.bf16 %v1232_v18, %v1232_v18  ;;  %v291_v30 = vadd.s32 72, %v7741_v5  ;;  %v1954_v16 = vunpack.c.l.b16 %v1303_v57 }
  0xec   : > { %2649 = vmatmul.bf16.gmra.mxu1 %v8249_v36  ;;  %v1550_v4 = vpop.f32.mrf.mxu2  ;;  %v1955_v62 = vunpack.c.l.b16 %v1304_v24 }
  0xed   : > { %v1603_v23 = vadd.f32 %v8213_v54, %v1550_v4  ;;  %v1832_v26 = vpop.f32.mrf.mxu3  ;;  %v385_v4 = vand.u32 15, %v291_v30  ;;  %v6937_v30 = vld [vmem:[#allocation6 + $0x1e8] sm:$0xff] }
  0xee   : > { %v1512_v37 = vpop.f32.mrf.mxu0  ;;  %3022 = vmatpush.bf16.msra.mxu3 %v6937_v30 }
  0xef   : > { %v8267_v25 = vadd.f32 %v1832_v26, %v1603_v23  ;;  %v1588_v40 = vadd.f32 %v8213_v54, %v1512_v37  ;;  %v1089_v23 = vrot.slane %v10168_v42, 1  ;;  %v10169_v26 = vunpack.c.l.bf16 %v8009_v53 }
  0xf0   : > { %vm8287_vm6 = vcmp.eq.s32.totalorder %v385_v4, 15 }
  0xf1   : > { %v1794_v8 = vpop.f32.mrf.mxu1  ;;  %v1090_v37 = vrot.slane %v10169_v26, 1  ;;  %v10171_v58 = vsel %vm8287_vm6, 4294967295, %v10170_v58 }
  0xf2   : > { %v8270_v50 = vadd.f32 %v1794_v8, %v1588_v40  ;;  %v8281_v8 = vpack.c.b16 %v1955_v62, %v1954_v16  ;;  %10172 = vst [vmem:[#allocation42_spill] sm:$0xff] %v10171_v58  ;;  %v1143_v62 = vsel %vm10173_vm4, %v1088_v27, %v1089_v23  ;;  %v293_v27 = vadd.s32 88, %v7741_v5 }
  0xf3   : > { %v1142_v42 = vsel %vm10160_vm10, %v1089_v23, %v1090_v37 }
  0xf4   : > { %v1552_v56 = vpop.f32.mrf.mxu2  ;;  %v399_v58 = vand.u32 15, %v293_v27 }
  0xf5   : > { %v1604_v39 = vadd.f32 %v8213_v54, %v1552_v56  ;;  %v1834_v10 = vpop.f32.mrf.mxu3 }
  0xf6   : > { %v1515_v7 = vpop.f32.mrf.mxu0  ;;  %vm8320_vm4 = vcmp.eq.s32.totalorder %v399_v58, 15 }
  0xf7   : > { %v8278_v18 = vadd.f32 %v1834_v10, %v1604_v39  ;;  %v1589_v40 = vadd.f32 %v8213_v54, %v1515_v7  ;;  %v6929_v10 = vld [vmem:[#allocation6 + $0x1a8] sm:$0xff] }
  0xf8   : > { %2830 = vmatpush.bf16.msra.mxu2 %v6929_v10 }
  0xf9   : > { %v1797_v57 = vpop.f32.mrf.mxu1  ;;  %2078 = vmatmul.bf16.gmra.mxu2 %v8249_v36  ;;  %2462 = vmatmul.bf16.gmra.mxu0 %v7983_v19  ;;  %v1234_v19 = vsel %vm8287_vm6, 0.0, %v1142_v42 }
  0xfa   : > { %v8285_v24 = vadd.f32 %v1797_v57, %v1589_v40  ;;  %2270 = vmatmul.bf16.gmra.mxu3 %v7973_v51  ;;  %v1305_v40 = vpack.c.bf16 %v1143_v62, %v1143_v62  ;;  %v1306_v57 = vpack.c.bf16 %v1234_v19, %v1234_v19  ;;  %v10176_v62 = vunpack.c.l.bf16 %v8060_v22 }
  0xfc   : > { %2654 = vmatmul.bf16.gmra.mxu1 %v8281_v8  ;;  %v1555_v16 = vpop.f32.mrf.mxu2  ;;  %v1956_v23 = vunpack.c.l.b16 %v1305_v40  ;;  %v1957_v42 = vunpack.c.l.b16 %v1306_v57  ;;  %v1092_v19 = vrot.slane %v10176_v62, 1 }
  0xfd   : > { %v1605_v56 = vadd.f32 %v8213_v54, %v1555_v16  ;;  %v1837_v39 = vpop.f32.mrf.mxu3 }
  0xfe   : > { %v1517_v4 = vpop.f32.mrf.mxu0 }
  0xff   : > { %v8300_v26 = vadd.f32 %v1837_v39, %v1605_v56  ;;  %v1590_v7 = vadd.f32 %v8213_v54, %v1517_v4  ;;  %v10175_v56 = vunpack.c.h.bf16 %v8009_v53  ;;  %v10178_v53 = vmov 0 }
 0x100   : > { %v10179_v53 = vsel %vm8320_vm4, 4294967295, %v10178_v53 }
 0x101   : > { %10174 = vst [vmem:[#allocation43_spill] sm:$0xff] %v8300_v26  ;;  %v1799_v9 = vpop.f32.mrf.mxu1  ;;  %v1091_v39 = vrot.slane %v10175_v56, 1  ;;  %v8314_v26 = vpack.c.b16 %v1957_v42, %v1956_v23 }
 0x102   : > { %v8303_v21 = vadd.f32 %v1799_v9, %v1590_v7  ;;  %10180 = vst [vmem:[#allocation45_spill] sm:$0xff] %v10179_v53 }
 0x103   : > { %v1140_v57 = vsel %vm10160_vm10, %v1091_v39, %v1092_v19  ;;  %v1141_v23 = vsel %vm10181_vm2, %v1090_v37, %v1091_v39 }
 0x104   : > { %v1557_v10 = vpop.f32.mrf.mxu2  ;;  %v1307_v56 = vpack.c.bf16 %v1141_v23, %v1141_v23 }
 0x105   : > { %v1606_v30 = vadd.f32 %v8213_v54, %v1557_v10  ;;  %v1839_v16 = vpop.f32.mrf.mxu3 }
 0x106   : > { %v1520_v4 = vpop.f32.mrf.mxu0 }
 0x107   : > { %v8311_v9 = vadd.f32 %v1839_v16, %v1606_v30  ;;  %v1591_v7 = vadd.f32 %v8213_v54, %v1520_v4 }
 0x109   : > { %10177 = vst [vmem:[#allocation44_spill] sm:$0xff] %v8311_v9  ;;  %v1802_v40 = vpop.f32.mrf.mxu1  ;;  %2083 = vmatmul.bf16.gmra.mxu2 %v8281_v8  ;;  %2467 = vmatmul.bf16.gmra.mxu0 %v8034_v0  ;;  %v1236_v0 = vsel %vm8320_vm4, 0.0, %v1140_v57  ;;  %v1958_v9 = vunpack.c.l.b16 %v1307_v56  ;;  %vm10276_vm4 = vmmov %vm10275_vm14 }
 0x10a   : > { %v8318_v32 = vadd.f32 %v1802_v40, %v1591_v7  ;;  %2275 = vmatmul.bf16.gmra.mxu3 %v8024_v45  ;;  %v1308_v62 = vpack.c.bf16 %v1236_v0, %v1236_v0  ;;  %v295_v40 = vadd.s32 104, %v7741_v5  ;;  %v10183_v45 = vunpack.c.h.bf16 %v8060_v22 }
 0x10b   : > { %v10186_v22 = vmov 0 }
 0x10c   : > { %2659 = vmatmul.bf16.gmra.mxu1 %v8314_v26  ;;  %v1560_v27 = vpop.f32.mrf.mxu2  ;;  %v1959_v37 = vunpack.c.l.b16 %v1308_v62 }
 0x10d   : > { %v1607_v42 = vadd.f32 %v8213_v54, %v1560_v27  ;;  %v1842_v58 = vpop.f32.mrf.mxu3  ;;  %v413_v27 = vand.u32 15, %v295_v40 }
 0x10e   : > { %v1522_v10 = vpop.f32.mrf.mxu0 }
 0x10f   : > { %v8333_v30 = vadd.f32 %v1842_v58, %v1607_v42  ;;  %v1592_v16 = vadd.f32 %v8213_v54, %v1522_v10  ;;  %v1093_v42 = vrot.slane %v10183_v45, 1  ;;  %v10184_v58 = vunpack.c.l.bf16 %v8111_v47  ;;  %v6928_v47 = vld [vmem:[#allocation6 + $0x1a0] sm:$0xff] }
 0x110   : > { %vm8353_vm2 = vcmp.eq.s32.totalorder %v413_v27, 15  ;;  %2831 = vmatpush.bf16.msra.mxu2 %v6928_v47 }
 0x111   : > { %10182 = vst [vmem:[#allocation46_spill] sm:$0xff] %v8333_v30  ;;  %v1804_v4 = vpop.f32.mrf.mxu1  ;;  %v1094_v10 = vrot.slane %v10184_v58, 1  ;;  %v10187_v22 = vsel %vm8353_vm2, 4294967295, %v10186_v22  ;;  %v1139_v40 = vsel %vm10189_vm15, %v1092_v19, %v1093_v42  ;;  %v6944_v30 = vld [vmem:[#allocation6 + $0x220] sm:$0xff]  ;;  %v297_v19 = vadd.s32 120, %v7741_v5 }
 0x112   : > { %v8336_v7 = vadd.f32 %v1804_v4, %v1592_v16  ;;  %v8347_v4 = vpack.c.b16 %v1959_v37, %v1958_v9  ;;  %10188 = vst [vmem:[#allocation48_spill] sm:$0xff] %v10187_v22  ;;  %3215 = vmatpush.bf16.msra.mxu0 %v6944_v30 }
 0x113   : > { %v1138_v45 = vsel %vm10160_vm10, %v1093_v42, %v1094_v10  ;;  %v427_v22 = vand.u32 15, %v297_v19 }
 0x114   : > { %v1562_v39 = vpop.f32.mrf.mxu2 }
 0x115   : > { %v1608_v57 = vadd.f32 %v8213_v54, %v1562_v39  ;;  %v1844_v53 = vpop.f32.mrf.mxu3  ;;  %vm8386_vm15 = vcmp.eq.s32.totalorder %v427_v22, 15 }
 0x116   : > { %v1525_v23 = vpop.f32.mrf.mxu0 }
 0x117   : > { %v8344_v0 = vadd.f32 %v1844_v53, %v1608_v57  ;;  %v1593_v16 = vadd.f32 %v8213_v54, %v1525_v23  ;;  %v6936_v53 = vld [vmem:[#allocation6 + $0x1e0] sm:$0xff]  ;;  %v1309_v23 = vpack.c.bf16 %v1139_v40, %v1139_v40  ;;  %v10192_v40 = vunpack.c.h.bf16 %v7751_v11 }
 0x118   : > { %3023 = vmatpush.bf16.msra.mxu3 %v6936_v53 }
 0x119   : > { %10185 = vst [vmem:[#allocation47_spill] sm:$0xff] %v8344_v0  ;;  %v1807_v56 = vpop.f32.mrf.mxu1  ;;  %2088 = vmatmul.bf16.gmra.mxu2 %v8314_v26  ;;  %2472 = vmatmul.bf16.gmra.mxu0 %v8085_v43  ;;  %v1238_v43 = vsel %vm8353_vm2, 0.0, %v1138_v45  ;;  %v1960_v42 = vunpack.c.l.b16 %v1309_v23  ;;  %vm10197_vm2 = vmmov %vm10160_vm10 }
 0x11a   : > { %v8351_v62 = vadd.f32 %v1807_v56, %v1593_v16  ;;  %2280 = vmatmul.bf16.gmra.mxu3 %v8075_v44  ;;  %v1310_v16 = vpack.c.bf16 %v1238_v43, %v1238_v43  ;;  %v1096_v43 = vrot.slane %v10192_v40, 1 }
 0x11c   : > { %2664 = vmatmul.bf16.gmra.mxu1 %v8347_v4  ;;  %v1565_v9 = vpop.f32.mrf.mxu2  ;;  %v1961_v45 = vunpack.c.l.b16 %v1310_v16  ;;  %v10194_v16 = vmov 0 }
 0x11d   : > { %v1609_v37 = vadd.f32 %v8213_v54, %v1565_v9  ;;  %v1847_v39 = vpop.f32.mrf.mxu3  ;;  %v10195_v16 = vsel %vm8386_vm15, 4294967295, %v10194_v16 }
 0x11e   : > { %v1527_v57 = vpop.f32.mrf.mxu0  ;;  %10196 = vst [vmem:[#allocation51_spill] sm:$0xff] %v10195_v16 }
 0x11f   : > { %v8366_v27 = vadd.f32 %v1847_v39, %v1609_v37  ;;  %v1594_v58 = vadd.f32 %v8213_v54, %v1527_v57  ;;  %v10191_v37 = vunpack.c.l.bf16 %v7751_v11 }
 0x121   : > { %10190 = vst [vmem:[#allocation49_spill] sm:$0xff] %v8366_v27  ;;  %v1809_v56 = vpop.f32.mrf.mxu1  ;;  %v1095_v39 = vrot.slane %v10191_v37, 1  ;;  %v8380_v27 = vpack.c.b16 %v1961_v45, %v1960_v42 }
 0x122   : > { %v8369_v0 = vadd.f32 %v1809_v56, %v1594_v58 }
 0x123   : > { %v1136_v11 = vsel %vm10160_vm10, %v1095_v39, %v1096_v43  ;;  %v1137_v42 = vsel %vm10197_vm2, %v1094_v10, %v1095_v39 }
 0x124   : > { %v1567_v47 = vpop.f32.mrf.mxu2  ;;  %v1311_v37 = vpack.c.bf16 %v1137_v42, %v1137_v42 }
 0x125   : > { %v1610_v53 = vadd.f32 %v8213_v54, %v1567_v47  ;;  %v1849_v9 = vpop.f32.mrf.mxu3 }
 0x126   : > { %v1530_v57 = vpop.f32.mrf.mxu0 }
 0x127   : > { %v8377_v58 = vadd.f32 %v1849_v9, %v1610_v53  ;;  %v1595_v56 = vadd.f32 %v8213_v54, %v1530_v57 }
 0x129   : > { %10193 = vst [vmem:[#allocation50_spill] sm:$0xff] %v8377_v58  ;;  %v1812_v23 = vpop.f32.mrf.mxu1  ;;  %2093 = vmatmul.bf16.gmra.mxu2 %v8347_v4  ;;  %2477 = vmatmul.bf16.gmra.mxu0 %v8141_v20  ;;  %v1240_v20 = vsel %vm8386_vm15, 0.0, %v1136_v11  ;;  %v1962_v58 = vunpack.c.l.b16 %v1311_v37  ;;  %vm10206_vm15 = vmmov %vm10160_vm10 }
 0x12a   : > { %v8384_v30 = vadd.f32 %v1812_v23, %v1595_v56  ;;  %2285 = vmatmul.bf16.gmra.mxu3 %v8125_v63  ;;  %v1312_v40 = vpack.c.bf16 %v1240_v20, %v1240_v20  ;;  %v299_v23 = vadd.s32 136, %v7741_v5  ;;  %v10199_v63 = vunpack.c.l.bf16 %v7756_v15 }
 0x12c   : > { %2669 = vmatmul.bf16.gmra.mxu1 %v8380_v27  ;;  %v1570_v19 = vpop.f32.mrf.mxu2  ;;  %v1963_v10 = vunpack.c.l.b16 %v1312_v40 }
 0x12d   : > { %v1611_v45 = vadd.f32 %v8213_v54, %v1570_v19  ;;  %v1852_v22 = vpop.f32.mrf.mxu3  ;;  %v441_v19 = vand.u32 15, %v299_v23  ;;  %v10203_v23 = vmov 0 }
 0x12e   : > { %v1532_v47 = vpop.f32.mrf.mxu0 }
 0x12f   : > { %v8399_v53 = vadd.f32 %v1852_v22, %v1611_v45  ;;  %v1596_v9 = vadd.f32 %v8213_v54, %v1532_v47  ;;  %v1097_v45 = vrot.slane %v10199_v63, 1  ;;  %v10200_v22 = vunpack.c.h.bf16 %v7756_v15  ;;  %v6927_v63 = vld [vmem:[#allocation6 + $0x198] sm:$0xff] }
 0x130   : > { %vm8419_vm2 = vcmp.eq.s32.totalorder %v441_v19, 15  ;;  %2832 = vmatpush.bf16.msra.mxu2 %v6927_v63  ;;  %v6943_v63 = vld [vmem:[#allocation6 + $0x218] sm:$0xff] }
 0x131   : > { %10198 = vst [vmem:[#allocation52_spill] sm:$0xff] %v8399_v53  ;;  %v1814_v57 = vpop.f32.mrf.mxu1  ;;  %v1098_v47 = vrot.slane %v10200_v22, 1  ;;  %v10204_v23 = vsel %vm8419_vm2, 4294967295, %v10203_v23  ;;  %3216 = vmatpush.bf16.msra.mxu0 %v6943_v63  ;;  %v10213_v63 = vmov 0 }
 0x132   : > { %v8402_v56 = vadd.f32 %v1814_v57, %v1596_v9  ;;  %v8413_v57 = vpack.c.b16 %v1963_v10, %v1962_v58  ;;  %10205 = vst [vmem:[#allocation55_spill] sm:$0xff] %v10204_v23  ;;  %v1135_v10 = vsel %vm10206_vm15, %v1096_v43, %v1097_v45  ;;  %v301_v43 = vadd.s32 152, %v7741_v5 }
 0x133   : > { %v1134_v15 = vsel %vm10160_vm10, %v1097_v45, %v1098_v47 }
 0x134   : > { %v1572_v39 = vpop.f32.mrf.mxu2  ;;  %10202 = vst [vmem:[#allocation54_spill] sm:$0xff] %v8413_v57 }
 0x135   : > { %v1612_v11 = vadd.f32 %v8213_v54, %v1572_v39  ;;  %v1854_v16 = vpop.f32.mrf.mxu3 }
 0x136   : > { %v1535_v42 = vpop.f32.mrf.mxu0 }
 0x137   : > { %v8410_v20 = vadd.f32 %v1854_v16, %v1612_v11  ;;  %v1597_v9 = vadd.f32 %v8213_v54, %v1535_v42  ;;  %v6935_v16 = vld [vmem:[#allocation6 + $0x1d8] sm:$0xff] }
 0x138   : > { %3024 = vmatpush.bf16.msra.mxu3 %v6935_v16 }
 0x139   : > { %10201 = vst [vmem:[#allocation53_spill] sm:$0xff] %v8410_v20  ;;  %v1817_v37 = vpop.f32.mrf.mxu1  ;;  %2098 = vmatmul.bf16.gmra.mxu2 %v8380_v27  ;;  %2482 = vmatmul.bf16.gmra.mxu0 %v8183_v13  ;;  %v1242_v13 = vsel %vm8419_vm2, 0.0, %v1134_v15  ;;  %vm10216_vm2 = vmmov %vm10160_vm10 }
 0x13a   : > { %v8417_v40 = vadd.f32 %v1817_v37, %v1597_v9  ;;  %2290 = vmatmul.bf16.gmra.mxu3 %v8168_v14  ;;  %v1313_v9 = vpack.c.bf16 %v1135_v10, %v1135_v10  ;;  %v1314_v37 = vpack.c.bf16 %v1242_v13, %v1242_v13  ;;  %v10209_v10 = vunpack.c.h.bf16 %v7815_v52 }
 0x13c   : > { %2674 = vmatmul.bf16.gmra.mxu1 %v8413_v57  ;;  %v1575_v58 = vpop.f32.mrf.mxu2  ;;  %v1964_v45 = vunpack.c.l.b16 %v1313_v9  ;;  %v1965_v15 = vunpack.c.l.b16 %v1314_v37  ;;  %v1100_v13 = vrot.slane %v10209_v10, 1 }
 0x13d   : > { %v1613_v39 = vadd.f32 %v8213_v54, %v1575_v58  ;;  %v1857_v11 = vpop.f32.mrf.mxu3 }
 0x13e   : > { %v1537_v19 = vpop.f32.mrf.mxu0 }
 0x13f   : > { %v8432_v22 = vadd.f32 %v1857_v11, %v1613_v39  ;;  %v1598_v42 = vadd.f32 %v8213_v54, %v1537_v19  ;;  %v455_v39 = vand.u32 15, %v301_v43  ;;  %v10208_v11 = vunpack.c.l.bf16 %v7815_v52 }
 0x141   : > { %10207 = vst [vmem:[#allocation56_spill] sm:$0xff] %v8432_v22  ;;  %v1819_v20 = vpop.f32.mrf.mxu1  ;;  %v1099_v19 = vrot.slane %v10208_v11, 1  ;;  %v8446_v22 = vpack.c.b16 %v1965_v15, %v1964_v45  ;;  %vm8455_vm15 = vcmp.eq.s32.totalorder %v455_v39, 15 }
 0x142   : > { %v8435_v53 = vadd.f32 %v1819_v20, %v1598_v42  ;;  %v10214_v63 = vsel %vm8455_vm15, 4294967295, %v10213_v63 }
 0x143   : > { %10211 = vst [vmem:[#allocation58_spill] sm:$0xff] %v8446_v22  ;;  %v1132_v52 = vsel %vm10160_vm10, %v1099_v19, %v1100_v13  ;;  %v1133_v45 = vsel %vm10216_vm2, %v1098_v47, %v1099_v19 }
 0x144   : > { %v1577_v16 = vpop.f32.mrf.mxu2  ;;  %10215 = vst [vmem:[#allocation60_spill] sm:$0xff] %v10214_v63  ;;  %v1244_v15 = vsel %vm8455_vm15, 0.0, %v1132_v52  ;;  %v6973_v63 = vld [vmem:[#allocation8 + $0x38] sm:$0xff]  ;;  %vm10225_vm15 = vmmov %vm10160_vm10 }
 0x145   : > { %v1614_v58 = vadd.f32 %v8213_v54, %v1577_v16  ;;  %v1859_v23 = vpop.f32.mrf.mxu3  ;;  %v8450_v16 = vld [vmem:[%s7731_s8 + $0x40] sm:$0xff]  ;;  %4050 = vmatpush.bf16.msra.mxu1 %v6973_v63 }
 0x146   : > { %v1540_v20 = vpop.f32.mrf.mxu0  ;;  %10212 = vst [vmem:[#allocation59_spill] sm:$0xff] %v8450_v16 }
 0x147   : > { %v8443_v42 = vadd.f32 %v1859_v23, %v1614_v58  ;;  %v1599_v9 = vadd.f32 %v8213_v54, %v1540_v20 }
 0x149   : > { %10210 = vst [vmem:[#allocation57_spill] sm:$0xff] %v8443_v42  ;;  %v1822_v37 = vpop.f32.mrf.mxu1  ;;  %2103 = vmatmul.bf16.gmra.mxu2 %v8413_v57  ;;  %2487 = vmatmul.bf16.gmra.mxu0 %v8450_v16 }
 0x14a   : > { %v8453_v43 = vadd.f32 %v1822_v37, %v1599_v9  ;;  %2295 = vmatmul.bf16.gmra.mxu3 %v7824_v6  ;;  %v1315_v9 = vpack.c.bf16 %v1133_v45, %v1133_v45  ;;  %v1316_v37 = vpack.c.bf16 %v1244_v15, %v1244_v15  ;;  %v303_v6 = vadd.s32 168, %v7741_v5 }
 0x14b   : > { %v10219_v45 = vunpack.c.h.bf16 %v7862_v49 }
 0x14c   : > { %2679 = vmatmul.bf16.gmra.mxu1 %v8446_v22  ;;  %v1580_v23 = vpop.f32.mrf.mxu2  ;;  %v1966_v47 = vunpack.c.l.b16 %v1315_v9  ;;  %v1967_v19 = vunpack.c.l.b16 %v1316_v37  ;;  %v8485_v37 = vld [vmem:[%s7731_s8 + $0x48] sm:$0xff] }
 0x14d   : > { %v1615_v58 = vadd.f32 %v8213_v54, %v1580_v23  ;;  %v1862_v39 = vpop.f32.mrf.mxu3  ;;  %v1102_v15 = vrot.slane %v10219_v45, 1  ;;  %10221 = vst [vmem:[#allocation63_spill] sm:$0xff] %v8485_v37 }
 0x14e   : > { %v1542_v11 = vpop.f32.mrf.mxu0 }
 0x14f   : > { %v8468_v10 = vadd.f32 %v1862_v39, %v1615_v58  ;;  %v1600_v20 = vadd.f32 %v8213_v54, %v1542_v11  ;;  %v469_v58 = vand.u32 15, %v303_v6  ;;  %v10218_v39 = vunpack.c.l.bf16 %v7862_v49 }
 0x150   : > { %v10222_v6 = vmov 0 }
 0x151   : > { %10217 = vst [vmem:[#allocation61_spill] sm:$0xff] %v8468_v10  ;;  %v1824_v42 = vpop.f32.mrf.mxu1  ;;  %v1101_v11 = vrot.slane %v10218_v39, 1  ;;  %v8481_v10 = vpack.c.b16 %v1967_v19, %v1966_v47  ;;  %vm8488_vm2 = vcmp.eq.s32.totalorder %v469_v58, 15 }
 0x152   : > { %v8471_v16 = vadd.f32 %v1824_v42, %v1600_v20  ;;  %v10223_v6 = vsel %vm8488_vm2, 4294967295, %v10222_v6 }
 0x153   : > { %10224 = vst [vmem:[#allocation64_spill] sm:$0xff] %v10223_v6  ;;  %v1130_v49 = vsel %vm10160_vm10, %v1101_v11, %v1102_v15  ;;  %v1131_v47 = vsel %vm10225_vm15, %v1100_v13, %v1101_v11  ;;  %v6942_v6 = vld [vmem:[#allocation6 + $0x210] sm:$0xff] }
 0x154   : > { %v1582_v52 = vpop.f32.mrf.mxu2  ;;  %v1246_v19 = vsel %vm8488_vm2, 0.0, %v1130_v49  ;;  %v1317_v45 = vpack.c.bf16 %v1131_v47, %v1131_v47  ;;  %3217 = vmatpush.bf16.msra.mxu0 %v6942_v6  ;;  %vm10232_vm2 = vmmov %vm10160_vm10 }
 0x155   : > { %v1616_v23 = vadd.f32 %v8213_v54, %v1582_v52  ;;  %v1864_v57 = vpop.f32.mrf.mxu3  ;;  %v6926_v54 = vld [vmem:[#allocation6 + $0x190] sm:$0xff] }
 0x156   : > { %v2453_v42 = vpop.f32.mrf.mxu0  ;;  %2833 = vmatpush.bf16.msra.mxu2 %v6926_v54  ;;  %v1968_v13 = vunpack.c.l.b16 %v1317_v45 }
 0x157   : > { %v8479_v20 = vadd.f32 %v1864_v57, %v1616_v23  ;;  %v6934_v57 = vld [vmem:[#allocation6 + $0x1d0] sm:$0xff] }
 0x158   : > { %3025 = vmatpush.bf16.msra.mxu3 %v6934_v57 }
 0x159   : > { %10220 = vst [vmem:[#allocation62_spill] sm:$0xff] %v8479_v20  ;;  %v2645_v9 = vpop.f32.mrf.mxu1  ;;  %2108 = vmatmul.bf16.gmra.mxu2 %v8446_v22  ;;  %2492 = vmatmul.bf16.gmra.mxu0 %v8485_v37  ;;  %v1318_v20 = vpack.c.bf16 %v1246_v19, %v1246_v19  ;;  %v305_v22 = vadd.s32 184, %v7741_v5  ;;  %v10227_v19 = vunpack.c.h.bf16 %v7913_v48 }
 0x15a   : > { %2300 = vmatmul.bf16.gmra.mxu3 %v7873_v3 }
 0x15b   : > { %v1969_v11 = vunpack.c.l.b16 %v1318_v20  ;;  %v483_v57 = vand.u32 15, %v305_v22  ;;  %v8513_v20 = vld [vmem:[%s7731_s8 + $0x50] sm:$0xff]  ;;  %v10228_v22 = vmov 0 }
 0x15c   : > { %2684 = vmatmul.bf16.gmra.mxu1 %v8481_v10  ;;  %v2069_v63 = vpop.f32.mrf.mxu2 }
 0x15d   : > { %v2149_v52 = vadd.f32 %v2069_v63, %v8221_v55  ;;  %v2261_v23 = vpop.f32.mrf.mxu3  ;;  %v10226_v63 = vunpack.c.l.bf16 %v7913_v48  ;;  %vm8516_vm15 = vcmp.eq.s32.totalorder %v483_v57, 15 }
 0x15e   : > { %v2455_v58 = vpop.f32.mrf.mxu0  ;;  %v10229_v22 = vsel %vm8516_vm15, 4294967295, %v10228_v22 }
 0x15f   : > { %v2341_v39 = vadd.f32 %v2261_v23, %v2149_v52  ;;  %v1103_v47 = vrot.slane %v10226_v63, 1  ;;  %10230 = vst [vmem:[#allocation65_spill] sm:$0xff] %v10229_v22 }
 0x161   : > { %v2647_v37 = vpop.f32.mrf.mxu1  ;;  %v2533_v3 = vadd.f32 %v2453_v42, %v2341_v39  ;;  %v1104_v42 = vrot.slane %v10227_v19, 1  ;;  %v1129_v45 = vsel %vm10232_vm2, %v1102_v15, %v1103_v47  ;;  %v6972_v15 = vld [vmem:[#allocation8 + $0x30] sm:$0xff] }
 0x162   : > { %4051 = vmatpush.bf16.msra.mxu1 %v6972_v15 }
 0x163   : > { %v8502_v14 = vadd.f32 %v2645_v9, %v2533_v3  ;;  %v8509_v3 = vpack.c.b16 %v1969_v11, %v1968_v13  ;;  %v1128_v48 = vsel %vm10160_vm10, %v1103_v47, %v1104_v42 }
 0x164   : > { %v2071_v49 = vpop.f32.mrf.mxu2 }
 0x165   : > { %v2150_v54 = vadd.f32 %v2071_v49, %v8238_v34  ;;  %v2263_v55 = vpop.f32.mrf.mxu3 }
 0x166   : > { %v2458_v52 = vpop.f32.mrf.mxu0 }
 0x167   : > { %v2342_v23 = vadd.f32 %v2263_v55, %v2150_v54  ;;  %v1319_v55 = vpack.c.bf16 %v1129_v45, %v1129_v45 }
 0x169   : > { %v2650_v9 = vpop.f32.mrf.mxu1  ;;  %2113 = vmatmul.bf16.gmra.mxu2 %v8481_v10  ;;  %2497 = vmatmul.bf16.gmra.mxu0 %v8513_v20  ;;  %v2534_v34 = vadd.f32 %v2455_v58, %v2342_v23  ;;  %v1248_v58 = vsel %vm8516_vm15, 0.0, %v1128_v48  ;;  %vm10239_vm15 = vmmov %vm10160_vm10 }
 0x16a   : > { %2305 = vmatmul.bf16.gmra.mxu3 %v7924_v29  ;;  %v1320_v57 = vpack.c.bf16 %v1248_v58, %v1248_v58  ;;  %v10234_v58 = vunpack.c.h.bf16 %v7964_v41 }
 0x16b   : > { %v8523_v6 = vadd.f32 %v2647_v37, %v2534_v34  ;;  %v307_v37 = vadd.s32 200, %v7741_v5  ;;  %v1970_v34 = vunpack.c.l.b16 %v1319_v55  ;;  %v8543_v55 = vld [vmem:[%s7731_s8 + $0x58] sm:$0xff] }
 0x16c   : > { %2689 = vmatmul.bf16.gmra.mxu1 %v8509_v3  ;;  %v2074_v39 = vpop.f32.mrf.mxu2 }
 0x16d   : > { %10231 = vst [vmem:[#allocation66_spill] sm:$0xff] %v8523_v6  ;;  %v2151_v13 = vadd.f32 %v2074_v39, %v8252_v31  ;;  %v2266_v11 = vpop.f32.mrf.mxu3  ;;  %v1971_v6 = vunpack.c.l.b16 %v1320_v57  ;;  %v497_v31 = vand.u32 15, %v307_v37  ;;  %v10233_v39 = vunpack.c.l.bf16 %v7964_v41 }
 0x16e   : > { %v2460_v49 = vpop.f32.mrf.mxu0  ;;  %v10235_v57 = vmov 0 }
 0x16f   : > { %v2343_v54 = vadd.f32 %v2266_v11, %v2151_v13  ;;  %v1105_v45 = vrot.slane %v10233_v39, 1  ;;  %vm8546_vm2 = vcmp.eq.s32.totalorder %v497_v31, 15 }
 0x170   : > { %v10236_v57 = vsel %vm8546_vm2, 4294967295, %v10235_v57 }
 0x171   : > { %v2652_v63 = vpop.f32.mrf.mxu1  ;;  %v2535_v19 = vadd.f32 %v2458_v52, %v2343_v54  ;;  %v1106_v52 = vrot.slane %v10234_v58, 1  ;;  %10237 = vst [vmem:[#allocation67_spill] sm:$0xff] %v10236_v57  ;;  %v6941_v57 = vld [vmem:[#allocation6 + $0x208] sm:$0xff] }
 0x172   : > { %3218 = vmatpush.bf16.msra.mxu0 %v6941_v57  ;;  %v10242_v57 = vmov 0 }
 0x173   : > { %v8532_v23 = vadd.f32 %v2650_v9, %v2535_v19  ;;  %v8539_v9 = vpack.c.b16 %v1971_v6, %v1970_v34  ;;  %v1126_v41 = vsel %vm10160_vm10, %v1105_v45, %v1106_v52  ;;  %v6933_v19 = vld [vmem:[#allocation6 + $0x1c8] sm:$0xff]  ;;  %v1127_v34 = vsel %vm10239_vm15, %v1104_v42, %v1105_v45 }
 0x174   : > { %v2076_v47 = vpop.f32.mrf.mxu2  ;;  %3026 = vmatpush.bf16.msra.mxu3 %v6933_v19  ;;  %v1321_v39 = vpack.c.bf16 %v1127_v34, %v1127_v34 }
 0x175   : > { %v2152_v48 = vadd.f32 %v2076_v47, %v8270_v50  ;;  %v2268_v22 = vpop.f32.mrf.mxu3 }
 0x176   : > { %v2463_v13 = vpop.f32.mrf.mxu0  ;;  %v1972_v42 = vunpack.c.l.b16 %v1321_v39  ;;  %v8573_v39 = vld [vmem:[%s7731_s8 + $0x60] sm:$0xff] }
 0x177   : > { %v2344_v11 = vadd.f32 %v2268_v22, %v2152_v48  ;;  %v6925_v22 = vld [vmem:[#allocation6 + $0x188] sm:$0xff] }
 0x178   : > { %2834 = vmatpush.bf16.msra.mxu2 %v6925_v22 }
 0x179   : > { %v2655_v54 = vpop.f32.mrf.mxu1  ;;  %2118 = vmatmul.bf16.gmra.mxu2 %v8509_v3  ;;  %2502 = vmatmul.bf16.gmra.mxu0 %v8543_v55  ;;  %v2536_v50 = vadd.f32 %v2460_v49, %v2344_v11  ;;  %v1250_v49 = vsel %vm8546_vm2, 0.0, %v1126_v41  ;;  %vm10246_vm2 = vmmov %vm10160_vm10 }
 0x17a   : > { %2310 = vmatmul.bf16.gmra.mxu3 %v7975_v60 }
 0x17b   : > { %v8553_v6 = vadd.f32 %v2652_v63, %v2536_v50  ;;  %v1322_v63 = vpack.c.bf16 %v1250_v49, %v1250_v49  ;;  %v309_v50 = vadd.s32 216, %v7741_v5  ;;  %v10241_v49 = vunpack.c.h.bf16 %v8015_v17 }
 0x17c   : > { %2694 = vmatmul.bf16.gmra.mxu1 %v8539_v9  ;;  %v2079_v37 = vpop.f32.mrf.mxu2 }
 0x17d   : > { %10238 = vst [vmem:[#allocation68_spill] sm:$0xff] %v8553_v6  ;;  %v2153_v15 = vadd.f32 %v2079_v37, %v8285_v24  ;;  %v2271_v47 = vpop.f32.mrf.mxu3  ;;  %v1973_v45 = vunpack.c.l.b16 %v1322_v63  ;;  %v511_v19 = vand.u32 15, %v309_v50  ;;  %v10240_v37 = vunpack.c.l.bf16 %v8015_v17 }
 0x17e   : > { %v2465_v48 = vpop.f32.mrf.mxu0 }
 0x17f   : > { %v2345_v31 = vadd.f32 %v2271_v47, %v2153_v15  ;;  %v1107_v34 = vrot.slane %v10240_v37, 1  ;;  %vm8576_vm15 = vcmp.eq.s32.totalorder %v511_v19, 15 }
 0x180   : > { %v10243_v57 = vsel %vm8576_vm15, 4294967295, %v10242_v57 }
 0x181   : > { %v2657_v58 = vpop.f32.mrf.mxu1  ;;  %v2537_v11 = vadd.f32 %v2463_v13, %v2345_v31  ;;  %v1108_v13 = vrot.slane %v10241_v49, 1  ;;  %10244 = vst [vmem:[#allocation69_spill] sm:$0xff] %v10243_v57  ;;  %v1125_v50 = vsel %vm10246_vm2, %v1106_v52, %v1107_v34  ;;  %v6971_v52 = vld [vmem:[#allocation8 + $0x28] sm:$0xff] }
 0x182   : > { %4052 = vmatpush.bf16.msra.mxu1 %v6971_v52 }
 0x183   : > { %v8562_v6 = vadd.f32 %v2655_v54, %v2537_v11  ;;  %v8569_v54 = vpack.c.b16 %v1973_v45, %v1972_v42  ;;  %v1124_v17 = vsel %vm10160_vm10, %v1107_v34, %v1108_v13 }
 0x184   : > { %v2081_v41 = vpop.f32.mrf.mxu2 }
 0x185   : > { %v2154_v22 = vadd.f32 %v2081_v41, %v8303_v21  ;;  %v2273_v24 = vpop.f32.mrf.mxu3 }
 0x186   : > { %v2468_v15 = vpop.f32.mrf.mxu0 }
 0x187   : > { %v2346_v47 = vadd.f32 %v2273_v24, %v2154_v22  ;;  %v1323_v24 = vpack.c.bf16 %v1125_v50, %v1125_v50 }
 0x189   : > { %v2660_v31 = vpop.f32.mrf.mxu1  ;;  %2123 = vmatmul.bf16.gmra.mxu2 %v8539_v9  ;;  %2507 = vmatmul.bf16.gmra.mxu0 %v8573_v39  ;;  %v2538_v21 = vadd.f32 %v2465_v48, %v2346_v47  ;;  %v1252_v48 = vsel %vm8576_vm15, 0.0, %v1124_v17  ;;  %vm10253_vm15 = vmmov %vm10160_vm10 }
 0x18a   : > { %2315 = vmatmul.bf16.gmra.mxu3 %v8026_v61  ;;  %v1324_v19 = vpack.c.bf16 %v1252_v48, %v1252_v48  ;;  %v10248_v48 = vunpack.c.h.bf16 %v8066_v46 }
 0x18b   : > { %v8583_v63 = vadd.f32 %v2657_v58, %v2538_v21  ;;  %v311_v58 = vadd.s32 232, %v7741_v5  ;;  %v1974_v21 = vunpack.c.l.b16 %v1323_v24  ;;  %v8603_v24 = vld [vmem:[%s7731_s8 + $0x68] sm:$0xff] }
 0x18c   : > { %2699 = vmatmul.bf16.gmra.mxu1 %v8569_v54  ;;  %v2084_v11 = vpop.f32.mrf.mxu2 }
 0x18d   : > { %10245 = vst [vmem:[#allocation70_spill] sm:$0xff] %v8583_v63  ;;  %v2155_v42 = vadd.f32 %v2084_v11, %v8318_v32  ;;  %v2276_v45 = vpop.f32.mrf.mxu3  ;;  %v1975_v63 = vunpack.c.l.b16 %v1324_v19  ;;  %v525_v32 = vand.u32 15, %v311_v58  ;;  %v10247_v11 = vunpack.c.l.bf16 %v8066_v46 }
 0x18e   : > { %v2470_v41 = vpop.f32.mrf.mxu0  ;;  %v10249_v19 = vmov 0 }
 0x18f   : > { %v2347_v22 = vadd.f32 %v2276_v45, %v2155_v42  ;;  %v1109_v50 = vrot.slane %v10247_v11, 1  ;;  %vm8606_vm2 = vcmp.eq.s32.totalorder %v525_v32, 15  ;;  %v8622_v32 = vld [vmem:[%s7731_s8 + $0x80] sm:$0xff]  }
 0x190   : > { %v10250_v19 = vsel %vm8606_vm2, 4294967295, %v10249_v19 }
 0x191   : > { %v2662_v37 = vpop.f32.mrf.mxu1  ;;  %v2539_v49 = vadd.f32 %v2468_v15, %v2347_v22  ;;  %v1110_v15 = vrot.slane %v10248_v48, 1  ;;  %10251 = vst [vmem:[#allocation71_spill] sm:$0xff] %v10250_v19 }
 0x193   : > { %v8592_v47 = vadd.f32 %v2660_v31, %v2539_v49  ;;  %v8599_v31 = vpack.c.b16 %v1975_v63, %v1974_v21  ;;  %v1122_v46 = vsel %vm10160_vm10, %v1109_v50, %v1110_v15  ;;  %v6932_v49 = vld [vmem:[#allocation6 + $0x1c0] sm:$0xff] }
 0x194   : > { %v2086_v34 = vpop.f32.mrf.mxu2  ;;  %v1254_v21 = vsel %vm8606_vm2, 0.0, %v1122_v46  ;;  %3027 = vmatpush.bf16.msra.mxu3 %v6932_v49  ;;  %vm10262_vm2 = vmmov %vm10160_vm10 }
 0x195   : > { %v2156_v17 = vadd.f32 %v2086_v34, %v8336_v7  ;;  %v2278_v57 = vpop.f32.mrf.mxu3  ;;  %v1326_v48 = vpack.c.bf16 %v1254_v21, %v1254_v21  ;;  %v10256_v21 = vunpack.c.l.bf16 %v8117_v28 }
 0x196   : > { %v2473_v42 = vpop.f32.mrf.mxu0 }
 0x197   : > { %v2348_v45 = vadd.f32 %v2278_v57, %v2156_v17  ;;  %v6924_v57 = vld [vmem:[#allocation6 + $0x180] sm:$0xff] }
 0x198   : > { %2835 = vmatpush.bf16.msra.mxu2 %v6924_v57  ;;  %v6940_v57 = vld [vmem:[#allocation6 + $0x200] sm:$0xff] }
 0x199   : > { %v2665_v22 = vpop.f32.mrf.mxu1  ;;  %2128 = vmatmul.bf16.gmra.mxu2 %v8569_v54  ;;  %2512 = vmatmul.bf16.gmra.mxu0 %v8603_v24  ;;  %v2540_v7 = vadd.f32 %v2470_v41, %v2348_v45  ;;  %v1123_v41 = vsel %vm10253_vm15, %v1108_v13, %v1109_v50  ;;  %v895_v13 = vunpack.c.l.bf16 %v8622_v32 }
 0x19a   : > { %2320 = vmatmul.bf16.gmra.mxu3 %v8077_v38  ;;  %v1325_v11 = vpack.c.bf16 %v1123_v41, %v1123_v41  ;;  %3219 = vmatpush.bf16.msra.mxu0 %v6940_v57  ;;  %v8656_v57 = vld [vmem:[%s7731_s8 + $0x88] sm:$0xf] }
 0x19b   : > { %v8613_v63 = vadd.f32 %v2662_v37, %v2540_v7  ;;  %10263 = vst [vmem:[#allocation78_spill] sm:$0xff] %v8656_v57 }
 0x19c   : > { %2704 = vmatmul.bf16.gmra.mxu1 %v8599_v31  ;;  %v2089_v58 = vpop.f32.mrf.mxu2  ;;  %v1976_v46 = vunpack.c.l.b16 %v1325_v11  ;;  %v8637_v11 = vld [vmem:[%s7731_s8 + $0x70] sm:$0xff] }
 0x19d   : > { %10252 = vst [vmem:[#allocation72_spill] sm:$0xff] %v8613_v63  ;;  %v2157_v52 = vadd.f32 %v2089_v58, %v8351_v62  ;;  %v2281_v34 = vpop.f32.mrf.mxu3  ;;  %v313_v63 = vadd.s32 248, %v7741_v5  ;;  %v1977_v62 = vunpack.c.l.b16 %v1326_v48 }
 0x19e   : > { %v2475_v17 = vpop.f32.mrf.mxu0  ;;  %10257 = vst [vmem:[#allocation75_spill] sm:$0xff] %v8637_v11 }
 0x19f   : > { %v2349_v37 = vadd.f32 %v2281_v34, %v2157_v52  ;;  %v539_v41 = vand.u32 15, %v313_v63  ;;  %v1111_v52 = vrot.slane %v10256_v21, 1  ;;  %v10259_v63 = vmov 0 }
 0x1a1   : > { %v8624_v45 = vpop.f32.mrf.mxu1  ;;  %v2541_v7 = vadd.f32 %v2473_v42, %v2349_v37  ;;  %v1112_v42 = vrot.slane %v895_v13, 1  ;;  %vm8642_vm15 = vcmp.eq.s32.totalorder %v539_v41, 15  ;;  %v1121_v48 = vsel %vm10262_vm2, %v1110_v15, %v1111_v52 }
 0x1a2   : > { %10254 = vst [vmem:[#allocation73_spill] sm:$0xff] %v8624_v45  ;;  %v8633_v45 = vpack.c.b16 %v1977_v62, %v1976_v46  ;;  %v10260_v63 = vsel %vm8642_vm15, 4294967295, %v10259_v63  ;;  %v10018_v15 = vunpack.c.l.bf16 %v8656_v57 }
 0x1a3   : > { %v8628_v50 = vadd.f32 %v2665_v22, %v2541_v7  ;;  %10261 = vst [vmem:[#allocation77_spill] sm:$0xff] %v10260_v63  ;;  %v1120_v28 = vsel %vm10160_vm10, %v1111_v52, %v1112_v42  ;;  %v6970_v63 = vld [vmem:[#allocation8 + $0x20] sm:$0xff]  ;;  %vm10270_vm10 = vcmp.lt.s32.totalorder %v7741_v5, 1 }
 0x1a4   : > { %v2091_v49 = vpop.f32.mrf.mxu2  ;;  %v1256_v7 = vsel %vm8642_vm15, 0.0, %v1120_v28  ;;  %4053 = vmatpush.bf16.msra.mxu1 %v6970_v63 }
 0x1a5   : > { %10255 = vst [vmem:[#allocation74_spill] sm:$0xff] %v8628_v50  ;;  %v2158_v58 = vadd.f32 %v2091_v49, %v8369_v0  ;;  %v2283_v19 = vpop.f32.mrf.mxu3  ;;  %v1328_v41 = vpack.c.bf16 %v1256_v7, %v1256_v7  ;;  %v315_v50 = vadd.s32 264, %v7741_v5 }
 0x1a6   : > { %v2478_v34 = vpop.f32.mrf.mxu0 }
 0x1a7   : > { %v2350_v37 = vadd.f32 %v2283_v19, %v2158_v58  ;;  %v1327_v58 = vpack.c.bf16 %v1121_v48, %v1121_v48  ;;  %v931_v48 = vrot.slane %v895_v13, 7  ;;  %v8684_v13 = vld [vmem:[%s7731_s8 + $0x78] sm:$0xff] }
 0x1a9   : > { %v2670_v22 = vpop.f32.mrf.mxu1  ;;  %2133 = vmatmul.bf16.gmra.mxu2 %v8599_v31  ;;  %2517 = vmatmul.bf16.gmra.mxu0 %v8637_v11  ;;  %v8640_v0 = vadd.f32 %v2475_v17, %v2350_v37  ;;  %v314_v37 = vadd.s32 256, %v7741_v5  ;;  %v1978_v28 = vunpack.c.l.b16 %v1327_v58 }
 0x1aa   : > { %2325 = vmatmul.bf16.gmra.mxu3 %v8127_v33 }
 0x1ab   : > { %10258 = vst [vmem:[#allocation76_spill] sm:$0xff] %v8640_v0 }
 0x1ac   : > { %2709 = vmatmul.bf16.gmra.mxu1 %v8633_v45  ;;  %v2094_v19 = vpop.f32.mrf.mxu2 }
 0x1ad   : > { %v2159_v17 = vadd.f32 %v2094_v19, %v8384_v30  ;;  %v2286_v46 = vpop.f32.mrf.mxu3  ;;  %v1979_v30 = vunpack.c.l.b16 %v1328_v41  ;;  %v896_v19 = vunpack.c.h.bf16 %v8622_v32 }
 0x1ae   : > { %v2480_v62 = vpop.f32.mrf.mxu0 }
 0x1af   : > { %v2351_v49 = vadd.f32 %v2286_v46, %v2159_v17  ;;  %v546_v17 = vand.u32 15, %v314_v37  ;;  %v8671_v58 = vpack.c.b16 %v1979_v30, %v1978_v28  ;;  %v8673_v32 = vrot.slane %v896_v19, 7 }
 0x1b0   : > { %v10267_v37 = vmov 0 }
 0x1b1   : > { %v8658_v21 = vpop.f32.mrf.mxu1  ;;  %v2543_v0 = vadd.f32 %v2478_v34, %v2351_v49  ;;  %v553_v34 = vand.u32 15, %v315_v50  ;;  %v1113_v49 = vrot.slane %v896_v19, 1  ;;  %10266 = vst [vmem:[#allocation81_spill] sm:$0xff] %v8673_v32  ;;  %vm8675_vm2 = vcmp.eq.s32.totalorder %v546_v17, 0 }
 0x1b2   : > { %10264 = vst [vmem:[#allocation79_spill] sm:$0xff] %v8658_v21  ;;  %v8669_v21 = vrot.slane %v10018_v15, 1  ;;  %v10268_v37 = vsel %vm8675_vm2, 4294967295, %v10267_v37 }
 0x1b3   : > { %v8663_v52 = vadd.f32 %v2670_v22, %v2543_v0  ;;  %10269 = vst [vmem:[#allocation82_spill] sm:$0xff] %v10268_v37  ;;  %vm8689_vm15 = vcmp.eq.s32.totalorder %v553_v34, 15  ;;  %v1119_v30 = vsel %vm10276_vm4, %v1112_v42, %v1113_v49  ;;  %vm10296_vm4 = vmmov %vm10270_vm10 }
 0x1b4   : > { %v2096_v11 = vpop.f32.mrf.mxu2  ;;  %10265 = vst [vmem:[#allocation80_spill] sm:$0xff] %v8669_v21  ;;  %v1118_v63 = vsel %vm10275_vm14, %v1113_v49, %v8669_v21  ;;  %v1329_v21 = vpack.c.bf16 %v1119_v30, %v1119_v30  ;;  %vm10295_vm14 = vmmov %vm10270_vm10 }
 0x1b5   : > { %v2160_v7 = vadd.f32 %v2096_v11, %v8402_v56  ;;  %v2288_v46 = vpop.f32.mrf.mxu3  ;;  %v939_v56 = vsel %vm10270_vm10, %v8138_v59, %v931_v48  ;;  %v10272_v11 = vmov 0  ;;  %v938_v59 = vsel %vm10270_vm10, %v931_v48, %v8673_v32 }
 0x1b6   : > { %v2483_v22 = vpop.f32.mrf.mxu0  ;;  %v10273_v11 = vsel %vm8689_vm15, 4294967295, %v10272_v11  ;;  %v1258_v19 = vsel %vm8689_vm15, 0.0, %v1118_v63  ;;  %v2584_v42 = vunpack.c.l.b16 %v1329_v21 }
 0x1b7   : > { %v2352_v0 = vadd.f32 %v2288_v46, %v2160_v7  ;;  %10274 = vst [vmem:[#allocation84_spill] sm:$0xff] %v10273_v11  ;;  %v1330_v48 = vpack.c.bf16 %v1258_v19, %v1258_v19  ;;  %v8714_v11 = vld [vmem:[%s7731_s8 + $0x80] sm:$0xff] }
 0x1b9   : > { %v2675_v41 = vpop.f32.mrf.mxu1  ;;  %2138 = vmatmul.bf16.gmra.mxu2 %v8633_v45  ;;  %2522 = vmatmul.bf16.gmra.mxu0 %v8684_v13  ;;  %v8687_v50 = vadd.f32 %v2480_v62, %v2352_v0  ;;  %v1076_v62 = vsel %vm8675_vm2, 0.0, %v939_v56  ;;  %v1294_v0 = vpack.c.bf16 %v938_v59, %v938_v59  ;;  %v2585_v49 = vunpack.c.l.b16 %v1330_v48 }
 0x1ba   : > { %2330 = vmatmul.bf16.gmra.mxu3 %v8171_v1  ;;  %v1293_v34 = vpack.c.bf16 %v1076_v62, %v1076_v62 }
 0x1bb   : > { %10271 = vst [vmem:[#allocation83_spill] sm:$0xff] %v8687_v50  ;;  %v2201_v32 = vunpack.c.l.b16 %v1294_v0  ;;  %v8718_v19 = vpack.c.b16 %v2585_v49, %v2584_v42  ;;  %v6969_v0 = vld [vmem:[#allocation8 + $0x18] sm:$0xff] }
 0x1bc   : > { %2714 = vmatmul.bf16.gmra.mxu1 %v8671_v58  ;;  %v2099_v28 = vpop.f32.mrf.mxu2  ;;  %v2200_v37 = vunpack.c.l.b16 %v1293_v34 }
 0x1bd   : > { %v2161_v17 = vadd.f32 %v2099_v28, %v8417_v40  ;;  %v2291_v7 = vpop.f32.mrf.mxu3  ;;  %4054 = vmatpush.bf16.msra.mxu1 %v6969_v0 }
 0x1be   : > { %v2485_v46 = vpop.f32.mrf.mxu0  ;;  %v8716_v59 = vpack.c.b16 %v2201_v32, %v2200_v37 }
 0x1bf   : > { %v2353_v15 = vadd.f32 %v2291_v7, %v2161_v17 }
 0x1c1   : > { %v8708_v50 = vpop.f32.mrf.mxu1  ;;  %v2545_v56 = vadd.f32 %v2483_v22, %v2353_v15 }
 0x1c3   : > { %v8710_v57 = vadd.f32 %v2675_v41, %v2545_v56 }
 0x1c4   : > { %v2101_v63 = vpop.f32.mrf.mxu2 }
 0x1c5   : > { %v2162_v40 = vadd.f32 %v2101_v63, %v8435_v53  ;;  %v2293_v28 = vpop.f32.mrf.mxu3 }
 0x1c6   : > { %v2488_v62 = vpop.f32.mrf.mxu0 }
 0x1c7   : > { %v2354_v30 = vadd.f32 %v2293_v28, %v2162_v40  ;;  %v7410_v40 = vld [vmem:[%s7731_s8 + $0x10] sm:$0xff] }
 0x1c9   : > { %v2680_v17 = vpop.f32.mrf.mxu1  ;;  %2143 = vmatmul.bf16.gmra.mxu2 %v8671_v58  ;;  %2527 = vmatmul.bf16.gmra.mxu0 %v8714_v11  ;;  %v8722_v15 = vadd.f32 %v2485_v46, %v2354_v30 }
 0x1ca   : > { %2335 = vmatmul.bf16.gmra.mxu3 %v8716_v59 }
 0x1cc   : > { %2719 = vmatmul.bf16.gmra.mxu1 %v8718_v19  ;;  %v2104_v53 = vpop.f32.mrf.mxu2 }
 0x1cd   : > { %v2163_v21 = vadd.f32 %v2104_v53, %v8453_v43  ;;  %v2296_v22 = vpop.f32.mrf.mxu3 }
 0x1ce   : > { %v2490_v32 = vpop.f32.mrf.mxu0 }
 0x1cf   : > { %v2355_v41 = vadd.f32 %v2296_v22, %v2163_v21 }
 0x1d1   : > { %v8727_v37 = vpop.f32.mrf.mxu1  ;;  %v2547_v7 = vadd.f32 %v2488_v62, %v2355_v41 }
 0x1d3   : > { %v8729_v34 = vadd.f32 %v2680_v17, %v2547_v7 }
 0x1d4   : > { %v2106_v48 = vpop.f32.mrf.mxu2 }
 0x1d5   : > { %v2164_v46 = vadd.f32 %v2106_v48, %v8471_v16  ;;  %v2298_v56 = vpop.f32.mrf.mxu3  ;;  %v7411_v48 = vld [vmem:[%s7731_s8 + $0x18] sm:$0xff] }
 0x1d6   : > { %v2493_v42 = vpop.f32.mrf.mxu0 }
 0x1d7   : > { %v2356_v49 = vadd.f32 %v2298_v56, %v2164_v46 }
 0x1d9   : > { %v2685_v63 = vpop.f32.mrf.mxu1  ;;  %2836 = vmatmul.bf16.vlgmr.msra.gmra.mxu2 %v7922_v12  ;;  %3220 = vmatmul.bf16.vlgmr.msra.gmra.mxu0 %v8249_v36  ;;  %v8734_v43 = vadd.f32 %v2490_v32, %v2356_v49 }
 0x1da   : > { %3028 = vmatmul.bf16.vlgmr.msra.gmra.mxu3 %v7410_v40 }
 0x1dc   : > { %v2109_v28 = vpop.f32.mrf.mxu2 }
 0x1dd   : > { %v2165_v62 = vadd.f32 %v2109_v28, %v8235_v35  ;;  %v2301_v30 = vpop.f32.mrf.mxu3 }
 0x1de   : > { %v2495_v17 = vpop.f32.mrf.mxu0 }
 0x1df   : > { %v2357_v16 = vadd.f32 %v2301_v30, %v2165_v62  ;;  %v6968_v62 = vld [vmem:[#allocation8 + $0x10] sm:$0xff] }
 0x1e0   : > { %4055 = vmatpush.bf16.msra.mxu1 %v6968_v62 }
 0x1e1   : > { %v8738_v53 = vpop.f32.mrf.mxu1  ;;  %v2549_v21 = vadd.f32 %v2493_v42, %v2357_v16 }
 0x1e3   : > { %v8740_v22 = vadd.f32 %v2685_v63, %v2549_v21 }
 0x1e4   : > { %v2111_v41 = vpop.f32.mrf.mxu2 }
 0x1e5   : > { %v2166_v12 = vadd.f32 %v2111_v41, %v8246_v2  ;;  %v2303_v36 = vpop.f32.mrf.mxu3  ;;  %v10277_v41 = vld [vmem:[#allocation28_spill] sm:$0xff] }
 0x1e6   : > { %v2498_v32 = vpop.f32.mrf.mxu0 }
 0x1e7   : > { %v2358_v7 = vadd.f32 %v2303_v36, %v2166_v12  ;;  %v7412_v12 = vld [vmem:[%s7731_s8 + $0x20] sm:$0xff] }
 0x1e9   : > { %v2690_v0 = vpop.f32.mrf.mxu1  ;;  %2841 = vmatmul.bf16.gmra.mxu2 %v7973_v51  ;;  %3225 = vmatmul.bf16.gmra.mxu0 %v8281_v8  ;;  %v8745_v35 = vadd.f32 %v2495_v17, %v2358_v7 }
 0x1ea   : > { %3033 = vmatmul.bf16.gmra.mxu3 %v7411_v48 }
 0x1ec   : > { %v2114_v46 = vpop.f32.mrf.mxu2 }
 0x1ed   : > { %v2167_v56 = vadd.f32 %v2114_v46, %v8267_v25  ;;  %v2306_v42 = vpop.f32.mrf.mxu3 }
 0x1ee   : > { %v2500_v49 = vpop.f32.mrf.mxu0 }
 0x1ef   : > { %v2359_v63 = vadd.f32 %v2306_v42, %v2167_v56 }
 0x1f1   : > { %v8749_v2 = vpop.f32.mrf.mxu1  ;;  %v2551_v40 = vadd.f32 %v2498_v32, %v2359_v63  ;;  %v10278_v32 = vld [vmem:[#allocation43_spill] sm:$0xff] }
 0x1f3   : > { %v8751_v28 = vadd.f32 %v2690_v0, %v2551_v40  ;;  %v10281_v40 = vld [vmem:[#allocation44_spill] sm:$0xff] }
 0x1f4   : > { %v2116_v51 = vpop.f32.mrf.mxu2 }
 0x1f5   : > { %v2168_v8 = vadd.f32 %v2116_v51, %v8278_v18  ;;  %v2308_v30 = vpop.f32.mrf.mxu3 }
 0x1f6   : > { %v2503_v17 = vpop.f32.mrf.mxu0 }
 0x1f7   : > { %v2360_v16 = vadd.f32 %v2308_v30, %v2168_v8 }
 0x1f9   : > { %v2695_v21 = vpop.f32.mrf.mxu1  ;;  %2846 = vmatmul.bf16.gmra.mxu2 %v10277_v41  ;;  %3230 = vmatmul.bf16.gmra.mxu0 %v8314_v26  ;;  %v8756_v25 = vadd.f32 %v2500_v49, %v2360_v16  ;;  %v7413_v16 = vld [vmem:[%s7731_s8 + $0x28] sm:$0xff] }
 0x1fa   : > { %3038 = vmatmul.bf16.gmra.mxu3 %v7412_v12  ;;  %v10283_v12 = vld [vmem:[#allocation46_spill] sm:$0xff] }
 0x1fc   : > { %v2119_v36 = vpop.f32.mrf.mxu2 }
 0x1fd   : > { %v2169_v7 = vadd.f32 %v2119_v36, %v10278_v32  ;;  %v2311_v0 = vpop.f32.mrf.mxu3 }
 0x1fe   : > { %v2505_v48 = vpop.f32.mrf.mxu0 }
 0x1ff   : > { %v2361_v18 = vadd.f32 %v2311_v0, %v2169_v7 }
 0x201   : > { %v8760_v46 = vpop.f32.mrf.mxu1  ;;  %v2553_v56 = vadd.f32 %v2503_v17, %v2361_v18 }
 0x202   : > { %10279 = vst [vmem:[#allocation28_spill] sm:$0xff] %v8760_v46 }
 0x203   : > { %v8762_v42 = vadd.f32 %v2695_v21, %v2553_v56  ;;  %v6967_v56 = vld [vmem:[#allocation8 + $0x8] sm:$0xff] }
 0x204   : > { %v2121_v63 = vpop.f32.mrf.mxu2  ;;  %4056 = vmatpush.bf16.msra.mxu1 %v6967_v56 }
 0x205   : > { %10280 = vst [vmem:[#allocation43_spill] sm:$0xff] %v8762_v42  ;;  %v2170_v62 = vadd.f32 %v2121_v63, %v10281_v40  ;;  %v2313_v26 = vpop.f32.mrf.mxu3  ;;  %v10286_v63 = vld [vmem:[#allocation47_spill] sm:$0xff] }
 0x206   : > { %v2508_v49 = vpop.f32.mrf.mxu0 }
 0x207   : > { %v2362_v51 = vadd.f32 %v2313_v26, %v2170_v62 }
 0x209   : > { %v2700_v8 = vpop.f32.mrf.mxu1  ;;  %2851 = vmatmul.bf16.gmra.mxu2 %v8075_v44  ;;  %3235 = vmatmul.bf16.gmra.mxu0 %v8347_v4  ;;  %v8767_v30 = vadd.f32 %v2505_v48, %v2362_v51  ;;  %v10287_v51 = vld [vmem:[#allocation33_spill] sm:$0xff] }
 0x20a   : > { %3043 = vmatmul.bf16.gmra.mxu3 %v7413_v16 }
 0x20b   : > { %10282 = vst [vmem:[#allocation44_spill] sm:$0xff] %v8767_v30 }
 0x20c   : > { %v2124_v41 = vpop.f32.mrf.mxu2 }
 0x20d   : > { %v2171_v17 = vadd.f32 %v2124_v41, %v10283_v12  ;;  %v2316_v21 = vpop.f32.mrf.mxu3  ;;  %v7414_v41 = vld [vmem:[%s7731_s8 + $0x30] sm:$0xff] }
 0x20e   : > { %v2510_v36 = vpop.f32.mrf.mxu0 }
 0x20f   : > { %v2363_v32 = vadd.f32 %v2316_v21, %v2171_v17  ;;  %v10290_v17 = vld [vmem:[#allocation49_spill] sm:$0xff] }
 0x211   : > { %v8771_v7 = vpop.f32.mrf.mxu1  ;;  %v2555_v0 = vadd.f32 %v2508_v49, %v2363_v32  ;;  %v8781_v49 = vld [vmem:[#allocation2] sm:$0xff]  }
 0x212   : > { %10284 = vst [vmem:[#allocation46_spill] sm:$0xff] %v8771_v7 }
 0x213   : > { %v8773_v18 = vadd.f32 %v2700_v8, %v2555_v0  ;;  %v8783_v8 = vld [vmem:[#allocation2 + $0x8c] sm:$0xf]  ;;  %v10024_v0 = vunpack.c.l.bf16 %v8781_v49 }
 0x214   : > { %v2126_v44 = vpop.f32.mrf.mxu2  ;;  %10289 = vst [vmem:[#allocation33_spill] sm:$0xff] %v8783_v8  ;;  %v10026_v56 = vunpack.c.l.bf16 %v8783_v8 }
 0x215   : > { %10285 = vst [vmem:[#allocation85_spill] sm:$0xff] %v8773_v18  ;;  %v2172_v4 = vadd.f32 %v2126_v44, %v10286_v63  ;;  %v2318_v48 = vpop.f32.mrf.mxu3 }
 0x216   : > { %v2513_v40 = vpop.f32.mrf.mxu0 }
 0x217   : > { %v2364_v62 = vadd.f32 %v2318_v48, %v2172_v4  ;;  %v3502_v48 = vrot.slane %v10024_v0, 7 }
 0x219   : > { %v2705_v26 = vpop.f32.mrf.mxu1  ;;  %2856 = vmatmul.bf16.gmra.mxu2 %v10287_v51  ;;  %3240 = vmatmul.bf16.gmra.mxu0 %v8380_v27  ;;  %v8778_v16 = vadd.f32 %v2510_v36, %v2364_v62  ;;  %v10027_v27 = vunpack.c.h.bf16 %v8781_v49  ;;  %v8795_v62 = vrot.slane %v10026_v56, 7 }
 0x21a   : > { %3048 = vmatmul.bf16.gmra.mxu3 %v7414_v41 }
 0x21b   : > { %10288 = vst [vmem:[#allocation47_spill] sm:$0xff] %v8778_v16 }
 0x21c   : > { %v2129_v12 = vpop.f32.mrf.mxu2  ;;  %10292 = vst [vmem:[#allocation86_spill] sm:$0xff] %v8795_v62 }
 0x21d   : > { %v2173_v21 = vadd.f32 %v2129_v12, %v10290_v17  ;;  %v2321_v32 = vpop.f32.mrf.mxu3  ;;  %v8801_v12 = vrot.slane %v10027_v27, 7  ;;  %v10294_v17 = vld [vmem:[#allocation50_spill] sm:$0xff] }
 0x21e   : > { %v2515_v44 = vpop.f32.mrf.mxu0  ;;  %v10299_v27 = vld [vmem:[#allocation54_spill] sm:$0xff] }
 0x21f   : > { %v2365_v63 = vadd.f32 %v2321_v32, %v2173_v21 }
 0x221   : > { %v8788_v4 = vpop.f32.mrf.mxu1  ;;  %v2557_v36 = vadd.f32 %v2513_v40, %v2365_v63  ;;  %v3573_v40 = vsel %vm10295_vm14, %v8795_v62, %v3502_v48  ;;  %vm10317_vm14 = vcmp.lt.s32.totalorder %v7741_v5, 7 }
 0x222   : > { %10291 = vst [vmem:[#allocation49_spill] sm:$0xff] %v8788_v4  ;;  %v3574_v56 = vsel %vm7784_vm1, 0.0, %v3573_v40  ;;  %v10298_v4 = vld [vmem:[#allocation36_spill] sm:$0xff]  ;;  %vm10314_vm1 = vmmov %vm10296_vm4 }
 0x223   : > { %v8797_v51 = vadd.f32 %v2705_v26, %v2557_v36  ;;  %v3572_v26 = vsel %vm10296_vm4, %v3502_v48, %v8801_v12  ;;  %vm10315_vm10 = vmmov %vm10314_vm1 }
 0x224   : > { %v2131_v41 = vpop.f32.mrf.mxu2  ;;  %v3719_v62 = vpack.c.bf16 %v3572_v26, %v3572_v26  ;;  %vm10320_vm4 = vmmov %vm10314_vm1 }
 0x225   : > { %10293 = vst [vmem:[#allocation87_spill] sm:$0xff] %v8797_v51  ;;  %v2174_v21 = vadd.f32 %v2131_v41, %v10294_v17  ;;  %v2323_v32 = vpop.f32.mrf.mxu3  ;;  %v7415_v17 = vld [vmem:[%s7731_s8 + $0x38] sm:$0xff]  ;;  %v3718_v51 = vpack.c.bf16 %v3574_v56, %v3574_v56 }
 0x226   : > { %v2518_v63 = vpop.f32.mrf.mxu0  ;;  %v3939_v30 = vunpack.c.l.b16 %v3719_v62 }
 0x227   : > { %v2366_v0 = vadd.f32 %v2323_v32, %v2174_v21  ;;  %v10301_v21 = vld [vmem:[#allocation52_spill] sm:$0xff]  ;;  %v3938_v48 = vunpack.c.l.b16 %v3718_v51 }
 0x229   : > { %v2710_v8 = vpop.f32.mrf.mxu1  ;;  %2861 = vmatmul.bf16.gmra.mxu2 %v10298_v4  ;;  %3245 = vmatmul.bf16.gmra.mxu0 %v10299_v27  ;;  %v8814_v41 = vadd.f32 %v2515_v44, %v2366_v0  ;;  %v6966_v27 = vld [vmem:[#allocation8] sm:$0xff]  ;;  %v3970_v0 = vpack.c.b16 %v3939_v30, %v3938_v48 }
 0x22a   : > { %3053 = vmatmul.bf16.gmra.mxu3 %v7415_v17  ;;  %4057 = vmatpush.bf16.msra.mxu1 %v6966_v27 }
 0x22b   : > { %10300 = vst [vmem:[#allocation50_spill] sm:$0xff] %v8814_v41  ;;  %v10302_v41 = vld [vmem:[#allocation53_spill] sm:$0xff] }
 0x22c   : > { %v2134_v7 = vpop.f32.mrf.mxu2 }
 0x22d   : > { %v2175_v32 = vadd.f32 %v2134_v7, %v10301_v21  ;;  %v2326_v16 = vpop.f32.mrf.mxu3  ;;  %4058 = vmatmul.bf16.vlgmr.msra.gmra.mxu1 %v3970_v0  ;;  %v10303_v7 = vld [vmem:[#allocation18_spill] sm:$0xff]  ;;  %v10307_v0 = vld [vmem:[#allocation57_spill] sm:$0xff] }
 0x22e   : > { %v2520_v18 = vpop.f32.mrf.mxu0 }
 0x22f   : > { %v2367_v46 = vadd.f32 %v2326_v16, %v2175_v32  ;;  %v10304_v16 = vld [vmem:[#allocation58_spill] sm:$0xff] }
 0x231   : > { %v2559_v36 = vadd.f32 %v2518_v63, %v2367_v46  ;;  %v8818_v40 = vpop.f32.mrf.mxu1  ;;  %v10305_v46 = vld [vmem:[#allocation59_spill] sm:$0xff]  ;;  %v10306_v63 = vld [vmem:[#allocation56_spill] sm:$0xff] }
 0x233   : > { %v8820_v4 = vadd.f32 %v2710_v8, %v2559_v36 }
 0x234   : > { %v2136_v44 = vpop.f32.mrf.mxu2 }
 0x235   : > { %v2176_v17 = vadd.f32 %v2136_v44, %v10302_v41  ;;  %v2328_v56 = vpop.f32.mrf.mxu3 }
 0x236   : > { %v2523_v26 = vpop.f32.mrf.mxu0 }
 0x237   : > { %v2368_v42 = vadd.f32 %v2328_v56, %v2176_v17 }
 0x239   : > { %2866 = vmatmul.bf16.gmra.mxu2 %v10303_v7  ;;  %3250 = vmatmul.bf16.gmra.mxu0 %v10304_v16  ;;  %v8825_v62 = vadd.f32 %v2520_v18, %v2368_v42  ;;  %v2715_v51 = vpop.f32.mrf.mxu1  ;;  %v10308_v18 = vld [vmem:[#allocation21_spill] sm:$0xff] }
 0x23a   : > { %3058 = vmatmul.bf16.gmra.mxu3 %v10305_v46  ;;  %v10309_v46 = vld [vmem:[#allocation63_spill] sm:$0xff] }
 0x23c   : > { %v2139_v8 = vpop.f32.mrf.mxu2 }
 0x23d   : > { %v2177_v30 = vadd.f32 %v2139_v8, %v10306_v63  ;;  %v2331_v21 = vpop.f32.mrf.mxu3 }
 0x23e   : > { %v2525_v32 = vpop.f32.mrf.mxu0 }
 0x23f   : > { %v2369_v41 = vadd.f32 %v2331_v21, %v2177_v30 }
 0x241   : > { %v2561_v48 = vadd.f32 %v2523_v26, %v2369_v41  ;;  %v8832_v7 = vpop.f32.mrf.mxu1  ;;  %v10310_v26 = vld [vmem:[#allocation61_spill] sm:$0xff]  ;;  %v6981_v41 = vld [vmem:[#allocation8 + $0x78] sm:$0xff] }
 0x242   : > { %4332 = vmatpush.bf16.msrb.mxu2 %v6981_v41 }
 0x243   : > { %v8829_v36 = vadd.f32 %v2715_v51, %v2561_v48  ;;  %v6989_v48 = vld [vmem:[#allocation8 + $0xb8] sm:$0xff] }
 0x244   : > { %v2141_v27 = vpop.f32.mrf.mxu2  ;;  %4614 = vmatpush.bf16.msrb.mxu3 %v6989_v48 }
 0x245   : > { %v2178_v44 = vadd.f32 %v2141_v27, %v10307_v0  ;;  %v2333_v17 = vpop.f32.mrf.mxu3 }
 0x246   : > { %v2528_v56 = vpop.f32.mrf.mxu0 }
 0x247   : > { %v2370_v42 = vadd.f32 %v2333_v17, %v2178_v44  ;;  %v6997_v17 = vld [vmem:[#allocation8 + $0xf8] sm:$0xff] }
 0x248   : > { %4806 = vmatpush.bf16.msrb.mxu0 %v6997_v17 }
 0x249   : > { %2871 = vmatmul.bf16.gmra.mxu2 %v10308_v18  ;;  %3255 = vmatmul.bf16.gmra.mxu0 %v8481_v10  ;;  %v8836_v16 = vadd.f32 %v2525_v32, %v2370_v42  ;;  %v2720_v27 = vpop.f32.mrf.mxu1  ;;  %v7005_v10 = vld [vmem:[#allocation8 + $0x138] sm:$0xff]  ;;  %v10311_v42 = vld [vmem:[#allocation62_spill] sm:$0xff] }
 0x24a   : > { %3063 = vmatmul.bf16.gmra.mxu3 %v10309_v46  ;;  %4998 = vmatpush.bf16.msrb.mxu1 %v7005_v10 }
 0x24c   : > { %v2144_v8 = vpop.f32.mrf.mxu2 }
 0x24d   : > { %v2179_v51 = vadd.f32 %v2144_v8, %v10310_v26  ;;  %v2336_v63 = vpop.f32.mrf.mxu3 }
 0x24e   : > { %v2530_v30 = vpop.f32.mrf.mxu0 }
 0x24f   : > { %v2371_v21 = vadd.f32 %v2336_v63, %v2179_v51 }
 0x251   : > { %v2563_v0 = vadd.f32 %v2528_v56, %v2371_v21 }
 0x253   : > { %v8840_v44 = vadd.f32 %v2720_v27, %v2563_v0  ;;  %v10312_v0 = vld [vmem:[#allocation66_spill] sm:$0xff] }
 0x254   : > { %v2146_v32 = vpop.f32.mrf.mxu2 }
 0x255   : > { %v2180_v18 = vadd.f32 %v2146_v32, %v10311_v42  ;;  %v2338_v46 = vpop.f32.mrf.mxu3 }
 0x256   : > { %v3221_v8 = vpop.f32.mrf.mxu0 }
 0x257   : > { %v2372_v26 = vadd.f32 %v2338_v46, %v2180_v18 }
 0x259   : > { %2876 = vmatmul.bf16.gmra.mxu2 %v7924_v29  ;;  %3260 = vmatmul.bf16.gmra.mxu0 %v8509_v3  ;;  %v8845_v51 = vadd.f32 %v2530_v30, %v2372_v26 }
 0x25a   : > { %3068 = vmatmul.bf16.gmra.mxu3 %v8513_v20 }
 0x25c   : > { %v2837_v56 = vpop.f32.mrf.mxu2 }
 0x25d   : > { %v3029_v63 = vpop.f32.mrf.mxu3  ;;  %v2917_v41 = vadd.f32 %v2837_v56, %v8502_v14 }
 0x25e   : > { %v3223_v21 = vpop.f32.mrf.mxu0 }
 0x25f   : > { %v3109_v48 = vadd.f32 %v3029_v63, %v2917_v41  ;;  %v6980_v63 = vld [vmem:[#allocation8 + $0x70] sm:$0xff] }
 0x260   : > { %v6988_v41 = vld [vmem:[#allocation8 + $0xb0] sm:$0xff]  ;;  %4333 = vmatpush.bf16.msrb.mxu2 %v6980_v63 }
 0x261   : > { %v3301_v42 = vadd.f32 %v3221_v8, %v3109_v48  ;;  %4615 = vmatpush.bf16.msrb.mxu3 %v6988_v41 }
 0x263   : > { %v3333_v3 = vmax.f32 %v3301_v42, 0.0 }
 0x264   : > { %v2839_v27 = vpop.f32.mrf.mxu2 }
 0x265   : > { %v2918_v17 = vadd.f32 %v2839_v27, %v10312_v0  ;;  %v3031_v10 = vpop.f32.mrf.mxu3 }
 0x266   : > { %v3226_v32 = vpop.f32.mrf.mxu0 }
 0x267   : > { %v3110_v18 = vadd.f32 %v3031_v10, %v2918_v17 }
 0x269   : > { %v3302_v29 = vadd.f32 %v3223_v21, %v3110_v18  ;;  %2881 = vmatmul.bf16.gmra.mxu2 %v7975_v60  ;;  %3265 = vmatmul.bf16.gmra.mxu0 %v8539_v9  ;;  %v6996_v21 = vld [vmem:[#allocation8 + $0xf0] sm:$0xff]  ;;  %v10313_v9 = vld [vmem:[#allocation68_spill] sm:$0xff] }
 0x26a   : > { %3073 = vmatmul.bf16.gmra.mxu3 %v8543_v55  ;;  %v7004_v60 = vld [vmem:[#allocation8 + $0x130] sm:$0xff]  ;;  %4807 = vmatpush.bf16.msrb.mxu0 %v6996_v21 }
 0x26b   : > { %v3334_v20 = vmax.f32 %v3302_v29, 0.0  ;;  %4999 = vmatpush.bf16.msrb.mxu1 %v7004_v60 }
 0x26c   : > { %v2842_v30 = vpop.f32.mrf.mxu2 }
 0x26d   : > { %v7042_v46 = vpack.c.bf16 %v3334_v20, %v3333_v3  ;;  %v3034_v14 = vpop.f32.mrf.mxu3  ;;  %v2919_v56 = vadd.f32 %v2842_v30, %v8532_v23 }
 0x26e   : > { %v3228_v26 = vpop.f32.mrf.mxu0 }
 0x26f   : > { %7043 = vst [vmem:[#allocation2 + $0x8] sm:$0xff] %v7042_v46   ;;  %v3111_v8 = vadd.f32 %v3034_v14, %v2919_v56 }
 0x271   : > { %v3303_v10 = vadd.f32 %v3226_v32, %v3111_v8 }
 0x273   : > { %v3335_v14 = vmax.f32 %v3303_v10, 0.0 }
 0x274   : > { %v2844_v48 = vpop.f32.mrf.mxu2 }
 0x275   : > { %v2920_v27 = vadd.f32 %v2844_v48, %v10313_v9  ;;  %v3036_v55 = vpop.f32.mrf.mxu3 }
 0x276   : > { %v3231_v0 = vpop.f32.mrf.mxu0  ;;  %v3432_v17 = vld [vmem:[#allocation2 + $0x8] sm:$0xff]  }
 0x277   : > { %v3112_v42 = vadd.f32 %v3036_v55, %v2920_v27  ;;  %v3468_v18 = vunpack.c.l.bf16 %v3432_v17  ;;  %v3469_v29 = vunpack.c.h.bf16 %v3432_v17 }
 0x279   : > { %v3304_v23 = vadd.f32 %v3228_v26, %v3112_v42  ;;  %2886 = vmatmul.bf16.gmra.mxu2 %v8026_v61  ;;  %3270 = vmatmul.bf16.gmra.mxu0 %v8569_v54  ;;  %v3504_v3 = vrot.slane %v3468_v18, 7  ;;  %v3505_v20 = vrot.slane %v3469_v29, 7  ;;  %v8857_v30 = vrot.slane %v3468_v18, 1  ;;  %v10318_v42 = vld [vmem:[#allocation70_spill] sm:$0xff] }
 0x27a   : > { %3078 = vmatmul.bf16.gmra.mxu3 %v8573_v39  ;;  %v3613_v46 = vrot.slane %v3469_v29, 1 }
 0x27b   : > { %v3336_v56 = vmax.f32 %v3304_v23, 0.0  ;;  %v3570_v32 = vsel %vm10314_vm1, %v3504_v3, %v3505_v20  ;;  %v3571_v26 = vsel %vm10315_vm10, %v8801_v12, %v3504_v3 }
 0x27c   : > { %v2847_v63 = vpop.f32.mrf.mxu2  ;;  %v3576_v54 = vsel %vm7832_vm3, 0.0, %v3571_v26  ;;  %v3721_v41 = vpack.c.bf16 %v3570_v32, %v3570_v32  ;;  %v3678_v8 = vsel %vm10317_vm14, %v8857_v30, %v3613_v46  ;;  %vm10319_vm3 = vmmov %vm10314_vm1 }
 0x27d   : > { %v7047_v39 = vpack.c.bf16 %v3336_v56, %v3335_v14  ;;  %v3039_v21 = vpop.f32.mrf.mxu3  ;;  %v3720_v60 = vpack.c.bf16 %v3576_v54, %v3576_v54  ;;  %v2921_v48 = vadd.f32 %v2847_v63, %v8562_v6  ;;  %vm10321_vm1 = vmmov %vm10317_vm14 }
 0x27e   : > { %v3233_v9 = vpop.f32.mrf.mxu0  ;;  %v3941_v27 = vunpack.c.l.b16 %v3721_v41  ;;  %vm10324_vm10 = vmmov %vm10321_vm1 }
 0x27f   : > { %7263 = vst [vmem:[#allocation2 + $0x10] sm:$0xff] %v7047_v39   ;;  %v3940_v55 = vunpack.c.l.b16 %v3720_v60  ;;  %v3113_v12 = vadd.f32 %v3039_v21, %v2921_v48  ;;  %v3756_v39 = vpack.c.bf16 %v3678_v8, %v3678_v8  ;;  %vm10329_vm14 = vmmov %vm10321_vm1 }
 0x281   : > { %v8871_v17 = vpack.c.b16 %v3941_v27, %v3940_v55  ;;  %v3305_v23 = vadd.f32 %v3231_v0, %v3113_v12 }
 0x283   : > { %4063 = vmatmul.bf16.gmra.mxu1 %v8871_v17  ;;  %v3337_v41 = vmax.f32 %v3305_v23, 0.0 }
 0x284   : > { %v2849_v10 = vpop.f32.mrf.mxu2 }
 0x285   : > { %v2922_v18 = vadd.f32 %v2849_v10, %v10318_v42  ;;  %v3041_v29 = vpop.f32.mrf.mxu3 }
 0x286   : > { %v3236_v3 = vpop.f32.mrf.mxu0  ;;  %v3434_v14 = vld [vmem:[#allocation2 + $0x10] sm:$0xff]  }
 0x287   : > { %v3114_v56 = vadd.f32 %v3041_v29, %v2922_v18  ;;  %v3470_v32 = vunpack.c.l.bf16 %v3434_v14  ;;  %v3471_v26 = vunpack.c.h.bf16 %v3434_v14 }
 0x289   : > { %v3306_v6 = vadd.f32 %v3233_v9, %v3114_v56  ;;  %2891 = vmatmul.bf16.gmra.mxu2 %v8077_v38  ;;  %3275 = vmatmul.bf16.gmra.mxu0 %v8599_v31  ;;  %v3506_v63 = vrot.slane %v3470_v32, 7  ;;  %v3507_v61 = vrot.slane %v3471_v26, 7  ;;  %v3614_v54 = vrot.slane %v3470_v32, 1  ;;  %v6979_v56 = vld [vmem:[#allocation8 + $0x68] sm:$0xff] }
 0x28a   : > { %3083 = vmatmul.bf16.gmra.mxu3 %v8603_v24  ;;  %v3615_v21 = vrot.slane %v3471_v26, 1  ;;  %v6987_v32 = vld [vmem:[#allocation8 + $0xa8] sm:$0xff]  ;;  %v4504_v26 = vunpack.c.l.b16 %v3756_v39  ;;  %4334 = vmatpush.bf16.msrb.mxu2 %v6979_v56 }
 0x28b   : > { %v3338_v60 = vmax.f32 %v3306_v6, 0.0  ;;  %v3568_v0 = vsel %vm10319_vm3, %v3506_v63, %v3507_v61  ;;  %v3569_v48 = vsel %vm10320_vm4, %v3505_v20, %v3506_v63  ;;  %v3677_v38 = vsel %vm10321_vm1, %v3613_v46, %v3614_v54  ;;  %4616 = vmatpush.bf16.msrb.mxu3 %v6987_v32 }
 0x28c   : > { %v2852_v9 = vpop.f32.mrf.mxu2  ;;  %v3578_v27 = vsel %vm7876_vm5, 0.0, %v3569_v48  ;;  %v3723_v55 = vpack.c.bf16 %v3568_v0, %v3568_v0  ;;  %v3685_v24 = vsel %vm8193_vm12, 0.0, %v3677_v38  ;;  %v3676_v8 = vsel %vm10324_vm10, %v3614_v54, %v3615_v21  ;;  %v10325_v48 = vld [vmem:[#allocation72_spill] sm:$0xff]  ;;  %vm10327_vm5 = vmmov %vm10319_vm3 }
 0x28d   : > { %v7052_v10 = vpack.c.bf16 %v3338_v60, %v3337_v41  ;;  %v3044_v42 = vpop.f32.mrf.mxu3  ;;  %v3722_v18 = vpack.c.bf16 %v3578_v27, %v3578_v27  ;;  %v3757_v29 = vpack.c.bf16 %v3685_v24, %v3685_v24  ;;  %v2923_v20 = vadd.f32 %v2852_v9, %v8592_v47  ;;  %v6995_v41 = vld [vmem:[#allocation8 + $0xe8] sm:$0xff]  ;;  %vm10328_vm12 = vmmov %vm10319_vm3 }
 0x28e   : > { %v3238_v23 = vpop.f32.mrf.mxu0  ;;  %v3943_v14 = vunpack.c.l.b16 %v3723_v55  ;;  %v7003_v60 = vld [vmem:[#allocation8 + $0x128] sm:$0xff]  ;;  %4808 = vmatpush.bf16.msrb.mxu0 %v6995_v41  ;;  %vm10332_vm3 = vmmov %vm10321_vm1 }
 0x28f   : > { %7264 = vst [vmem:[#allocation2 + $0x18] sm:$0xff] %v7052_v10   ;;  %v3942_v46 = vunpack.c.l.b16 %v3722_v18  ;;  %v4505_v6 = vunpack.c.l.b16 %v3757_v29  ;;  %v3115_v54 = vadd.f32 %v3044_v42, %v2923_v20  ;;  %5000 = vmatpush.bf16.msrb.mxu1 %v7003_v60 }
 0x291   : > { %v8891_v63 = vpack.c.b16 %v3943_v14, %v3942_v46  ;;  %v8893_v0 = vpack.c.b16 %v4505_v6, %v4504_v26  ;;  %v3307_v31 = vadd.f32 %v3236_v3, %v3115_v54  ;;  %v10326_v14 = vld [vmem:[#allocation75_spill] sm:$0xff]  ;;  %v3758_v46 = vpack.c.bf16 %v3676_v8, %v3676_v8  ;;  %v6978_v26 = vld [vmem:[#allocation8 + $0x60] sm:$0xff] }
 0x292   : > { %4335 = vmatpush.bf16.msrb.mxu2 %v6978_v26 }
 0x293   : > { %4068 = vmatmul.bf16.gmra.mxu1 %v8891_v63  ;;  %v3339_v20 = vmax.f32 %v3307_v31, 0.0 }
 0x294   : > { %v2854_v47 = vpop.f32.mrf.mxu2 }
 0x295   : > { %v2924_v38 = vadd.f32 %v2854_v47, %v10325_v48  ;;  %v3046_v9 = vpop.f32.mrf.mxu3 }
 0x296   : > { %v3241_v39 = vpop.f32.mrf.mxu0  ;;  %v3436_v27 = vld [vmem:[#allocation2 + $0x18] sm:$0xff]  }
 0x297   : > { %v3116_v55 = vadd.f32 %v3046_v9, %v2924_v38  ;;  %v3472_v12 = vunpack.c.l.bf16 %v3436_v27  ;;  %v3473_v24 = vunpack.c.h.bf16 %v3436_v27 }
 0x299   : > { %v3308_v10 = vadd.f32 %v3238_v23, %v3116_v55  ;;  %2896 = vmatmul.bf16.gmra.mxu2 %v8127_v33  ;;  %3280 = vmatmul.bf16.gmra.mxu0 %v8633_v45  ;;  %v3508_v42 = vrot.slane %v3472_v12, 7  ;;  %v8899_v18 = vrot.slane %v3473_v24, 7  ;;  %v3616_v29 = vrot.slane %v3472_v12, 1 }
 0x29a   : > { %3088 = vmatmul.bf16.gmra.mxu3 %v10326_v14  ;;  %v8902_v56 = vrot.slane %v3473_v24, 1  ;;  %v4506_v12 = vunpack.c.l.b16 %v3758_v46  ;;  %v10336_v14 = vld [vmem:[#allocation76_spill] sm:$0xff] }
 0x29b   : > { %v3340_v3 = vmax.f32 %v3308_v10, 0.0  ;;  %v3566_v32 = vsel %vm10327_vm5, %v3508_v42, %v8899_v18  ;;  %v3567_v33 = vsel %vm10328_vm12, %v3507_v61, %v3508_v42  ;;  %v3675_v45 = vsel %vm10329_vm14, %v3615_v21, %v3616_v29  ;;  %v10333_v21 = vld [vmem:[#allocation74_spill] sm:$0xff]  ;;  %vm10362_vm12 = vmmov %vm10321_vm1 }
 0x29c   : > { %v2857_v23 = vpop.f32.mrf.mxu2  ;;  %v3580_v6 = vsel %vm7934_vm7, 0.0, %v3567_v33  ;;  %v3725_v54 = vpack.c.bf16 %v3566_v32, %v3566_v32  ;;  %v3687_v8 = vsel %vm8223_vm0, 0.0, %v3675_v45  ;;  %v8918_v60 = vsel %vm10332_vm3, %v3616_v29, %v8902_v56  ;;  %v10337_v32 = vld [vmem:[#allocation73_spill] sm:$0xff]  ;;  %vm10338_vm0 = vmmov %vm10320_vm4 }
 0x29d   : > { %v7057_v47 = vpack.c.bf16 %v3340_v3, %v3339_v20  ;;  %v3049_v48 = vpop.f32.mrf.mxu3  ;;  %v3724_v38 = vpack.c.bf16 %v3580_v6, %v3580_v6  ;;  %v3759_v61 = vpack.c.bf16 %v3687_v8, %v3687_v8  ;;  %v2925_v27 = vadd.f32 %v2857_v23, %v10333_v21  ;;  %v6986_v6 = vld [vmem:[#allocation8 + $0xa0] sm:$0xff]  ;;  %vm10339_vm7 = vmmov %vm10338_vm0 }
 0x29e   : > { %v3243_v9 = vpop.f32.mrf.mxu0  ;;  %v3945_v31 = vunpack.c.l.b16 %v3725_v54  ;;  %v2734_v29 = vadd.f32 %v10337_v32, %v10336_v14  ;;  %v6994_v54 = vld [vmem:[#allocation8 + $0xe0] sm:$0xff]  ;;  %4617 = vmatpush.bf16.msrb.mxu3 %v6986_v6  ;;  %v316_v21 = vadd.s32 272, %v7741_v5  ;;  %vm10341_vm4 = vmmov %vm10321_vm1 }
 0x29f   : > { %7265 = vst [vmem:[#allocation2 + $0x20] sm:$0xff] %v7057_v47   ;;  %v3944_v55 = vunpack.c.l.b16 %v3724_v38  ;;  %v4507_v24 = vunpack.c.l.b16 %v3759_v61  ;;  %v3117_v33 = vadd.f32 %v3049_v48, %v2925_v27  ;;  %4809 = vmatpush.bf16.msrb.mxu0 %v6994_v54  ;;  %v6977_v27 = vld [vmem:[#allocation8 + $0x58] sm:$0xff]  ;;  %vm10360_vm5 = vmmov %vm10338_vm0 }
 0x2a0   : > { %4336 = vmatpush.bf16.msrb.mxu2 %v6977_v27  ;;  %v560_v54 = vand.u32 15, %v316_v21  ;;  %vm10364_vm14 = vmmov %vm10321_vm1 }
 0x2a1   : > { %v8921_v10 = vpack.c.b16 %v3945_v31, %v3944_v55  ;;  %v8923_v42 = vpack.c.b16 %v4507_v24, %v4506_v12  ;;  %v3309_v41 = vadd.f32 %v3241_v39, %v3117_v33  ;;  %v6985_v55 = vld [vmem:[#allocation8 + $0x98] sm:$0xff]  ;;  %v317_v39 = vadd.s32 280, %v7741_v5  ;;  %v10346_v33 = vld [vmem:[#allocation14_spill] sm:$0xff]  ;;  %vm10365_vm3 = vmmov %vm10338_vm0 }
 0x2a2   : > { %v6993_v12 = vld [vmem:[#allocation8 + $0xd8] sm:$0xff]  ;;  %4618 = vmatpush.bf16.msrb.mxu3 %v6985_v55 }
 0x2a3   : > { %10334 = vst [vmem:[#allocation16_spill] sm:$0xff] %v8921_v10  ;;  %4073 = vmatmul.bf16.gmra.mxu1 %v8921_v10  ;;  %4810 = vmatpush.bf16.msrb.mxu0 %v6993_v12 }
 0x2a4   : > { %10335 = vst [vmem:[#allocation36_spill] sm:$0xff] %v8923_v42  ;;  %v2859_v20 = vpop.f32.mrf.mxu2 }
 0x2a5   : > { %v2926_v3 = vadd.f32 %v2859_v20, %v2734_v29  ;;  %v3051_v45 = vpop.f32.mrf.mxu3 }
 0x2a6   : > { %v8928_v23 = vpop.f32.mrf.mxu0  ;;  %v3438_v46 = vld [vmem:[#allocation2 + $0x20] sm:$0xff]  }
 0x2a7   : > { %v3118_v8 = vadd.f32 %v3051_v45, %v2926_v3  ;;  %v3474_v47 = vunpack.c.l.bf16 %v3438_v46  ;;  %v3475_v38 = vunpack.c.h.bf16 %v3438_v46  ;;  %v6976_v46 = vld [vmem:[#allocation8 + $0x50] sm:$0xff] }
 0x2a8   : > { %4337 = vmatpush.bf16.msrb.mxu2 %v6976_v46  ;;  %v10355_v46 = vld [vmem:[#allocation79_spill] sm:$0xff] }
 0x2a9   : > { %v3310_v61 = vadd.f32 %v3243_v9, %v3118_v8  ;;  %2901 = vmatmul.bf16.gmra.mxu2 %v8171_v1  ;;  %3285 = vmatmul.bf16.gmra.mxu0 %v8671_v58  ;;  %v3510_v48 = vrot.slane %v3474_v47, 7  ;;  %v8932_v31 = vrot.slane %v3475_v38, 7  ;;  %v3618_v24 = vrot.slane %v3474_v47, 1  ;;  %v6992_v8 = vld [vmem:[#allocation8 + $0xd0] sm:$0xff] }
 0x2aa   : > { %3093 = vmatmul.bf16.gmra.mxu3 %v8684_v13  ;;  %v3760_v9 = vpack.c.bf16 %v8918_v60, %v8918_v60  ;;  %v8939_v14 = vrot.slane %v3475_v38, 1  ;;  %v3341_v1 = vmax.f32 %v3309_v41, 0.0  ;;  %v6984_v41 = vld [vmem:[#allocation8 + $0x90] sm:$0xff]  ;;  %4811 = vmatpush.bf16.msrb.mxu0 %v6992_v8  ;;  %v7002_v8 = vld [vmem:[#allocation8 + $0x120] sm:$0xff] }
 0x2ab   : > { %v3342_v58 = vmax.f32 %v3310_v61, 0.0  ;;  %v3564_v32 = vsel %vm10338_vm0, %v3510_v48, %v8932_v31  ;;  %v3565_v29 = vsel %vm10339_vm7, %v8899_v18, %v3510_v48  ;;  %v3673_v60 = vsel %vm10341_vm4, %v8902_v56, %v3618_v24  ;;  %v10343_v56 = vld [vmem:[#allocation78_spill] sm:$0xff]  ;;  %4619 = vmatpush.bf16.msrb.mxu3 %v6984_v41  ;;  %5001 = vmatpush.bf16.msrb.mxu1 %v7002_v8  ;;  %vm10366_vm7 = vmmov %vm10321_vm1 }
 0x2ac   : > { %v2862_v13 = vpop.f32.mrf.mxu2  ;;  %v3582_v20 = vsel %vm7985_vm9, 0.0, %v3565_v29  ;;  %v3727_v3 = vpack.c.bf16 %v3564_v32, %v3564_v32  ;;  %v8955_v45 = vsel %vm10321_vm1, %v3618_v24, %v8939_v14  ;;  %v3689_v38 = vsel %vm8254_vm8, 0.0, %v3673_v60  ;;  %vm10352_vm8 = vmmov %vm10338_vm0 }
 0x2ad   : > { %v7062_v26 = vpack.c.bf16 %v3342_v58, %v3341_v1  ;;  %v3054_v6 = vpop.f32.mrf.mxu3  ;;  %v3726_v18 = vpack.c.bf16 %v3582_v20, %v3582_v20  ;;  %v2927_v61 = vadd.f32 %v2862_v13, %v8663_v52  ;;  %v10344_v55 = vunpack.c.l.bf16 %v10343_v56  ;;  %v6975_v52 = vld [vmem:[#allocation8 + $0x48] sm:$0xff]  ;;  %vm10369_vm4 = vmmov %vm10321_vm1 }
 0x2ae   : > { %v3248_v48 = vpop.f32.mrf.mxu0  ;;  %v3947_v27 = vunpack.c.l.b16 %v3727_v3  ;;  %v3761_v32 = vpack.c.bf16 %v3689_v38, %v3689_v38  ;;  %v567_v1 = vand.u32 15, %v317_v39  ;;  %v4508_v21 = vunpack.c.l.b16 %v3760_v9  ;;  %v6983_v13 = vld [vmem:[#allocation8 + $0x88] sm:$0xff]  ;;  %v10354_v9 = vld [vmem:[#allocation83_spill] sm:$0xff]  ;;  %4338 = vmatpush.bf16.msrb.mxu2 %v6975_v52 }
 0x2af   : > { %v933_v12 = vrot.slane %v10344_v55, 7  ;;  %7266 = vst [vmem:[#allocation2 + $0x28] sm:$0xff] %v7062_v26   ;;  %v3946_v24 = vunpack.c.l.b16 %v3726_v18  ;;  %v10347_v20 = vunpack.c.l.bf16 %v10346_v33  ;;  %v6991_v3 = vld [vmem:[#allocation8 + $0xc8] sm:$0xff]  ;;  %v3119_v47 = vadd.f32 %v3054_v6, %v2927_v61  ;;  %v10351_v26 = vld [vmem:[#allocation81_spill] sm:$0xff]  ;;  %4620 = vmatpush.bf16.msrb.mxu3 %v6983_v13 }
 0x2b0   : > { %v4509_v58 = vunpack.c.l.b16 %v3761_v32  ;;  %vm8966_vm9 = vcmp.eq.s32.totalorder %v560_v54, 0  ;;  %v10348_v56 = vmov 0  ;;  %v2736_v41 = vadd.f32 %v10355_v46, %v10354_v9  ;;  %4812 = vmatpush.bf16.msrb.mxu0 %v6991_v3  ;;  %v6990_v33 = vld [vmem:[#allocation8 + $0xc0] sm:$0xff]  ;;  %v10363_v46 = vld [vmem:[#allocation80_spill] sm:$0xff] }
 0x2b1   : > { %v8962_v29 = vpack.c.b16 %v3947_v27, %v3946_v24  ;;  %v1115_v60 = vrot.slane %v10347_v20, 1  ;;  %v10349_v56 = vsel %vm8966_vm9, 4294967295, %v10348_v56  ;;  %v937_v39 = vsel %vm10352_vm8, %v10351_v26, %v933_v12  ;;  %v10359_v27 = vld [vmem:[#allocation15_spill] sm:$0xff]  ;;  %v10361_v24 = vld [vmem:[#allocation37_spill] sm:$0xff]  ;;  %vm10378_vm8 = vmmov %vm10338_vm0 }
 0x2b2   : > { %10350 = vst [vmem:[#allocation52_spill] sm:$0xff] %v10349_v56  ;;  %v8973_v18 = vpack.c.b16 %v4509_v58, %v4508_v21  ;;  %vm8978_vm10 = vcmp.eq.s32.totalorder %v567_v1, 15  ;;  %v10356_v6 = vmov 0  ;;  %v936_v55 = vsel %vm10360_vm5, %v933_v12, %v10359_v27  ;;  %v6974_v1 = vld [vmem:[#allocation8 + $0x40] sm:$0xff]  ;;  %vm10379_vm5 = vmmov %vm10369_vm4 }
 0x2b3   : > { %10345 = vst [vmem:[#allocation54_spill] sm:$0xff] %v8962_v29  ;;  %4078 = vmatmul.bf16.gmra.mxu1 %v8962_v29  ;;  %v10357_v6 = vsel %vm8978_vm10, 4294967295, %v10356_v6  ;;  %v1078_v32 = vsel %vm8966_vm9, 0.0, %v937_v39  ;;  %v1152_v21 = vsel %vm10362_vm12, %v1115_v60, %v10361_v24  ;;  %v6982_v58 = vld [vmem:[#allocation8 + $0x80] sm:$0xff]  ;;  %v3311_v20 = vadd.f32 %v8928_v23, %v3119_v47  ;;  %4339 = vmatpush.bf16.msrb.mxu2 %v6974_v1 }
 0x2b4   : > { %10353 = vst [vmem:[#allocation53_spill] sm:$0xff] %v8973_v18  ;;  %v2864_v38 = vpop.f32.mrf.mxu2  ;;  %v1117_v12 = vsel %vm10364_vm14, %v10363_v46, %v1115_v60  ;;  %v1295_v39 = vpack.c.bf16 %v1078_v32, %v1078_v32  ;;  %v1260_v8 = vsel %vm8978_vm10, 0.0, %v1152_v21  ;;  %4621 = vmatpush.bf16.msrb.mxu3 %v6982_v58  ;;  %4813 = vmatpush.bf16.msrb.mxu0 %v6990_v33  ;;  %vm10383_vm14 = vmmov %vm10369_vm4 }
 0x2b5   : > { %10358 = vst [vmem:[#allocation18_spill] sm:$0xff] %v10357_v6  ;;  %v2928_v54 = vadd.f32 %v2864_v38, %v2736_v41  ;;  %v3056_v61 = vpop.f32.mrf.mxu3  ;;  %v1296_v41 = vpack.c.bf16 %v936_v55, %v936_v55  ;;  %v1331_v60 = vpack.c.bf16 %v1117_v12, %v1117_v12  ;;  %v3762_v27 = vpack.c.bf16 %v8955_v45, %v8955_v45 }
 0x2b6   : > { %v3251_v52 = vpop.f32.mrf.mxu0  ;;  %v3440_v13 = vld [vmem:[#allocation2 + $0x28] sm:$0xff]  }
 0x2b7   : > { %v3120_v3 = vadd.f32 %v3056_v61, %v2928_v54  ;;  %v3476_v26 = vunpack.c.l.bf16 %v3440_v13  ;;  %v3477_v9 = vunpack.c.h.bf16 %v3440_v13  ;;  %v3343_v61 = vmax.f32 %v3311_v20, 0.0 }
 0x2b9   : > { %v3312_v38 = vadd.f32 %v3248_v48, %v3120_v3  ;;  %2906 = vmatmul.bf16.gmra.mxu2 %v8716_v59  ;;  %3290 = vmatmul.bf16.gmra.mxu0 %v8718_v19  ;;  %v3512_v23 = vrot.slane %v3476_v26, 7  ;;  %v8998_v47 = vrot.slane %v3477_v9, 7  ;;  %v3620_v54 = vrot.slane %v3476_v26, 1 }
 0x2ba   : > { %3098 = vmatmul.bf16.gmra.mxu3 %v8714_v11  ;;  %v3621_v55 = vrot.slane %v3477_v9, 1 }
 0x2bb   : > { %v3344_v32 = vmax.f32 %v3312_v38, 0.0  ;;  %v3562_v48 = vsel %vm10365_vm3, %v3512_v23, %v8998_v47  ;;  %v3563_v59 = vsel %vm10338_vm0, %v8932_v31, %v3512_v23  ;;  %v3671_v19 = vsel %vm10366_vm7, %v8939_v14, %v3620_v54  ;;  %vm10389_vm7 = vmmov %vm10369_vm4 }
 0x2bc   : > { %v2867_v24 = vpop.f32.mrf.mxu2  ;;  %v3584_v21 = vsel %vm8036_vm11, 0.0, %v3563_v59  ;;  %v3729_v1 = vpack.c.bf16 %v3562_v48, %v3562_v48  ;;  %v3691_v58 = vsel %vm8287_vm6, 0.0, %v3671_v19  ;;  %v9018_v33 = vsel %vm10369_vm4, %v3620_v54, %v3621_v55  ;;  %vm10375_vm11 = vmmov %vm10321_vm1 }
 0x2bd   : > { %v7067_v20 = vpack.c.bf16 %v3344_v32, %v3343_v61  ;;  %v3059_v13 = vpop.f32.mrf.mxu3  ;;  %v3728_v3 = vpack.c.bf16 %v3584_v21, %v3584_v21  ;;  %v1332_v31 = vpack.c.bf16 %v1260_v8, %v1260_v8  ;;  %v3763_v26 = vpack.c.bf16 %v3691_v58, %v3691_v58  ;;  %vm10376_vm6 = vmmov %vm10321_vm1 }
 0x2be   : > { %v2929_v9 = vadd.f32 %v2867_v24, %v8710_v57  ;;  %v3253_v14 = vpop.f32.mrf.mxu0  ;;  %v3949_v46 = vunpack.c.l.b16 %v3729_v1  ;;  %v4510_v38 = vunpack.c.l.b16 %v3762_v27  ;;  %v2776_v48 = vunpack.c.l.b16 %v1295_v39  ;;  %vm10377_vm1 = vmmov %vm10338_vm0 }
 0x2bf   : > { %7267 = vst [vmem:[#allocation2 + $0x30] sm:$0xff] %v7067_v20   ;;  %v3948_v12 = vunpack.c.l.b16 %v3728_v3  ;;  %v4511_v23 = vunpack.c.l.b16 %v3763_v26  ;;  %v2777_v59 = vunpack.c.l.b16 %v1296_v41  ;;  %v3160_v54 = vunpack.c.l.b16 %v1331_v60 }
 0x2c0   : > { %v3161_v11 = vunpack.c.l.b16 %v1332_v31  ;;  %v3121_v32 = vadd.f32 %v3059_v13, %v2929_v9  ;;  %v2738_v8 = vadd.f32 %v8708_v50, %v8722_v15  ;;  %v10372_v57 = vunpack.c.l.bf16 %v8781_v49  ;;  %v6875_v13 = vld [vmem:[%s7731_s8 + $0x88] sm:$0xff] }
 0x2c1   : > { %v9021_v19 = vpack.c.b16 %v3949_v46, %v3948_v12  ;;  %v9023_v61 = vpack.c.b16 %v4511_v23, %v4510_v38  ;;  %v10374_v39 = vunpack.c.h.bf16 %v8781_v49  ;;  %v2778_v60 = vpack.c.b16 %v2777_v59, %v2776_v48 }
 0x2c2   : > { %v9030_v24 = vrot.slane %v10372_v57, 1  ;;  %v3162_v45 = vpack.c.b16 %v3161_v11, %v3160_v54  ;;  %v3313_v58 = vadd.f32 %v3251_v52, %v3121_v32  ;;  %v3764_v23 = vpack.c.bf16 %v9018_v33, %v9018_v33 }
 0x2c3   : > { %10370 = vst [vmem:[#allocation58_spill] sm:$0xff] %v9021_v19  ;;  %4083 = vmatmul.bf16.gmra.mxu1 %v9021_v19  ;;  %v3611_v41 = vrot.slane %v10374_v39, 1 }
 0x2c4   : > { %10371 = vst [vmem:[#allocation59_spill] sm:$0xff] %v9023_v61  ;;  %v2869_v27 = vpop.f32.mrf.mxu2  ;;  %v3345_v38 = vmax.f32 %v3313_v58, 0.0 }
 0x2c5   : > { %10373 = vst [vmem:[#allocation56_spill] sm:$0xff] %v9030_v24  ;;  %v2930_v21 = vadd.f32 %v2869_v27, %v2738_v8  ;;  %v3061_v1 = vpop.f32.mrf.mxu3  ;;  %v3680_v26 = vsel %vm10375_vm11, %v9030_v24, %v3611_v41  ;;  %v3679_v52 = vsel %vm10376_vm6, %v3611_v41, %v8857_v30  ;;  %v10381_v27 = vld [vmem:[#allocation45_spill] sm:$0xff]  ;;  %vm10394_vm6 = vmmov %vm10379_vm5 }
 0x2c6   : > { %v3256_v20 = vpop.f32.mrf.mxu0  ;;  %v3442_v3 = vld [vmem:[#allocation2 + $0x30] sm:$0xff]   ;;  %vm10382_vm12 = vnez %v10381_v27 }
 0x2c7   : > { %v3122_v31 = vadd.f32 %v3061_v1, %v2930_v21  ;;  %v3478_v50 = vunpack.c.l.bf16 %v3442_v3  ;;  %v3479_v15 = vunpack.c.h.bf16 %v3442_v3 }
 0x2c9   : > { %v3314_v9 = vadd.f32 %v3253_v14, %v3122_v31  ;;  %2911 = vmatmul.bf16.gmra.mxu2 %v2778_v60  ;;  %3295 = vmatmul.bf16.gmra.mxu0 %v3162_v45  ;;  %v3514_v49 = vrot.slane %v3478_v50, 7  ;;  %v9038_v46 = vrot.slane %v3479_v15, 7  ;;  %v3622_v12 = vrot.slane %v3478_v50, 1  ;;  %v10384_v60 = vld [vmem:[#allocation38_spill] sm:$0xff] }
 0x2ca   : > { %3103 = vmatmul.bf16.gmra.mxu3 %v6875_v13  ;;  %v3623_v48 = vrot.slane %v3479_v15, 1  ;;  %vm10385_vm3 = vnez %v10384_v60  ;;  %v4512_v31 = vunpack.c.l.b16 %v3764_v23  ;;  %v3754_v15 = vpack.c.bf16 %v3680_v26, %v3680_v26  ;;  %v6948_v23 = vld [vmem:[#allocation2] sm:$0xff] }
 0x2cb   : > { %v3346_v59 = vmax.f32 %v3314_v9, 0.0  ;;  %v3560_v14 = vsel %vm10377_vm1, %v3514_v49, %v9038_v46  ;;  %v3561_v54 = vsel %vm10378_vm8, %v8998_v47, %v3514_v49  ;;  %v3669_v11 = vsel %vm10379_vm5, %v3621_v55, %v3622_v12  ;;  %vm10397_vm1 = vmmov %vm10338_vm0 }
 0x2cc   : > { %v2872_v32 = vpop.f32.mrf.mxu2  ;;  %v3586_v30 = vsel %vm8087_vm13, 0.0, %v3561_v54  ;;  %v3731_v57 = vpack.c.bf16 %v3560_v14, %v3560_v14  ;;  %v3693_v33 = vsel %vm10382_vm12, 0.0, %v3669_v11  ;;  %v9059_v39 = vsel %vm10383_vm14, %v3622_v12, %v3623_v48  ;;  %vm10388_vm13 = vmmov %vm10338_vm0 }
 0x2cd   : > { %v7072_v41 = vpack.c.bf16 %v3346_v59, %v3345_v38  ;;  %v3064_v21 = vpop.f32.mrf.mxu3  ;;  %v3730_v1 = vpack.c.bf16 %v3586_v30, %v3586_v30  ;;  %v3683_v47 = vsel %vm10385_vm3, 0.0, %v3679_v52  ;;  %v3765_v45 = vpack.c.bf16 %v3693_v33, %v3693_v33  ;;  %v7001_v52 = vld [vmem:[#allocation8 + $0x118] sm:$0xff]  ;;  %vm10398_vm8 = vmmov %vm10338_vm0 }
 0x2ce   : > { %v2931_v55 = vadd.f32 %v2872_v32, %v8729_v34  ;;  %v3258_v58 = vpop.f32.mrf.mxu0  ;;  %v3951_v13 = vunpack.c.l.b16 %v3731_v57  ;;  %v3755_v9 = vpack.c.bf16 %v3683_v47, %v3683_v47  ;;  %v2740_v59 = vadd.f32 %v8727_v37, %v8734_v43  ;;  %5002 = vmatpush.bf16.msrb.mxu1 %v7001_v52  ;;  %vm10401_vm12 = vmmov %vm10394_vm6 }
 0x2cf   : > { %7268 = vst [vmem:[#allocation2 + $0x38] sm:$0xff] %v7072_v41   ;;  %v3950_v3 = vunpack.c.l.b16 %v3730_v1  ;;  %v4513_v50 = vunpack.c.l.b16 %v3765_v45  ;;  %v4502_v14 = vunpack.c.l.b16 %v3754_v15  ;;  %v3766_v47 = vpack.c.bf16 %v9059_v39, %v9059_v39  ;;  %v10392_v15 = vld [vmem:[#allocation48_spill] sm:$0xff]  ;;  %vm10402_vm14 = vmmov %vm10394_vm6 }
 0x2d0   : > { %v3123_v38 = vadd.f32 %v3064_v21, %v2931_v55  ;;  %v4503_v54 = vunpack.c.l.b16 %v3755_v9  ;;  %vm10393_vm11 = vnez %v10392_v15 }
 0x2d1   : > { %v9064_v49 = vpack.c.b16 %v3951_v13, %v3950_v3  ;;  %v9066_v12 = vpack.c.b16 %v4513_v50, %v4512_v31  ;;  %v10390_v3 = vld [vmem:[#allocation34_spill] sm:$0xff] }
 0x2d2   : > { %v3315_v26 = vadd.f32 %v3256_v20, %v3123_v38  ;;  %v4534_v41 = vpack.c.b16 %v4503_v54, %v4502_v14  ;;  %vm10391_vm4 = vnez %v10390_v3 }
 0x2d3   : > { %10386 = vst [vmem:[#allocation57_spill] sm:$0xff] %v9064_v49  ;;  %4088 = vmatmul.bf16.gmra.mxu1 %v9064_v49 }
 0x2d4   : > { %10387 = vst [vmem:[#allocation21_spill] sm:$0xff] %v9066_v12  ;;  %v2874_v34 = vpop.f32.mrf.mxu2  ;;  %v3347_v60 = vmax.f32 %v3315_v26, 0.0 }
 0x2d5   : > { %v2932_v11 = vadd.f32 %v2874_v34, %v2740_v59  ;;  %v3066_v32 = vpop.f32.mrf.mxu3 }
 0x2d6   : > { %v3261_v8 = vpop.f32.mrf.mxu0  ;;  %v3444_v30 = vld [vmem:[#allocation2 + $0x38] sm:$0xff]  }
 0x2d7   : > { %v3124_v57 = vadd.f32 %v3066_v32, %v2932_v11  ;;  %v3480_v27 = vunpack.c.l.bf16 %v3444_v30  ;;  %v3481_v33 = vunpack.c.h.bf16 %v3444_v30  ;;  %v4514_v11 = vunpack.c.l.b16 %v3766_v47  ;;  %v9097_v47 = vld [vmem:[#allocation2 + $0x8] sm:$0xff] }
 0x2d8   : > { %v2742_v30 = vadd.f32 %v8738_v53, %v8745_v35 }
 0x2d9   : > { %v3316_v21 = vadd.f32 %v3258_v58, %v3124_v57  ;;  %4340 = vmatmul.bf16.vlgmr.msrb.gmra.mxu2 %v6948_v23  ;;  %4814 = vmatmul.bf16.vlgmr.msrb.gmra.mxu0 %v8871_v17  ;;  %v3516_v37 = vrot.slane %v3480_v27, 7  ;;  %v3517_v43 = vrot.slane %v3481_v33, 7  ;;  %v3624_v1 = vrot.slane %v3480_v27, 1 }
 0x2da   : > { %4622 = vmatmul.bf16.vlgmr.msrb.gmra.mxu3 %v4534_v41  ;;  %v3625_v45 = vrot.slane %v3481_v33, 1 }
 0x2db   : > { %v3348_v20 = vmax.f32 %v3316_v21, 0.0  ;;  %v3558_v55 = vsel %vm10388_vm13, %v3516_v37, %v3517_v43  ;;  %v3559_v58 = vsel %vm10338_vm0, %v9038_v46, %v3516_v37  ;;  %v3667_v17 = vsel %vm10389_vm7, %v3623_v48, %v3624_v1  ;;  %v9095_v21 = vpop.f32.mrf.mxu1  ;;  %vm10407_vm13 = vmmov %vm10338_vm0 }
 0x2dc   : > { %v2877_v13 = vpop.f32.mrf.mxu2  ;;  %v3588_v31 = vsel %vm10391_vm4, 0.0, %v3559_v58  ;;  %v3733_v50 = vpack.c.bf16 %v3558_v55, %v3558_v55  ;;  %v3695_v39 = vsel %vm10393_vm11, 0.0, %v3667_v17  ;;  %v3666_v9 = vsel %vm10394_vm6, %v3624_v1, %v3625_v45  ;;  %vm10408_vm7 = vmmov %vm10394_vm6 }
 0x2dd   : > { %v7077_v38 = vpack.c.bf16 %v3348_v20, %v3347_v60  ;;  %v3069_v59 = vpop.f32.mrf.mxu3  ;;  %v3732_v52 = vpack.c.bf16 %v3588_v31, %v3588_v31  ;;  %v3767_v34 = vpack.c.bf16 %v3695_v39, %v3695_v39  ;;  %v2933_v48 = vadd.f32 %v2877_v13, %v8740_v22 }
 0x2de   : > { %v3263_v14 = vpop.f32.mrf.mxu0  ;;  %v3953_v46 = vunpack.c.l.b16 %v3733_v50  ;;  %v3768_v13 = vpack.c.bf16 %v3666_v9, %v3666_v9 }
 0x2df   : > { %7269 = vst [vmem:[#allocation2 + $0x40] sm:$0xff] %v7077_v38   ;;  %v3952_v54 = vunpack.c.l.b16 %v3732_v52  ;;  %v4515_v32 = vunpack.c.l.b16 %v3767_v34  ;;  %v3125_v57 = vadd.f32 %v3069_v59, %v2933_v48  ;;  %v10399_v38 = vld [vmem:[#allocation17_spill] sm:$0xff] }
 0x2e0   : > { %vm10400_vm5 = vnez %v10399_v38 }
 0x2e1   : > { %v9088_v23 = vpack.c.b16 %v3953_v46, %v3952_v54  ;;  %v9090_v26 = vpack.c.b16 %v4515_v32, %v4514_v11  ;;  %v3317_v1 = vadd.f32 %v3261_v8, %v3125_v57  ;;  %v10403_v54 = vld [vmem:[#allocation51_spill] sm:$0xff] }
 0x2e2   : > { %vm10404_vm3 = vnez %v10403_v54 }
 0x2e3   : > { %10395 = vst [vmem:[#allocation63_spill] sm:$0xff] %v9088_v23  ;;  %4093 = vmatmul.bf16.gmra.mxu1 %v9088_v23  ;;  %v3349_v31 = vmax.f32 %v3317_v1, 0.0  ;;  %v9114_v32 = vpop.f32.mrf.mxu1 }
 0x2e4   : > { %10396 = vst [vmem:[#allocation61_spill] sm:$0xff] %v9090_v26  ;;  %v2879_v27 = vpop.f32.mrf.mxu2 }
 0x2e5   : > { %v2934_v33 = vadd.f32 %v2879_v27, %v2742_v30  ;;  %v3071_v41 = vpop.f32.mrf.mxu3 }
 0x2e6   : > { %v3266_v37 = vpop.f32.mrf.mxu0  ;;  %v3446_v22 = vld [vmem:[#allocation2 + $0x40] sm:$0xff]  }
 0x2e7   : > { %v3126_v60 = vadd.f32 %v3071_v41, %v2934_v33  ;;  %v3482_v20 = vunpack.c.l.bf16 %v3446_v22  ;;  %v3483_v55 = vunpack.c.h.bf16 %v3446_v22  ;;  %v4516_v41 = vunpack.c.l.b16 %v3768_v13 }
 0x2e9   : > { %v3318_v58 = vadd.f32 %v3263_v14, %v3126_v60  ;;  %4345 = vmatmul.bf16.gmra.mxu2 %v9097_v47  ;;  %4819 = vmatmul.bf16.gmra.mxu0 %v8891_v63  ;;  %v3518_v53 = vrot.slane %v3482_v20, 7  ;;  %v3519_v35 = vrot.slane %v3483_v55, 7  ;;  %v3626_v17 = vrot.slane %v3482_v20, 1 }
 0x2ea   : > { %4627 = vmatmul.bf16.gmra.mxu3 %v8893_v0  ;;  %v3627_v3 = vrot.slane %v3483_v55, 1  ;;  %v2744_v20 = vadd.f32 %v8749_v2, %v8756_v25  ;;  %v7000_v55 = vld [vmem:[#allocation8 + $0x110] sm:$0xff] }
 0x2eb   : > { %v3350_v50 = vmax.f32 %v3318_v58, 0.0  ;;  %v3556_v8 = vsel %vm10397_vm1, %v3518_v53, %v3519_v35  ;;  %v3557_v15 = vsel %vm10398_vm8, %v3517_v43, %v3518_v53  ;;  %v3665_v34 = vsel %vm10401_vm12, %v3625_v45, %v3626_v17  ;;  %5003 = vmatpush.bf16.msrb.mxu1 %v7000_v55  ;;  %v9126_v38 = vpop.f32.mrf.mxu1  ;;  %vm10418_vm1 = vmmov %vm10338_vm0 }
 0x2ec   : > { %v2882_v39 = vpop.f32.mrf.mxu2  ;;  %v3590_v59 = vsel %vm10400_vm5, 0.0, %v3557_v15  ;;  %v3735_v52 = vpack.c.bf16 %v3556_v8, %v3556_v8  ;;  %v3664_v9 = vsel %vm10402_vm14, %v3626_v17, %v3627_v3  ;;  %v3697_v11 = vsel %vm10404_vm3, 0.0, %v3665_v34  ;;  %v9124_v8 = vld [vmem:[#allocation2 + $0x10] sm:$0xff]  ;;  %vm10419_vm8 = vmmov %vm10338_vm0 }
 0x2ed   : > { %v7082_v14 = vpack.c.bf16 %v3350_v50, %v3349_v31  ;;  %v3074_v46 = vpop.f32.mrf.mxu3  ;;  %v3734_v48 = vpack.c.bf16 %v3590_v59, %v3590_v59  ;;  %v2935_v43 = vadd.f32 %v2882_v39, %v8751_v28  ;;  %v3769_v27 = vpack.c.bf16 %v3697_v11, %v3697_v11  ;;  %vm10422_vm12 = vmmov %vm10394_vm6 }
 0x2ee   : > { %v3268_v30 = vpop.f32.mrf.mxu0  ;;  %v3955_v57 = vunpack.c.l.b16 %v3735_v52  ;;  %vm10423_vm14 = vmmov %vm10394_vm6 }
 0x2ef   : > { %7270 = vst [vmem:[#allocation2 + $0x48] sm:$0xff] %v7082_v14   ;;  %v3954_v33 = vunpack.c.l.b16 %v3734_v48  ;;  %v4517_v45 = vunpack.c.l.b16 %v3769_v27  ;;  %v3127_v1 = vadd.f32 %v3074_v46, %v2935_v43 }
 0x2f1   : > { %v9117_v22 = vpack.c.b16 %v3955_v57, %v3954_v33  ;;  %v9119_v60 = vpack.c.b16 %v4517_v45, %v4516_v41  ;;  %v3319_v17 = vadd.f32 %v3266_v37, %v3127_v1  ;;  %v3770_v37 = vpack.c.bf16 %v3664_v9, %v3664_v9  ;;  %v10411_v33 = vld [vmem:[#allocation55_spill] sm:$0xff] }
 0x2f2   : > { %vm10412_vm11 = vnez %v10411_v33 }
 0x2f3   : > { %10405 = vst [vmem:[#allocation62_spill] sm:$0xff] %v9117_v22  ;;  %4098 = vmatmul.bf16.gmra.mxu1 %v9117_v22  ;;  %v3351_v34 = vmax.f32 %v3319_v17, 0.0  ;;  %v4518_v17 = vunpack.c.l.b16 %v3770_v37 }
 0x2f4   : > { %10406 = vst [vmem:[#allocation66_spill] sm:$0xff] %v9119_v60  ;;  %v2884_v58 = vpop.f32.mrf.mxu2 }
 0x2f5   : > { %v2936_v28 = vadd.f32 %v2884_v58, %v2744_v20  ;;  %v3076_v53 = vpop.f32.mrf.mxu3 }
 0x2f6   : > { %v3271_v31 = vpop.f32.mrf.mxu0  ;;  %v3448_v50 = vld [vmem:[#allocation2 + $0x48] sm:$0xff]  }
 0x2f7   : > { %v3128_v13 = vadd.f32 %v3076_v53, %v2936_v28  ;;  %v3484_v15 = vunpack.c.l.bf16 %v3448_v50  ;;  %v3485_v39 = vunpack.c.h.bf16 %v3448_v50  ;;  %v10413_v28 = vld [vmem:[#allocation43_spill] sm:$0xff] }
 0x2f9   : > { %v3320_v59 = vadd.f32 %v3268_v30, %v3128_v13  ;;  %4350 = vmatmul.bf16.gmra.mxu2 %v9124_v8  ;;  %4824 = vmatmul.bf16.gmra.mxu0 %v8921_v10  ;;  %v3520_v2 = vrot.slane %v3484_v15, 7  ;;  %v3521_v25 = vrot.slane %v3485_v39, 7  ;;  %v3628_v52 = vrot.slane %v3484_v15, 1  ;;  %v10409_v30 = vld [vmem:[#allocation20_spill] sm:$0xff]  ;;  %v7279_v10 = vld [vmem:[%s7731_s8 + $0x10] sm:$0xff]  }
 0x2fa   : > { %4632 = vmatmul.bf16.gmra.mxu3 %v8923_v42  ;;  %v3629_v14 = vrot.slane %v3485_v39, 1  ;;  %vm10410_vm4 = vnez %v10409_v30 }
 0x2fb   : > { %v3352_v46 = vmax.f32 %v3320_v59, 0.0  ;;  %v3554_v48 = vsel %vm10407_vm13, %v3520_v2, %v3521_v25  ;;  %v3555_v54 = vsel %vm10338_vm0, %v3519_v35, %v3520_v2  ;;  %v3663_v11 = vsel %vm10408_vm7, %v3627_v3, %v3628_v52  ;;  %v10416_v59 = vld [vmem:[#allocation44_spill] sm:$0xff]  ;;  %vm10431_vm13 = vmmov %vm10338_vm0 }
 0x2fc   : > { %v2887_v43 = vpop.f32.mrf.mxu2  ;;  %v3592_v57 = vsel %vm10410_vm4, 0.0, %v3555_v54  ;;  %v3737_v27 = vpack.c.bf16 %v3554_v48, %v3554_v48  ;;  %v3699_v41 = vsel %vm10412_vm11, 0.0, %v3663_v11  ;;  %v3662_v9 = vsel %vm10394_vm6, %v3628_v52, %v3629_v14  ;;  %v10417_v2 = vld [vmem:[#allocation28_spill] sm:$0xff]  ;;  %vm10434_vm4 = vmmov %vm10394_vm6 }
 0x2fd   : > { %v7087_v45 = vpack.c.bf16 %v3352_v46, %v3351_v34  ;;  %v3079_v1 = vpop.f32.mrf.mxu3  ;;  %v3736_v20 = vpack.c.bf16 %v3592_v57, %v3592_v57  ;;  %v3771_v55 = vpack.c.bf16 %v3699_v41, %v3699_v41  ;;  %v2937_v3 = vadd.f32 %v2887_v43, %v10413_v28  ;;  %v9153_v57 = vld [vmem:[#allocation2 + $0x18] sm:$0xff]  ;;  %vm10435_vm11 = vmmov %vm10434_vm4 }
 0x2fe   : > { %v3273_v58 = vpop.f32.mrf.mxu0  ;;  %v3957_v35 = vunpack.c.l.b16 %v3737_v27  ;;  %v2746_v52 = vadd.f32 %v10417_v2, %v10416_v59 }
 0x2ff   : > { %7271 = vst [vmem:[#allocation2 + $0x50] sm:$0xff] %v7087_v45   ;;  %v3956_v53 = vunpack.c.l.b16 %v3736_v20  ;;  %v4519_v50 = vunpack.c.l.b16 %v3771_v55  ;;  %v3129_v34 = vadd.f32 %v3079_v1, %v2937_v3 }
 0x300   : > { %v9144_v13 = vpop.f32.mrf.mxu1 }
 0x301   : > { %v9146_v15 = vpack.c.b16 %v3957_v35, %v3956_v53  ;;  %v9148_v39 = vpack.c.b16 %v4519_v50, %v4518_v17  ;;  %v3321_v30 = vadd.f32 %v3271_v31, %v3129_v34  ;;  %v3772_v35 = vpack.c.bf16 %v3662_v9, %v3662_v9  ;;  %v10420_v50 = vld [vmem:[#allocation23_spill] sm:$0xff] }
 0x302   : > { %vm10421_vm5 = vnez %v10420_v50 }
 0x303   : > { %10414 = vst [vmem:[#allocation68_spill] sm:$0xff] %v9146_v15  ;;  %4103 = vmatmul.bf16.gmra.mxu1 %v9146_v15  ;;  %v3353_v31 = vmax.f32 %v3321_v30, 0.0 }
 0x304   : > { %10415 = vst [vmem:[#allocation19_spill] sm:$0xff] %v9148_v39  ;;  %v2889_v46 = vpop.f32.mrf.mxu2 }
 0x305   : > { %v2938_v48 = vadd.f32 %v2889_v46, %v2746_v52  ;;  %v3081_v54 = vpop.f32.mrf.mxu3 }
 0x306   : > { %v3276_v11 = vpop.f32.mrf.mxu0  ;;  %v3450_v43 = vld [vmem:[#allocation2 + $0x50] sm:$0xff]  }
 0x307   : > { %v3130_v37 = vadd.f32 %v3081_v54, %v2938_v48  ;;  %v3486_v27 = vunpack.c.l.bf16 %v3450_v43  ;;  %v3487_v33 = vunpack.c.h.bf16 %v3450_v43  ;;  %v10424_v54 = vld [vmem:[#allocation60_spill] sm:$0xff] }
 0x308   : > { %v9155_v41 = vpop.f32.mrf.mxu1  ;;  %vm10425_vm3 = vnez %v10424_v54 }
 0x309   : > { %v3322_v45 = vadd.f32 %v3273_v58, %v3130_v37  ;;  %4355 = vmatmul.bf16.gmra.mxu2 %v9153_v57  ;;  %4829 = vmatmul.bf16.gmra.mxu0 %v8962_v29  ;;  %v3522_v1 = vrot.slane %v3486_v27, 7  ;;  %v3523_v20 = vrot.slane %v3487_v33, 7  ;;  %v3630_v55 = vrot.slane %v3486_v27, 1  ;;  %v10426_v27 = vld [vmem:[#allocation85_spill] sm:$0xff] }
 0x30a   : > { %4637 = vmatmul.bf16.gmra.mxu3 %v8973_v18  ;;  %v3631_v28 = vrot.slane %v3487_v33, 1 }
 0x30b   : > { %v3354_v3 = vmax.f32 %v3322_v45, 0.0  ;;  %v3552_v53 = vsel %vm10418_vm1, %v3522_v1, %v3523_v20  ;;  %v3553_v17 = vsel %vm10419_vm8, %v3521_v25, %v3522_v1  ;;  %v3661_v52 = vsel %vm10422_vm12, %v3629_v14, %v3630_v55  ;;  %vm10441_vm1 = vmmov %vm10338_vm0 }
 0x30c   : > { %v2892_v58 = vpop.f32.mrf.mxu2  ;;  %v3594_v59 = vsel %vm10421_vm5, 0.0, %v3553_v17  ;;  %v3739_v2 = vpack.c.bf16 %v3552_v53, %v3552_v53  ;;  %v3660_v9 = vsel %vm10423_vm14, %v3630_v55, %v3631_v28  ;;  %v3701_v43 = vsel %vm10425_vm3, 0.0, %v3661_v52  ;;  %vm10442_vm8 = vmmov %vm10338_vm0 }
 0x30d   : > { %v7092_v34 = vpack.c.bf16 %v3354_v3, %v3353_v31  ;;  %v3084_v46 = vpop.f32.mrf.mxu3  ;;  %v3738_v48 = vpack.c.bf16 %v3594_v59, %v3594_v59  ;;  %v3773_v25 = vpack.c.bf16 %v3701_v43, %v3701_v43  ;;  %v2939_v33 = vadd.f32 %v2892_v58, %v10426_v27  ;;  %v10429_v31 = vld [vmem:[#allocation47_spill] sm:$0xff]  ;;  %v10430_v3 = vld [vmem:[#allocation46_spill] sm:$0xff]  ;;  %vm10445_vm12 = vmmov %vm10434_vm4 }
 0x30e   : > { %v3278_v30 = vpop.f32.mrf.mxu0  ;;  %v3959_v37 = vunpack.c.l.b16 %v3739_v2  ;;  %v4520_v53 = vunpack.c.l.b16 %v3772_v35  ;;  %v2748_v50 = vadd.f32 %v10430_v3, %v10429_v31  ;;  %v6999_v2 = vld [vmem:[#allocation8 + $0x108] sm:$0xff]  ;;  %v3774_v31 = vpack.c.bf16 %v3660_v9, %v3660_v9  ;;  %vm10446_vm14 = vmmov %vm10434_vm4 }
 0x30f   : > { %7272 = vst [vmem:[#allocation2 + $0x58] sm:$0xff] %v7092_v34   ;;  %v3958_v45 = vunpack.c.l.b16 %v3738_v48  ;;  %v4521_v14 = vunpack.c.l.b16 %v3773_v25  ;;  %v3131_v59 = vadd.f32 %v3084_v46, %v2939_v33  ;;  %5004 = vmatpush.bf16.msrb.mxu1 %v6999_v2  ;;  %v9182_v25 = vld [vmem:[#allocation2 + $0x20] sm:$0xff] }
 0x310   : > { %v9173_v1 = vpop.f32.mrf.mxu1  ;;  %v4522_v56 = vunpack.c.l.b16 %v3774_v31 }
 0x311   : > { %v9175_v17 = vpack.c.b16 %v3959_v37, %v3958_v45  ;;  %v9177_v55 = vpack.c.b16 %v4521_v14, %v4520_v53  ;;  %v3323_v43 = vadd.f32 %v3276_v11, %v3131_v59 }
 0x313   : > { %10427 = vst [vmem:[#allocation70_spill] sm:$0xff] %v9175_v17  ;;  %4108 = vmatmul.bf16.gmra.mxu1 %v9175_v17  ;;  %v3355_v11 = vmax.f32 %v3323_v43, 0.0 }
 0x314   : > { %10428 = vst [vmem:[#allocation22_spill] sm:$0xff] %v9177_v55  ;;  %v2894_v52 = vpop.f32.mrf.mxu2 }
 0x315   : > { %v2940_v34 = vadd.f32 %v2894_v52, %v2748_v50  ;;  %v3086_v54 = vpop.f32.mrf.mxu3  ;;  %v10432_v52 = vld [vmem:[#allocation25_spill] sm:$0xff] }
 0x316   : > { %v3281_v58 = vpop.f32.mrf.mxu0  ;;  %v3452_v48 = vld [vmem:[#allocation2 + $0x58] sm:$0xff]   ;;  %vm10433_vm7 = vnez %v10432_v52 }
 0x317   : > { %v3132_v35 = vadd.f32 %v3086_v54, %v2940_v34  ;;  %v3488_v37 = vunpack.c.l.bf16 %v3452_v48  ;;  %v3489_v27 = vunpack.c.h.bf16 %v3452_v48 }
 0x318   : > { %v9184_v45 = vpop.f32.mrf.mxu1 }
 0x319   : > { %v3324_v53 = vadd.f32 %v3278_v30, %v3132_v35  ;;  %4360 = vmatmul.bf16.gmra.mxu2 %v9182_v25  ;;  %4834 = vmatmul.bf16.gmra.mxu0 %v9021_v19  ;;  %v3524_v46 = vrot.slane %v3488_v37, 7  ;;  %v3525_v33 = vrot.slane %v3489_v27, 7  ;;  %v3632_v14 = vrot.slane %v3488_v37, 1 }
 0x31a   : > { %4642 = vmatmul.bf16.gmra.mxu3 %v9023_v61  ;;  %v3633_v3 = vrot.slane %v3489_v27, 1  ;;  %v10436_v27 = vld [vmem:[#allocation64_spill] sm:$0xff] }
 0x31b   : > { %v3356_v50 = vmax.f32 %v3324_v53, 0.0  ;;  %v3550_v59 = vsel %vm10431_vm13, %v3524_v46, %v3525_v33  ;;  %v3551_v2 = vsel %vm10338_vm0, %v3523_v20, %v3524_v46  ;;  %v3659_v48 = vsel %vm10434_vm4, %v3631_v28, %v3632_v14  ;;  %v10438_v46 = vld [vmem:[#allocation87_spill] sm:$0xff]  ;;  %v9211_v61 = vld [vmem:[#allocation2 + $0x28] sm:$0xff]  ;;  %vm10450_vm13 = vmmov %vm10338_vm0 }
 0x31c   : > { %v2897_v30 = vpop.f32.mrf.mxu2  ;;  %v3596_v34 = vsel %vm10433_vm7, 0.0, %v3551_v2  ;;  %v3741_v54 = vpack.c.bf16 %v3550_v59, %v3550_v59  ;;  %v3658_v9 = vsel %vm10435_vm11, %v3632_v14, %v3633_v3  ;;  %vm10437_vm6 = vnez %v10436_v27  ;;  %vm10453_vm11 = vmmov %vm10434_vm4 }
 0x31d   : > { %v7097_v35 = vpack.c.bf16 %v3356_v50, %v3355_v11  ;;  %v3089_v43 = vpop.f32.mrf.mxu3  ;;  %v3740_v37 = vpack.c.bf16 %v3596_v34, %v3596_v34  ;;  %v3703_v53 = vsel %vm10437_vm6, 0.0, %v3659_v48  ;;  %v2941_v52 = vadd.f32 %v2897_v30, %v10438_v46  ;;  %v10439_v11 = vld [vmem:[#allocation50_spill] sm:$0xff]  ;;  %v10440_v50 = vld [vmem:[#allocation49_spill] sm:$0xff] }
 0x31e   : > { %v3283_v6 = vpop.f32.mrf.mxu0  ;;  %v3961_v24 = vunpack.c.l.b16 %v3741_v54  ;;  %v3775_v20 = vpack.c.bf16 %v3703_v53, %v3703_v53  ;;  %v2750_v34 = vadd.f32 %v10440_v50, %v10439_v11 }
 0x31f   : > { %7273 = vst [vmem:[#allocation2 + $0x60] sm:$0xff] %v7097_v35   ;;  %v3960_v2 = vunpack.c.l.b16 %v3740_v37  ;;  %v3133_v27 = vadd.f32 %v3089_v43, %v2941_v52 }
 0x320   : > { %v9202_v59 = vpop.f32.mrf.mxu1  ;;  %v4523_v28 = vunpack.c.l.b16 %v3775_v20 }
 0x321   : > { %v9204_v19 = vpack.c.b16 %v3961_v24, %v3960_v2  ;;  %v3325_v37 = vadd.f32 %v3281_v58, %v3133_v27 }
 0x322   : > { %v9206_v14 = vpack.c.b16 %v4523_v28, %v4522_v56  ;;  %v3776_v28 = vpack.c.bf16 %v3658_v9, %v3658_v9 }
 0x323   : > { %4113 = vmatmul.bf16.gmra.mxu1 %v9204_v19  ;;  %v3357_v58 = vmax.f32 %v3325_v37, 0.0 }
 0x324   : > { %v2899_v54 = vpop.f32.mrf.mxu2 }
 0x325   : > { %v2942_v48 = vadd.f32 %v2899_v54, %v2750_v34  ;;  %v3091_v35 = vpop.f32.mrf.mxu3  ;;  %v10443_v54 = vld [vmem:[#allocation27_spill] sm:$0xff] }
 0x326   : > { %v3286_v53 = vpop.f32.mrf.mxu0  ;;  %v3454_v30 = vld [vmem:[#allocation2 + $0x60] sm:$0xff]   ;;  %vm10444_vm5 = vnez %v10443_v54  ;;  %v4524_v54 = vunpack.c.l.b16 %v3776_v28 }
 0x327   : > { %v3134_v46 = vadd.f32 %v3091_v35, %v2942_v48  ;;  %v3490_v31 = vunpack.c.l.bf16 %v3454_v30  ;;  %v3491_v24 = vunpack.c.h.bf16 %v3454_v30 }
 0x328   : > { %v9213_v20 = vpop.f32.mrf.mxu1 }
 0x329   : > { %v3326_v56 = vadd.f32 %v3283_v6, %v3134_v46  ;;  %4365 = vmatmul.bf16.gmra.mxu2 %v9211_v61  ;;  %4839 = vmatmul.bf16.gmra.mxu0 %v9064_v49  ;;  %v3526_v43 = vrot.slane %v3490_v31, 7  ;;  %v3527_v52 = vrot.slane %v3491_v24, 7  ;;  %v3634_v2 = vrot.slane %v3490_v31, 1 }
 0x32a   : > { %4647 = vmatmul.bf16.gmra.mxu3 %v9066_v12  ;;  %v3635_v11 = vrot.slane %v3491_v24, 1  ;;  %v10447_v24 = vld [vmem:[#allocation65_spill] sm:$0xff] }
 0x32b   : > { %v3358_v50 = vmax.f32 %v3326_v56, 0.0  ;;  %v3548_v34 = vsel %vm10441_vm1, %v3526_v43, %v3527_v52  ;;  %v3549_v27 = vsel %vm10442_vm8, %v3525_v33, %v3526_v43  ;;  %v3657_v30 = vsel %vm10445_vm12, %v3633_v3, %v3634_v2  ;;  %vm10458_vm1 = vmmov %vm10338_vm0 }
 0x32c   : > { %v2902_v6 = vpop.f32.mrf.mxu2  ;;  %v3598_v48 = vsel %vm10444_vm5, 0.0, %v3549_v27  ;;  %v3743_v35 = vpack.c.bf16 %v3548_v34, %v3548_v34  ;;  %v3656_v9 = vsel %vm10446_vm14, %v3634_v2, %v3635_v11  ;;  %vm10448_vm3 = vnez %v10447_v24  ;;  %v9240_v24 = vld [vmem:[#allocation2 + $0x30] sm:$0xff]  ;;  %vm10459_vm8 = vmmov %vm10338_vm0 }
 0x32d   : > { %v7102_v46 = vpack.c.bf16 %v3358_v50, %v3357_v58  ;;  %v3094_v37 = vpop.f32.mrf.mxu3  ;;  %v3742_v31 = vpack.c.bf16 %v3598_v48, %v3598_v48  ;;  %v3705_v56 = vsel %vm10448_vm3, 0.0, %v3657_v30  ;;  %v2943_v43 = vadd.f32 %v2902_v6, %v8820_v4  ;;  %v6998_v48 = vld [vmem:[#allocation8 + $0x100] sm:$0xff]  ;;  %vm10462_vm12 = vmmov %vm10434_vm4 }
 0x32e   : > { %v3288_v49 = vpop.f32.mrf.mxu0  ;;  %v3963_v12 = vunpack.c.l.b16 %v3743_v35  ;;  %v3777_v33 = vpack.c.bf16 %v3705_v56, %v3705_v56  ;;  %v2752_v58 = vadd.f32 %v8818_v40, %v8825_v62  ;;  %5005 = vmatpush.bf16.msrb.mxu1 %v6998_v48  ;;  %v10451_v48 = vld [vmem:[#allocation30_spill] sm:$0xff]  ;;  %vm10463_vm14 = vmmov %vm10434_vm4 }
 0x32f   : > { %7274 = vst [vmem:[#allocation2 + $0x68] sm:$0xff] %v7102_v46   ;;  %v3962_v27 = vunpack.c.l.b16 %v3742_v31  ;;  %v3135_v50 = vadd.f32 %v3094_v37, %v2943_v43  ;;  %v3778_v43 = vpack.c.bf16 %v3656_v9, %v3656_v9  ;;  %vm10452_vm7 = vnez %v10451_v48 }
 0x330   : > { %v9231_v34 = vpop.f32.mrf.mxu1  ;;  %v4525_v3 = vunpack.c.l.b16 %v3777_v33 }
 0x331   : > { %v9233_v29 = vpack.c.b16 %v3963_v12, %v3962_v27  ;;  %v3327_v31 = vadd.f32 %v3286_v53, %v3135_v50 }
 0x332   : > { %v9235_v2 = vpack.c.b16 %v4525_v3, %v4524_v54 }
 0x333   : > { %10449 = vst [vmem:[#allocation39_spill] sm:$0xff] %v9233_v29  ;;  %4118 = vmatmul.bf16.gmra.mxu1 %v9233_v29  ;;  %v3359_v53 = vmax.f32 %v3327_v31, 0.0 }
 0x334   : > { %v2904_v35 = vpop.f32.mrf.mxu2 }
 0x335   : > { %v2944_v30 = vadd.f32 %v2904_v35, %v2752_v58  ;;  %v3096_v46 = vpop.f32.mrf.mxu3 }
 0x336   : > { %v3291_v4 = vpop.f32.mrf.mxu0  ;;  %v3456_v6 = vld [vmem:[#allocation2 + $0x68] sm:$0xff]  }
 0x337   : > { %v3136_v28 = vadd.f32 %v3096_v46, %v2944_v30  ;;  %v3492_v12 = vunpack.c.l.bf16 %v3456_v6  ;;  %v3493_v56 = vunpack.c.h.bf16 %v3456_v6 }
 0x338   : > { %v9242_v33 = vpop.f32.mrf.mxu1 }
 0x339   : > { %v3328_v27 = vadd.f32 %v3288_v49, %v3136_v28  ;;  %4370 = vmatmul.bf16.gmra.mxu2 %v9240_v24  ;;  %4844 = vmatmul.bf16.gmra.mxu0 %v9088_v23  ;;  %v3528_v40 = vrot.slane %v3492_v12, 7  ;;  %v3529_v62 = vrot.slane %v3493_v56, 7  ;;  %v3636_v37 = vrot.slane %v3492_v12, 1  ;;  %v10454_v12 = vld [vmem:[#allocation67_spill] sm:$0xff] }
 0x33a   : > { %4652 = vmatmul.bf16.gmra.mxu3 %v9090_v26  ;;  %v3637_v54 = vrot.slane %v3493_v56, 1  ;;  %vm10455_vm6 = vnez %v10454_v12  ;;  %v9271_v12 = vld [vmem:[#allocation2 + $0x38] sm:$0xff] }
 0x33b   : > { %v3360_v3 = vmax.f32 %v3328_v27, 0.0  ;;  %v3546_v58 = vsel %vm10450_vm13, %v3528_v40, %v3529_v62  ;;  %v3547_v50 = vsel %vm10338_vm0, %v3527_v52, %v3528_v40  ;;  %v3655_v46 = vsel %vm10434_vm4, %v3635_v11, %v3636_v37  ;;  %vm10468_vm13 = vmmov %vm10338_vm0 }
 0x33c   : > { %v2907_v49 = vpop.f32.mrf.mxu2  ;;  %v3600_v35 = vsel %vm10452_vm7, 0.0, %v3547_v50  ;;  %v3745_v30 = vpack.c.bf16 %v3546_v58, %v3546_v58  ;;  %v9257_v9 = vsel %vm10453_vm11, %v3636_v37, %v3637_v54  ;;  %v3707_v56 = vsel %vm10455_vm6, 0.0, %v3655_v46  ;;  %vm10471_vm11 = vmmov %vm10434_vm4 }
 0x33d   : > { %v7107_v6 = vpack.c.bf16 %v3360_v3, %v3359_v53  ;;  %v3099_v31 = vpop.f32.mrf.mxu3  ;;  %v3744_v28 = vpack.c.bf16 %v3600_v35, %v3600_v35  ;;  %v3779_v40 = vpack.c.bf16 %v3707_v56, %v3707_v56  ;;  %v2945_v50 = vadd.f32 %v2907_v49, %v8829_v36 }
 0x33e   : > { %v3293_v27 = vpop.f32.mrf.mxu0  ;;  %v3965_v52 = vunpack.c.l.b16 %v3745_v30  ;;  %v4526_v11 = vunpack.c.l.b16 %v3778_v43  ;;  %v2754_v53 = vadd.f32 %v8832_v7, %v8836_v16 }
 0x33f   : > { %7275 = vst [vmem:[#allocation2 + $0x70] sm:$0xff] %v7107_v6   ;;  %v3964_v58 = vunpack.c.l.b16 %v3744_v28  ;;  %v4527_v23 = vunpack.c.l.b16 %v3779_v40  ;;  %v3137_v3 = vadd.f32 %v3099_v31, %v2945_v50  ;;  %v3780_v50 = vpack.c.bf16 %v9257_v9, %v9257_v9 }
 0x340   : > { %v9262_v48 = vpop.f32.mrf.mxu1 }
 0x341   : > { %v9264_v26 = vpack.c.b16 %v3965_v52, %v3964_v58  ;;  %v9266_v37 = vpack.c.b16 %v4527_v23, %v4526_v11  ;;  %v3329_v49 = vadd.f32 %v3291_v4, %v3137_v3  ;;  %v7013_v52 = vld [vmem:[#allocation8 + $0x178] sm:$0xff] }
 0x342   : > { %5190 = vmatpush.bf16.msra.mxu2 %v7013_v52  ;;  %v7021_v4 = vld [vmem:[#allocation8 + $0x1b8] sm:$0xff]  ;;  %v10464_v52 = vld [vmem:[#allocation69_spill] sm:$0xff] }
 0x343   : > { %10456 = vst [vmem:[#allocation72_spill] sm:$0xff] %v9264_v26  ;;  %4123 = vmatmul.bf16.gmra.mxu1 %v9264_v26  ;;  %v3361_v11 = vmax.f32 %v3329_v49, 0.0  ;;  %5382 = vmatpush.bf16.msra.mxu3 %v7021_v4  ;;  %vm10465_vm3 = vnez %v10464_v52 }
 0x344   : > { %10457 = vst [vmem:[#allocation75_spill] sm:$0xff] %v9266_v37  ;;  %v2909_v35 = vpop.f32.mrf.mxu2 }
 0x345   : > { %v2946_v30 = vadd.f32 %v2909_v35, %v2754_v53  ;;  %v3101_v46 = vpop.f32.mrf.mxu3 }
 0x346   : > { %v3296_v6 = vpop.f32.mrf.mxu0  ;;  %v3458_v36 = vld [vmem:[#allocation2 + $0x70] sm:$0xff]  }
 0x347   : > { %v3138_v28 = vadd.f32 %v3101_v46, %v2946_v30  ;;  %v3494_v43 = vunpack.c.l.bf16 %v3458_v36  ;;  %v3495_v56 = vunpack.c.h.bf16 %v3458_v36  ;;  %v10460_v30 = vld [vmem:[#allocation32_spill] sm:$0xff] }
 0x348   : > { %v9273_v23 = vpop.f32.mrf.mxu1  ;;  %vm10461_vm5 = vnez %v10460_v30 }
 0x349   : > { %v3330_v40 = vadd.f32 %v3293_v27, %v3138_v28  ;;  %4375 = vmatmul.bf16.gmra.mxu2 %v9271_v12  ;;  %4849 = vmatmul.bf16.gmra.mxu0 %v9117_v22  ;;  %v3530_v7 = vrot.slane %v3494_v43, 7  ;;  %v9277_v16 = vrot.slane %v3495_v56, 7  ;;  %v3638_v31 = vrot.slane %v3494_v43, 1 }
 0x34a   : > { %4657 = vmatmul.bf16.gmra.mxu3 %v9119_v60  ;;  %v9282_v58 = vrot.slane %v3495_v56, 1  ;;  %v4528_v22 = vunpack.c.l.b16 %v3780_v50  ;;  %v7037_v50 = vld [vmem:[#allocation8 + $0x238] sm:$0xff] }
 0x34b   : > { %v3362_v53 = vmax.f32 %v3330_v40, 0.0  ;;  %v3544_v27 = vsel %vm10458_vm1, %v3530_v7, %v9277_v16  ;;  %v3545_v3 = vsel %vm10459_vm8, %v3529_v62, %v3530_v7  ;;  %v3653_v9 = vsel %vm10462_vm12, %v3637_v54, %v3638_v31  ;;  %5766 = vmatpush.bf16.msra.mxu1 %v7037_v50  ;;  %vm10479_vm1 = vmmov %vm10434_vm4 }
 0x34c   : > { %v2912_v35 = vpop.f32.mrf.mxu2  ;;  %v3602_v46 = vsel %vm10461_vm5, 0.0, %v3545_v3  ;;  %v3747_v36 = vpack.c.bf16 %v3544_v27, %v3544_v27  ;;  %v9296_v49 = vsel %vm10463_vm14, %v3638_v31, %v9282_v58  ;;  %v3709_v62 = vsel %vm10465_vm3, 0.0, %v3653_v9  ;;  %v7278_v3 = vld [vmem:[%s7731_s8 + $0x8] sm:$0xff]   ;;  %vm10482_vm5 = vmmov %vm10479_vm1 }
 0x34d   : > { %v7112_v28 = vpack.c.bf16 %v3362_v53, %v3361_v11  ;;  %v3104_v43 = vpop.f32.mrf.mxu3  ;;  %v3746_v56 = vpack.c.bf16 %v3602_v46, %v3602_v46  ;;  %v3781_v30 = vpack.c.bf16 %v3709_v62, %v3709_v62  ;;  %v2947_v4 = vadd.f32 %v2912_v35, %v8840_v44  ;;  %v7029_v11 = vld [vmem:[#allocation8 + $0x1f8] sm:$0xff]  ;;  %v9309_v46 = vld [vmem:[%s9913_s4] ss:$0 sm:$0xff]  ;;  %vm10483_vm12 = vmmov %vm10479_vm1 }
 0x34e   : > { %v3298_v40 = vpop.f32.mrf.mxu0  ;;  %v3967_v7 = vunpack.c.l.b16 %v3747_v36  ;;  %v7121_v53 = vunpack.c.l.bf16 %v7278_v3  ;;  %v2756_v9 = vadd.f32 %v9095_v21, %v8845_v51  ;;  %5574 = vmatpush.bf16.msra.mxu0 %v7029_v11  ;;  %v7122_v21 = vunpack.c.h.bf16 %v7278_v3  ;;  %vm10491_vm14 = vmmov %vm10338_vm0 }
 0x34f   : > { %7276 = vst [vmem:[#allocation2 + $0x78] sm:$0xff] %v7112_v28   ;;  %v3966_v27 = vunpack.c.l.b16 %v3746_v56  ;;  %v4529_v60 = vunpack.c.l.b16 %v3781_v30  ;;  %v3139_v44 = vadd.f32 %v3104_v43, %v2947_v4  ;;  %vm10529_vm3 = vmmov %vm10338_vm0 }
 0x350   : > { %v9302_v54 = vpop.f32.mrf.mxu1  ;;  %v3858_v52 = vadd.f32 %v9309_v46, %v7121_v53 }
 0x351   : > { %v9304_v31 = vpack.c.b16 %v3967_v7, %v3966_v27  ;;  %v9311_v36 = vpack.c.b16 %v4529_v60, %v4528_v22  ;;  %v3331_v30 = vadd.f32 %v3296_v6, %v3139_v44  ;;  %v9317_v22 = vld [vmem:[#allocation2 + $0x40] sm:$0xff] }
 0x352   : > { %v4139_v53 = vadd.f32 %v9114_v32, %v3858_v52 }
 0x353   : > { %10466 = vst [vmem:[#allocation24_spill] sm:$0xff] %v9304_v31  ;;  %4128 = vmatmul.bf16.gmra.mxu1 %v9304_v31  ;;  %v3363_v50 = vmax.f32 %v3331_v30, 0.0 }
 0x354   : > { %10467 = vst [vmem:[#allocation40_spill] sm:$0xff] %v9311_v36  ;;  %v2914_v35 = vpop.f32.mrf.mxu2 }
 0x355   : > { %v2948_v28 = vadd.f32 %v2914_v35, %v2756_v9  ;;  %v3106_v56 = vpop.f32.mrf.mxu3  ;;  %v3782_v9 = vpack.c.bf16 %v9296_v49, %v9296_v49 }
 0x356   : > { %v4815_v62 = vpop.f32.mrf.mxu0  ;;  %v3460_v7 = vld [vmem:[#allocation2 + $0x78] sm:$0xff]  }
 0x357   : > { %v3140_v27 = vadd.f32 %v3106_v56, %v2948_v28  ;;  %v3496_v60 = vunpack.c.l.bf16 %v3460_v7  ;;  %v3497_v18 = vunpack.c.h.bf16 %v3460_v7  ;;  %v10469_v56 = vld [vmem:[#allocation35_spill] sm:$0xff]  ;;  %v4530_v42 = vunpack.c.l.b16 %v3782_v9 }
 0x358   : > { %v9319_v51 = vpop.f32.mrf.mxu1  ;;  %vm10470_vm7 = vnez %v10469_v56 }
 0x359   : > { %v3332_v43 = vadd.f32 %v3298_v40, %v3140_v27  ;;  %4380 = vmatmul.bf16.gmra.mxu2 %v9317_v22  ;;  %4854 = vmatmul.bf16.gmra.mxu0 %v9146_v15  ;;  %v3532_v4 = vrot.slane %v3496_v60, 7  ;;  %v9323_v11 = vrot.slane %v3497_v18, 7  ;;  %v3640_v6 = vrot.slane %v3496_v60, 1 }
 0x35a   : > { %4662 = vmatmul.bf16.gmra.mxu3 %v9148_v39  ;;  %v3641_v44 = vrot.slane %v3497_v18, 1 }
 0x35b   : > { %v3364_v35 = vmax.f32 %v3332_v43, 0.0  ;;  %v3542_v40 = vsel %vm10468_vm13, %v3532_v4, %v9323_v11  ;;  %v3543_v3 = vsel %vm10338_vm0, %v9277_v16, %v3532_v4  ;;  %v3651_v18 = vsel %vm10434_vm4, %v9282_v58, %v3640_v6  ;;  %v10472_v43 = vld [vmem:[#allocation71_spill] sm:$0xff]  ;;  %vm10537_vm13 = vmmov %vm10479_vm1 }
 0x35c   : > { %v4341_v28 = vpop.f32.mrf.mxu2  ;;  %v3604_v32 = vsel %vm10470_vm7, 0.0, %v3543_v3  ;;  %v3749_v52 = vpack.c.bf16 %v3542_v40, %v3542_v40  ;;  %v3650_v49 = vsel %vm10471_vm11, %v3640_v6, %v3641_v44  ;;  %vm10473_vm6 = vnez %v10472_v43 }
 0x35d   : > { %v7117_v7 = vpack.c.bf16 %v3364_v35, %v3363_v50  ;;  %v4421_v30 = vadd.f32 %v4341_v28, %v4139_v53  ;;  %v4623_v27 = vpop.f32.mrf.mxu3  ;;  %v3748_v60 = vpack.c.bf16 %v3604_v32, %v3604_v32  ;;  %v3711_v16 = vsel %vm10473_vm6, 0.0, %v3651_v18  ;;  %v9352_v35 = vld [vmem:[#allocation2 + $0x88] sm:$0xf] }
 0x35e   : > { %v4817_v4 = vpop.f32.mrf.mxu0  ;;  %v3969_v15 = vunpack.c.l.b16 %v3749_v52  ;;  %v3783_v56 = vpack.c.bf16 %v3711_v16, %v3711_v16  ;;  %v3859_v3 = vadd.f32 %v9309_v46, %v7122_v21  ;;  %10475 = vst [vmem:[#allocation76_spill] sm:$0xff] %v9352_v35  ;;  %v7125_v52 = vunpack.c.l.bf16 %v7279_v10 }
 0x35f   : > { %7277 = vst [vmem:[#allocation2 + $0x80] sm:$0xff] %v7117_v7   ;;  %v4703_v40 = vadd.f32 %v4623_v27, %v4421_v30  ;;  %v3968_v39 = vunpack.c.l.b16 %v3748_v60  ;;  %v10053_v18 = vunpack.c.l.bf16 %v9352_v35 }
 0x360   : > { %v9346_v58 = vpop.f32.mrf.mxu1  ;;  %v4531_v6 = vunpack.c.l.b16 %v3783_v56  ;;  %v4140_v32 = vadd.f32 %v9126_v38, %v3859_v3  ;;  %v7020_v3 = vld [vmem:[#allocation8 + $0x1b0] sm:$0xff] }
 0x361   : > { %v9348_v50 = vpack.c.b16 %v3969_v15, %v3968_v39  ;;  %v9350_v53 = vadd.f32 %v4815_v62, %v4703_v40  ;;  %v3860_v15 = vadd.f32 %v9309_v46, %v7125_v52  ;;  %v9362_v62 = vld [vmem:[#allocation2 + $0x48] sm:$0xff]  ;;  %v9370_v16 = vrot.slane %v10053_v18, 1  ;;  %5383 = vmatpush.bf16.msra.mxu3 %v7020_v3  ;;  %v10480_v18 = vld [vmem:[#allocation77_spill] sm:$0xff] }
 0x362   : > { %v9354_v28 = vpack.c.b16 %v4531_v6, %v4530_v42  ;;  %v7012_v42 = vld [vmem:[#allocation8 + $0x170] sm:$0xff]  ;;  %v7126_v52 = vunpack.c.h.bf16 %v7279_v10  ;;  %vm10481_vm8 = vnez %v10480_v18 }
 0x363   : > { %10474 = vst [vmem:[#allocation74_spill] sm:$0xff] %v9348_v50  ;;  %4133 = vmatmul.bf16.gmra.mxu1 %v9348_v50  ;;  %5191 = vmatpush.bf16.msra.mxu2 %v7012_v42 }
 0x364   : > { %10476 = vst [vmem:[#allocation73_spill] sm:$0xff] %v9354_v28  ;;  %v4343_v21 = vpop.f32.mrf.mxu2 }
 0x365   : > { %v4422_v7 = vadd.f32 %v4343_v21, %v4140_v32  ;;  %v4625_v30 = vpop.f32.mrf.mxu3  ;;  %10477 = vst [vmem:[#allocation26_spill] sm:$0xff] %v9370_v16  ;;  %v4141_v32 = vadd.f32 %v9144_v13, %v3860_v15 }
 0x366   : > { %v4820_v9 = vpop.f32.mrf.mxu0  ;;  %v9359_v27 = vld [vmem:[#allocation2 + $0x80] sm:$0xff]  }
 0x367   : > { %v4704_v39 = vadd.f32 %v4625_v30, %v4422_v7  ;;  %v10054_v60 = vunpack.c.l.bf16 %v9359_v27  ;;  %v10055_v38 = vunpack.c.h.bf16 %v9359_v27  ;;  %v3784_v7 = vpack.c.bf16 %v3650_v49, %v3650_v49 }
 0x368   : > { %v9366_v43 = vpop.f32.mrf.mxu1  ;;  %v3861_v49 = vadd.f32 %v9309_v46, %v7126_v52  ;;  %v7036_v52 = vld [vmem:[#allocation8 + $0x230] sm:$0xff] }
 0x369   : > { %4385 = vmatmul.bf16.gmra.mxu2 %v9362_v62  ;;  %4859 = vmatmul.bf16.gmra.mxu0 %v9175_v17  ;;  %v3642_v56 = vrot.slane %v10054_v60, 1  ;;  %v9377_v40 = vadd.f32 %v4817_v4, %v4704_v39  ;;  %v3643_v6 = vrot.slane %v10055_v38, 1  ;;  %v4532_v3 = vunpack.c.l.b16 %v3784_v7 }
 0x36a   : > { %4667 = vmatmul.bf16.gmra.mxu3 %v9177_v55  ;;  %5767 = vmatpush.bf16.msra.mxu1 %v7036_v52 }
 0x36b   : > { %10478 = vst [vmem:[#allocation41_spill] sm:$0xff] %v9377_v40  ;;  %v3649_v21 = vsel %vm10479_vm1, %v3641_v44, %v3642_v56  ;;  %v3647_v4 = vsel %vm10482_vm5, %v3643_v6, %v9370_v16  ;;  %v3648_v10 = vsel %vm10483_vm12, %v3642_v56, %v3643_v6  ;;  %v4142_v6 = vadd.f32 %v9155_v41, %v3861_v49 }
 0x36c   : > { %v4346_v30 = vpop.f32.mrf.mxu2  ;;  %v3713_v60 = vsel %vm10481_vm8, 0.0, %v3649_v21  ;;  %v3715_v44 = vsel %vm8689_vm15, 0.0, %v3647_v4  ;;  %v7280_v21 = vld [vmem:[%s7731_s8 + $0x18] sm:$0xff]   ;;  %v3786_v55 = vpack.c.bf16 %v3648_v10, %v3648_v10  ;;  %vm10490_vm15 = vmmov %vm10338_vm0 }
 0x36d   : > { %v4423_v39 = vadd.f32 %v4346_v30, %v4141_v32  ;;  %v4628_v42 = vpop.f32.mrf.mxu3  ;;  %v3785_v38 = vpack.c.bf16 %v3713_v60, %v3713_v60  ;;  %v3787_v16 = vpack.c.bf16 %v3715_v44, %v3715_v44  ;;  %v7028_v32 = vld [vmem:[#allocation8 + $0x1f0] sm:$0xff]  ;;  %v7129_v4 = vunpack.c.l.bf16 %v7280_v21 }
 0x36e   : > { %v4822_v35 = vpop.f32.mrf.mxu0  ;;  %v5138_v40 = vunpack.c.l.b16 %v3786_v55  ;;  %5575 = vmatpush.bf16.msra.mxu0 %v7028_v32  ;;  %v9406_v55 = vld [vmem:[#allocation2 + $0x50] sm:$0xff] }
 0x36f   : > { %v4705_v15 = vadd.f32 %v4628_v42, %v4423_v39  ;;  %v4533_v18 = vunpack.c.l.b16 %v3785_v38  ;;  %v5139_v56 = vunpack.c.l.b16 %v3787_v16  ;;  %v3862_v13 = vadd.f32 %v9309_v46, %v7129_v4 }
 0x370   : > { %v9395_v17 = vpop.f32.mrf.mxu1 }
 0x371   : > { %v9397_v30 = vpack.c.b16 %v4533_v18, %v4532_v3  ;;  %v9399_v60 = vadd.f32 %v4820_v9, %v4705_v15  ;;  %v9403_v7 = vpack.c.b16 %v5139_v56, %v5138_v40  ;;  %v4143_v41 = vadd.f32 %v9173_v1, %v3862_v13  ;;  %v7281_v56 = vld [vmem:[%s7731_s8 + $0x20] sm:$0xff]  }
 0x372   : > { %v7130_v40 = vunpack.c.h.bf16 %v7280_v21  ;;  %v7133_v52 = vunpack.c.l.bf16 %v7281_v56 }
 0x373   : > { %10485 = vst [vmem:[#allocation78_spill] sm:$0xff] %v9397_v30  ;;  %5006 = vmatmul.bf16.vlgmr.msrb.gmra.mxu1 %v9097_v47 }
 0x374   : > { %v4348_v38 = vpop.f32.mrf.mxu2  ;;  %10486 = vst [vmem:[#allocation14_spill] sm:$0xff] %v9403_v7  ;;  %v3863_v18 = vadd.f32 %v9309_v46, %v7130_v40 }
 0x375   : > { %v4424_v39 = vadd.f32 %v4348_v38, %v4142_v6  ;;  %v4630_v42 = vpop.f32.mrf.mxu3 }
 0x376   : > { %v4825_v10 = vpop.f32.mrf.mxu0 }
 0x377   : > { %v4706_v9 = vadd.f32 %v4630_v42, %v4424_v39  ;;  %v3864_v42 = vadd.f32 %v9309_v46, %v7133_v52 }
 0x378   : > { %v9408_v16 = vpop.f32.mrf.mxu1 }
 0x379   : > { %4390 = vmatmul.bf16.gmra.mxu2 %v9406_v55  ;;  %4864 = vmatmul.bf16.gmra.mxu0 %v9204_v19  ;;  %v9412_v47 = vadd.f32 %v4822_v35, %v4706_v9  ;;  %v4144_v35 = vadd.f32 %v9184_v45, %v3863_v18  ;;  %v9425_v9 = vld [vmem:[#allocation2 + $0x58] sm:$0xff] }
 0x37a   : > { %4672 = vmatmul.bf16.gmra.mxu3 %v9206_v14 }
 0x37c   : > { %v4351_v44 = vpop.f32.mrf.mxu2 }
 0x37d   : > { %v4425_v49 = vadd.f32 %v4351_v44, %v4143_v41  ;;  %v4633_v15 = vpop.f32.mrf.mxu3  ;;  %v7011_v41 = vld [vmem:[#allocation8 + $0x168] sm:$0xff]  ;;  %v7134_v44 = vunpack.c.h.bf16 %v7281_v56 }
 0x37e   : > { %v4827_v3 = vpop.f32.mrf.mxu0  ;;  %5192 = vmatpush.bf16.msra.mxu2 %v7011_v41 }
 0x37f   : > { %v4707_v32 = vadd.f32 %v4633_v15, %v4425_v49 }
 0x380   : > { %v9418_v6 = vpop.f32.mrf.mxu1 }
 0x381   : > { %v9420_v4 = vadd.f32 %v4825_v10, %v4707_v32  ;;  %v4145_v10 = vadd.f32 %v9202_v59, %v3864_v42  ;;  %v7035_v59 = vld [vmem:[#allocation8 + $0x228] sm:$0xff] }
 0x382   : > { %5768 = vmatpush.bf16.msra.mxu1 %v7035_v59 }
 0x383   : > { %5011 = vmatmul.bf16.gmra.mxu1 %v9124_v8  ;;  %v7019_v8 = vld [vmem:[#allocation8 + $0x1a8] sm:$0xff] }
 0x384   : > { %v4353_v38 = vpop.f32.mrf.mxu2  ;;  %5384 = vmatpush.bf16.msra.mxu3 %v7019_v8 }
 0x385   : > { %v4426_v1 = vadd.f32 %v4353_v38, %v4144_v35  ;;  %v4635_v21 = vpop.f32.mrf.mxu3  ;;  %v3865_v35 = vadd.f32 %v9309_v46, %v7134_v44  ;;  %v7282_v38 = vld [vmem:[%s7731_s8 + $0x28] sm:$0xff]  }
 0x386   : > { %v4830_v39 = vpop.f32.mrf.mxu0  ;;  %v7137_v41 = vunpack.c.l.bf16 %v7282_v38 }
 0x387   : > { %v4708_v13 = vadd.f32 %v4635_v21, %v4426_v1 }
 0x388   : > { %v9427_v40 = vpop.f32.mrf.mxu1  ;;  %v3866_v44 = vadd.f32 %v9309_v46, %v7137_v41 }
 0x389   : > { %4395 = vmatmul.bf16.gmra.mxu2 %v9425_v9  ;;  %4869 = vmatmul.bf16.gmra.mxu0 %v9233_v29  ;;  %v9431_v45 = vadd.f32 %v4827_v3, %v4708_v13  ;;  %v7027_v3 = vld [vmem:[#allocation8 + $0x1e8] sm:$0xff]  ;;  %v4146_v13 = vadd.f32 %v9213_v20, %v3865_v35 }
 0x38a   : > { %4677 = vmatmul.bf16.gmra.mxu3 %v9235_v2  ;;  %5576 = vmatpush.bf16.msra.mxu0 %v7027_v3  ;;  %v4147_v20 = vadd.f32 %v9231_v34, %v3866_v44 }
 0x38c   : > { %v4356_v49 = vpop.f32.mrf.mxu2 }
 0x38d   : > { %v4427_v15 = vadd.f32 %v4356_v49, %v4145_v10  ;;  %v4638_v18 = vpop.f32.mrf.mxu3 }
 0x38e   : > { %v4832_v32 = vpop.f32.mrf.mxu0 }
 0x38f   : > { %v4709_v52 = vadd.f32 %v4638_v18, %v4427_v15  ;;  %v9444_v15 = vld [vmem:[#allocation2 + $0x60] sm:$0xff]  ;;  %v7138_v18 = vunpack.c.h.bf16 %v7282_v38 }
 0x390   : > { %v9437_v1 = vpop.f32.mrf.mxu1 }
 0x391   : > { %v9439_v21 = vadd.f32 %v4830_v39, %v4709_v52  ;;  %v3867_v41 = vadd.f32 %v9309_v46, %v7138_v18 }
 0x393   : > { %5016 = vmatmul.bf16.gmra.mxu1 %v9153_v57 }
 0x394   : > { %v4358_v56 = vpop.f32.mrf.mxu2 }
 0x395   : > { %v4428_v42 = vadd.f32 %v4358_v56, %v4146_v13  ;;  %v4640_v8 = vpop.f32.mrf.mxu3  ;;  %v7283_v56 = vld [vmem:[%s7731_s8 + $0x30] sm:$0xff]  }
 0x396   : > { %v4835_v10 = vpop.f32.mrf.mxu0 }
 0x397   : > { %v4710_v49 = vadd.f32 %v4640_v8, %v4428_v42 }
 0x398   : > { %v9446_v39 = vpop.f32.mrf.mxu1 }
 0x399   : > { %4400 = vmatmul.bf16.gmra.mxu2 %v9444_v15  ;;  %4874 = vmatmul.bf16.gmra.mxu0 %v9264_v26  ;;  %v9450_v57 = vadd.f32 %v4832_v32, %v4710_v49  ;;  %v4148_v32 = vadd.f32 %v9242_v33, %v3867_v41  ;;  %v7141_v49 = vunpack.c.l.bf16 %v7283_v56  ;;  %v7026_v26 = vld [vmem:[#allocation8 + $0x1e0] sm:$0xff]  ;;  %v7017_v41 = vld [vmem:[#allocation8 + $0x198] sm:$0xff] }
 0x39a   : > { %4682 = vmatmul.bf16.gmra.mxu3 %v9266_v37  ;;  %5577 = vmatpush.bf16.msra.mxu0 %v7026_v26  ;;  %v7007_v26 = vld [vmem:[#allocation8 + $0x148] sm:$0xff] }
 0x39c   : > { %v4361_v35 = vpop.f32.mrf.mxu2 }
 0x39d   : > { %v4429_v52 = vadd.f32 %v4361_v35, %v4147_v20  ;;  %v4643_v3 = vpop.f32.mrf.mxu3  ;;  %v9462_v20 = vld [vmem:[#allocation2 + $0x68] sm:$0xff]  ;;  %v3868_v35 = vadd.f32 %v9309_v46, %v7141_v49 }
 0x39e   : > { %v4837_v13 = vpop.f32.mrf.mxu0 }
 0x39f   : > { %v4711_v59 = vadd.f32 %v4643_v3, %v4429_v52  ;;  %v7010_v52 = vld [vmem:[#allocation8 + $0x160] sm:$0xff] }
 0x3a0   : > { %v9456_v42 = vpop.f32.mrf.mxu1  ;;  %v7018_v3 = vld [vmem:[#allocation8 + $0x1a0] sm:$0xff]  ;;  %5193 = vmatpush.bf16.msra.mxu2 %v7010_v52  ;;  %v7008_v52 = vld [vmem:[#allocation8 + $0x150] sm:$0xff] }
 0x3a1   : > { %v9458_v8 = vadd.f32 %v4835_v10, %v4711_v59  ;;  %v7142_v10 = vunpack.c.h.bf16 %v7283_v56  ;;  %5385 = vmatpush.bf16.msra.mxu3 %v7018_v3  ;;  %v7025_v59 = vld [vmem:[#allocation8 + $0x1d8] sm:$0xff]  ;;  %v7024_v56 = vld [vmem:[#allocation8 + $0x1d0] sm:$0xff] }
 0x3a2   : > { %5578 = vmatpush.bf16.msra.mxu0 %v7025_v59  ;;  %v7023_v59 = vld [vmem:[#allocation8 + $0x1c8] sm:$0xff] }
 0x3a3   : > { %5021 = vmatmul.bf16.gmra.mxu1 %v9182_v25  ;;  %v7009_v25 = vld [vmem:[#allocation8 + $0x158] sm:$0xff] }
 0x3a4   : > { %v4363_v7 = vpop.f32.mrf.mxu2  ;;  %5194 = vmatpush.bf16.msra.mxu2 %v7009_v25  ;;  %v7015_v25 = vld [vmem:[#allocation8 + $0x188] sm:$0xff] }
 0x3a5   : > { %v4430_v34 = vadd.f32 %v4363_v7, %v4148_v32  ;;  %v4645_v38 = vpop.f32.mrf.mxu3  ;;  %v4149_v7 = vadd.f32 %v9262_v48, %v3868_v35  ;;  %5386 = vmatpush.bf16.msra.mxu3 %v7017_v41 }
 0x3a6   : > { %v4840_v44 = vpop.f32.mrf.mxu0  ;;  %5579 = vmatpush.bf16.msra.mxu0 %v7024_v56  ;;  %v10488_v56 = vunpack.c.h.bf16 %v9359_v27 }
 0x3a7   : > { %v4712_v18 = vadd.f32 %v4645_v38, %v4430_v34 }
 0x3a8   : > { %v9465_v37 = vpop.f32.mrf.mxu1  ;;  %5195 = vmatpush.bf16.msra.mxu2 %v7008_v52 }
 0x3a9   : > { %4405 = vmatmul.bf16.gmra.mxu2 %v9462_v20  ;;  %4879 = vmatmul.bf16.gmra.mxu0 %v9304_v31  ;;  %v9469_v33 = vadd.f32 %v4837_v13, %v4712_v18  ;;  %v3869_v13 = vadd.f32 %v9309_v46, %v7142_v10  ;;  %v7016_v31 = vld [vmem:[#allocation8 + $0x190] sm:$0xff]  ;;  %v7034_v10 = vld [vmem:[#allocation8 + $0x220] sm:$0xff] }
 0x3aa   : > { %4687 = vmatmul.bf16.gmra.mxu3 %v9311_v36  ;;  %v7284_v36 = vld [vmem:[%s7731_s8 + $0x38] sm:$0xff]   ;;  %5769 = vmatpush.bf16.msra.mxu1 %v7034_v10 }
 0x3ab   : > { %v4150_v3 = vadd.f32 %v9273_v23, %v3869_v13  ;;  %5387 = vmatpush.bf16.msra.mxu3 %v7016_v31  ;;  %v9484_v13 = vld [vmem:[#allocation2 + $0x70] sm:$0xff]  ;;  %5580 = vmatpush.bf16.msra.mxu0 %v7023_v59 }
 0x3ac   : > { %v4366_v32 = vpop.f32.mrf.mxu2  ;;  %5196 = vmatpush.bf16.msra.mxu2 %v7007_v26  ;;  %v7014_v31 = vld [vmem:[#allocation8 + $0x180] sm:$0xff] }
 0x3ad   : > { %v4431_v49 = vadd.f32 %v4366_v32, %v4149_v7  ;;  %v4648_v34 = vpop.f32.mrf.mxu3  ;;  %v7145_v7 = vunpack.c.l.bf16 %v7284_v36 }
 0x3ae   : > { %v4842_v38 = vpop.f32.mrf.mxu0 }
 0x3af   : > { %v4713_v18 = vadd.f32 %v4648_v34, %v4431_v49  ;;  %v10487_v34 = vunpack.c.l.bf16 %v9359_v27  ;;  %5388 = vmatpush.bf16.msra.mxu3 %v7015_v25  ;;  %v7146_v25 = vunpack.c.h.bf16 %v7284_v36 }
 0x3b0   : > { %v9475_v48 = vpop.f32.mrf.mxu1 }
 0x3b1   : > { %v9477_v35 = vadd.f32 %v4840_v44, %v4713_v18  ;;  %v3534_v29 = vrot.slane %v10487_v34, 7  ;;  %v3870_v18 = vadd.f32 %v9309_v46, %v7145_v7 }
 0x3b3   : > { %5026 = vmatmul.bf16.gmra.mxu1 %v9211_v61  ;;  %v7006_v61 = vld [vmem:[#allocation8 + $0x140] sm:$0xff]  ;;  %v3541_v26 = vsel %vm10490_vm15, %v9323_v11, %v3534_v29  ;;  %v4151_v27 = vadd.f32 %v9302_v54, %v3870_v18  ;;  %5389 = vmatpush.bf16.msra.mxu3 %v7014_v31 }
 0x3b4   : > { %v4368_v41 = vpop.f32.mrf.mxu2  ;;  %5197 = vmatpush.bf16.msra.mxu2 %v7006_v61  ;;  %v7285_v54 = vld [vmem:[%s7731_s8 + $0x40] sm:$0xff]  }
 0x3b5   : > { %v4432_v32 = vadd.f32 %v4368_v41, %v4150_v3  ;;  %v4650_v49 = vpop.f32.mrf.mxu3  ;;  %v9490_v3 = vrot.slane %v10488_v56, 7  ;;  %v7022_v41 = vld [vmem:[#allocation8 + $0x1c0] sm:$0xff] }
 0x3b6   : > { %v4845_v44 = vpop.f32.mrf.mxu0  ;;  %5581 = vmatpush.bf16.msra.mxu0 %v7022_v41 }
 0x3b7   : > { %v4714_v23 = vadd.f32 %v4650_v49, %v4432_v32  ;;  %10489 = vst [vmem:[#allocation81_spill] sm:$0xff] %v9490_v3  ;;  %v3540_v59 = vsel %vm10491_vm14, %v3534_v29, %v9490_v3  ;;  %v3606_v49 = vsel %vm8675_vm2, 0.0, %v3541_v26  ;;  %v7149_v29 = vunpack.c.l.bf16 %v7285_v54  ;;  %vm10527_vm2 = vmmov %vm10338_vm0 }
 0x3b8   : > { %v9486_v52 = vpop.f32.mrf.mxu1  ;;  %v3750_v61 = vpack.c.bf16 %v3606_v49, %v3606_v49 }
 0x3b9   : > { %4410 = vmatmul.bf16.gmra.mxu2 %v9484_v13  ;;  %4884 = vmatmul.bf16.gmra.mxu0 %v9348_v50  ;;  %v9497_v7 = vadd.f32 %v4842_v38, %v4714_v23  ;;  %v3871_v23 = vadd.f32 %v9309_v46, %v7146_v25  ;;  %v3751_v50 = vpack.c.bf16 %v3540_v59, %v3540_v59  ;;  %v9515_v59 = vld [vmem:[#allocation2 + $0x78] sm:$0xff] }
 0x3ba   : > { %4692 = vmatmul.bf16.gmra.mxu3 %v9354_v28  ;;  %v4754_v26 = vunpack.c.l.b16 %v3750_v61  ;;  %v3872_v25 = vadd.f32 %v9309_v46, %v7149_v29 }
 0x3bb   : > { %v4152_v31 = vadd.f32 %v9319_v51, %v3871_v23  ;;  %v4755_v41 = vunpack.c.l.b16 %v3751_v50  ;;  %v7150_v50 = vunpack.c.h.bf16 %v7285_v54 }
 0x3bc   : > { %v4371_v10 = vpop.f32.mrf.mxu2  ;;  %v4153_v51 = vadd.f32 %v9346_v58, %v3872_v25 }
 0x3bd   : > { %v4433_v11 = vadd.f32 %v4371_v10, %v4151_v27  ;;  %v4653_v38 = vpop.f32.mrf.mxu3 }
 0x3be   : > { %v4847_v34 = vpop.f32.mrf.mxu0 }
 0x3bf   : > { %v4715_v56 = vadd.f32 %v4653_v38, %v4433_v11  ;;  %v9517_v11 = vpack.c.b16 %v4755_v41, %v4754_v26  ;;  %v7286_v26 = vld [vmem:[%s7731_s8 + $0x48] sm:$0xff]  }
 0x3c0   : > { %v9508_v36 = vpop.f32.mrf.mxu1 }
 0x3c1   : > { %v9510_v18 = vadd.f32 %v4845_v44, %v4715_v56  ;;  %10493 = vst [vmem:[#allocation83_spill] sm:$0xff] %v9517_v11 }
 0x3c3   : > { %5031 = vmatmul.bf16.gmra.mxu1 %v9240_v24 }
 0x3c4   : > { %v4373_v27 = vpop.f32.mrf.mxu2 }
 0x3c5   : > { %v4434_v10 = vadd.f32 %v4373_v27, %v4152_v31  ;;  %v4655_v32 = vpop.f32.mrf.mxu3  ;;  %v3873_v31 = vadd.f32 %v9309_v46, %v7150_v50 }
 0x3c6   : > { %v4850_v5 = vpop.f32.mrf.mxu0 }
 0x3c7   : > { %v4716_v49 = vadd.f32 %v4655_v32, %v4434_v10  ;;  %v7153_v10 = vunpack.c.l.bf16 %v7286_v26  ;;  %v7033_v32 = vld [vmem:[#allocation8 + $0x218] sm:$0xff] }
 0x3c8   : > { %v9519_v44 = vpop.f32.mrf.mxu1  ;;  %5770 = vmatpush.bf16.msra.mxu1 %v7033_v32 }
 0x3c9   : > { %4415 = vmatmul.bf16.gmra.mxu2 %v9515_v59  ;;  %4889 = vmatmul.bf16.gmra.mxu0 %v9517_v11  ;;  %v9523_v24 = vadd.f32 %v4847_v34, %v4716_v49  ;;  %v4154_v34 = vadd.f32 %v9366_v43, %v3873_v31 }
 0x3ca   : > { %4697 = vmatmul.bf16.gmra.mxu3 %v9397_v30 }
 0x3cc   : > { %v4376_v38 = vpop.f32.mrf.mxu2 }
 0x3cd   : > { %v4435_v23 = vadd.f32 %v4376_v38, %v4153_v51  ;;  %v4658_v56 = vpop.f32.mrf.mxu3  ;;  %v3874_v51 = vadd.f32 %v9309_v46, %v7153_v10 }
 0x3ce   : > { %v4852_v61 = vpop.f32.mrf.mxu0 }
 0x3cf   : > { %v4717_v29 = vadd.f32 %v4658_v56, %v4435_v23  ;;  %v7154_v23 = vunpack.c.h.bf16 %v7286_v26 }
 0x3d0   : > { %v9529_v41 = vpop.f32.mrf.mxu1 }
 0x3d1   : > { %v9531_v27 = vadd.f32 %v4850_v5, %v4717_v29  ;;  %v7416_v5 = vld [vmem:[#allocation2 + $0x10] sm:$0xff]  ;;  %v3875_v10 = vadd.f32 %v9309_v46, %v7154_v23  ;;  %v10494_v23 = vld [vmem:[#allocation36_spill] sm:$0xff] }
 0x3d3   : > { %5036 = vmatmul.bf16.gmra.mxu1 %v9271_v12  ;;  %v4155_v12 = vadd.f32 %v9395_v17, %v3874_v51 }
 0x3d4   : > { %v4378_v58 = vpop.f32.mrf.mxu2 }
 0x3d5   : > { %v4436_v54 = vadd.f32 %v4378_v58, %v4154_v34  ;;  %v4660_v25 = vpop.f32.mrf.mxu3  ;;  %v7287_v58 = vld [vmem:[%s7731_s8 + $0x50] sm:$0xff]  }
 0x3d6   : > { %v4855_v49 = vpop.f32.mrf.mxu0 }
 0x3d7   : > { %v4718_v50 = vadd.f32 %v4660_v25, %v4436_v54  ;;  %v7157_v25 = vunpack.c.l.bf16 %v7287_v58 }
 0x3d8   : > { %v9536_v38 = vpop.f32.mrf.mxu1 }
 0x3d9   : > { %5198 = vmatmul.bf16.vlgmr.msra.gmra.mxu2 %v8893_v0  ;;  %5582 = vmatmul.bf16.vlgmr.msra.gmra.mxu0 %v7416_v5  ;;  %v9539_v43 = vadd.f32 %v4852_v61, %v4718_v50  ;;  %v4156_v61 = vadd.f32 %v9408_v16, %v3875_v10  ;;  %v3876_v50 = vadd.f32 %v9309_v46, %v7157_v25  ;;  %v10495_v16 = vld [vmem:[#allocation16_spill] sm:$0xff] }
 0x3da   : > { %5390 = vmatmul.bf16.vlgmr.msra.gmra.mxu3 %v8891_v63 }
 0x3dc   : > { %v4381_v56 = vpop.f32.mrf.mxu2 }
 0x3dd   : > { %v4437_v31 = vadd.f32 %v4381_v56, %v4155_v12  ;;  %v4663_v29 = vpop.f32.mrf.mxu3  ;;  %v7417_v56 = vld [vmem:[#allocation2 + $0x18] sm:$0xff] }
 0x3de   : > { %v4857_v34 = vpop.f32.mrf.mxu0 }
 0x3df   : > { %v4719_v32 = vadd.f32 %v4663_v29, %v4437_v31  ;;  %v4157_v31 = vadd.f32 %v9418_v6, %v3876_v50  ;;  %v7158_v29 = vunpack.c.h.bf16 %v7287_v58  ;;  %v7032_v6 = vld [vmem:[#allocation8 + $0x210] sm:$0xff] }
 0x3e0   : > { %v9545_v54 = vpop.f32.mrf.mxu1  ;;  %5771 = vmatpush.bf16.msra.mxu1 %v7032_v6 }
 0x3e1   : > { %v9547_v0 = vadd.f32 %v4855_v49, %v4719_v32  ;;  %v3877_v25 = vadd.f32 %v9309_v46, %v7158_v29 }
 0x3e3   : > { %5041 = vmatmul.bf16.gmra.mxu1 %v9317_v22 }
 0x3e4   : > { %v4383_v63 = vpop.f32.mrf.mxu2 }
 0x3e5   : > { %v4438_v17 = vadd.f32 %v4383_v63, %v4156_v61  ;;  %v4665_v26 = vpop.f32.mrf.mxu3 }
 0x3e6   : > { %v4860_v51 = vpop.f32.mrf.mxu0 }
 0x3e7   : > { %v4720_v5 = vadd.f32 %v4665_v26, %v4438_v17  ;;  %v7288_v26 = vld [vmem:[%s7731_s8 + $0x58] sm:$0xff]  }
 0x3e8   : > { %v9552_v12 = vpop.f32.mrf.mxu1 }
 0x3e9   : > { %5203 = vmatmul.bf16.gmra.mxu2 %v10494_v23  ;;  %5587 = vmatmul.bf16.gmra.mxu0 %v7417_v56  ;;  %v9555_v49 = vadd.f32 %v4857_v34, %v4720_v5  ;;  %v4158_v34 = vadd.f32 %v9427_v40, %v3877_v25  ;;  %v7161_v5 = vunpack.c.l.bf16 %v7288_v26  ;;  %v7418_v40 = vld [vmem:[#allocation2 + $0x20] sm:$0xff]  ;;  %v10498_v25 = vld [vmem:[#allocation54_spill] sm:$0xff] }
 0x3ea   : > { %5395 = vmatmul.bf16.gmra.mxu3 %v10495_v16 }
 0x3eb   : > { %v3878_v29 = vadd.f32 %v9309_v46, %v7161_v5 }
 0x3ec   : > { %v4386_v10 = vpop.f32.mrf.mxu2 }
 0x3ed   : > { %v4439_v32 = vadd.f32 %v4386_v10, %v4157_v31  ;;  %v4668_v61 = vpop.f32.mrf.mxu3 }
 0x3ee   : > { %v4862_v63 = vpop.f32.mrf.mxu0 }
 0x3ef   : > { %v4721_v17 = vadd.f32 %v4668_v61, %v4439_v32 }
 0x3f0   : > { %v5007_v3 = vpop.f32.mrf.mxu1 }
 0x3f1   : > { %v9562_v11 = vadd.f32 %v5007_v3, %v9350_v53  ;;  %v9564_v56 = vadd.f32 %v4860_v51, %v4721_v17  ;;  %v10496_v53 = vld [vmem:[#allocation41_spill] sm:$0xff]  ;;  %v4159_v17 = vadd.f32 %v9437_v1, %v3878_v29 }
 0x3f2   : > { %v10497_v51 = vld [vmem:[#allocation53_spill] sm:$0xff] }
 0x3f3   : > { %5046 = vmatmul.bf16.gmra.mxu1 %v9362_v62 }
 0x3f4   : > { %v4388_v58 = vpop.f32.mrf.mxu2 }
 0x3f5   : > { %v4440_v50 = vadd.f32 %v4388_v58, %v4158_v34  ;;  %v4670_v16 = vpop.f32.mrf.mxu3  ;;  %v7162_v34 = vunpack.c.h.bf16 %v7288_v26 }
 0x3f6   : > { %v4865_v31 = vpop.f32.mrf.mxu0 }
 0x3f7   : > { %v4722_v10 = vadd.f32 %v4670_v16, %v4440_v50  ;;  %v3879_v16 = vadd.f32 %v9309_v46, %v7162_v34 }
 0x3f8   : > { %v5009_v32 = vpop.f32.mrf.mxu1 }
 0x3f9   : > { %v9570_v3 = vadd.f32 %v5009_v32, %v10496_v53  ;;  %5208 = vmatmul.bf16.gmra.mxu2 %v10497_v51  ;;  %5592 = vmatmul.bf16.gmra.mxu0 %v7418_v40  ;;  %v9573_v61 = vadd.f32 %v4862_v63, %v4722_v10  ;;  %v7289_v32 = vld [vmem:[%s7731_s8 + $0x60] sm:$0xff]   ;;  %v4160_v63 = vadd.f32 %v9446_v39, %v3879_v16 }
 0x3fa   : > { %5400 = vmatmul.bf16.gmra.mxu3 %v10498_v25  ;;  %v7165_v10 = vunpack.c.l.bf16 %v7289_v32  ;;  %v7166_v16 = vunpack.c.h.bf16 %v7289_v32 }
 0x3fc   : > { %v4391_v6 = vpop.f32.mrf.mxu2 }
 0x3fd   : > { %v4441_v58 = vadd.f32 %v4391_v6, %v4159_v17  ;;  %v4673_v5 = vpop.f32.mrf.mxu3  ;;  %v3880_v17 = vadd.f32 %v9309_v46, %v7165_v10 }
 0x3fe   : > { %v4867_v50 = vpop.f32.mrf.mxu0 }
 0x3ff   : > { %v4723_v30 = vadd.f32 %v4673_v5, %v4441_v58  ;;  %v4161_v5 = vadd.f32 %v9456_v42, %v3880_v17  ;;  %v7031_v42 = vld [vmem:[#allocation8 + $0x208] sm:$0xff] }
 0x400   : > { %v5012_v53 = vpop.f32.mrf.mxu1  ;;  %5772 = vmatpush.bf16.msra.mxu1 %v7031_v42 }
 0x401   : > { %v9580_v28 = vadd.f32 %v5012_v53, %v9399_v60  ;;  %v9582_v40 = vadd.f32 %v4865_v31, %v4723_v30  ;;  %v10499_v60 = vld [vmem:[#allocation59_spill] sm:$0xff]  ;;  %v7419_v30 = vld [vmem:[#allocation2 + $0x28] sm:$0xff]  ;;  %v10500_v31 = vld [vmem:[#allocation58_spill] sm:$0xff] }
 0x403   : > { %5051 = vmatmul.bf16.gmra.mxu1 %v9406_v55 }
 0x404   : > { %v4393_v1 = vpop.f32.mrf.mxu2 }
 0x405   : > { %v4442_v26 = vadd.f32 %v4393_v1, %v4160_v63  ;;  %v4675_v29 = vpop.f32.mrf.mxu3 }
 0x406   : > { %v4870_v25 = vpop.f32.mrf.mxu0 }
 0x407   : > { %v4724_v34 = vadd.f32 %v4675_v29, %v4442_v26  ;;  %v3881_v26 = vadd.f32 %v9309_v46, %v7166_v16 }
 0x408   : > { %v5014_v6 = vpop.f32.mrf.mxu1 }
 0x409   : > { %v9588_v58 = vadd.f32 %v5014_v6, %v9412_v47  ;;  %5213 = vmatmul.bf16.gmra.mxu2 %v10499_v60  ;;  %5597 = vmatmul.bf16.gmra.mxu0 %v7419_v30  ;;  %v9591_v39 = vadd.f32 %v4867_v50, %v4724_v34  ;;  %v7290_v47 = vld [vmem:[%s7731_s8 + $0x68] sm:$0xff]   ;;  %v4162_v50 = vadd.f32 %v9465_v37, %v3881_v26  ;;  %v7420_v37 = vld [vmem:[#allocation2 + $0x30] sm:$0xff] }
 0x40a   : > { %5405 = vmatmul.bf16.gmra.mxu3 %v10500_v31  ;;  %v7169_v34 = vunpack.c.l.bf16 %v7290_v47  ;;  %v10502_v26 = vld [vmem:[#allocation57_spill] sm:$0xff] }
 0x40c   : > { %v4396_v53 = vpop.f32.mrf.mxu2  ;;  %v3882_v16 = vadd.f32 %v9309_v46, %v7169_v34 }
 0x40d   : > { %v4443_v63 = vadd.f32 %v4396_v53, %v4161_v5  ;;  %v4678_v10 = vpop.f32.mrf.mxu3 }
 0x40e   : > { %v4872_v1 = vpop.f32.mrf.mxu0 }
 0x40f   : > { %v4725_v29 = vadd.f32 %v4678_v10, %v4443_v63 }
 0x410   : > { %v5017_v6 = vpop.f32.mrf.mxu1 }
 0x411   : > { %v9598_v60 = vadd.f32 %v5017_v6, %v9420_v4  ;;  %v9600_v30 = vadd.f32 %v4870_v25, %v4725_v29  ;;  %v10501_v25 = vld [vmem:[#allocation21_spill] sm:$0xff]  ;;  %v4163_v29 = vadd.f32 %v9475_v48, %v3882_v16  ;;  %v7170_v6 = vunpack.c.h.bf16 %v7290_v47 }
 0x413   : > { %5056 = vmatmul.bf16.gmra.mxu1 %v9425_v9 }
 0x414   : > { %v4398_v32 = vpop.f32.mrf.mxu2 }
 0x415   : > { %v4444_v17 = vadd.f32 %v4398_v32, %v4162_v50  ;;  %v4680_v31 = vpop.f32.mrf.mxu3 }
 0x416   : > { %v4875_v5 = vpop.f32.mrf.mxu0 }
 0x417   : > { %v4726_v53 = vadd.f32 %v4680_v31, %v4444_v17  ;;  %v3883_v17 = vadd.f32 %v9309_v46, %v7170_v6 }
 0x418   : > { %v5019_v63 = vpop.f32.mrf.mxu1 }
 0x419   : > { %v9606_v4 = vadd.f32 %v5019_v63, %v9431_v45  ;;  %5218 = vmatmul.bf16.gmra.mxu2 %v10501_v25  ;;  %5602 = vmatmul.bf16.gmra.mxu0 %v7420_v37  ;;  %v9609_v10 = vadd.f32 %v4872_v1, %v4726_v53  ;;  %v7291_v45 = vld [vmem:[%s7731_s8 + $0x70] sm:$0xff]   ;;  %v4164_v1 = vadd.f32 %v9486_v52, %v3883_v17 }
 0x41a   : > { %5410 = vmatmul.bf16.gmra.mxu3 %v10502_v26  ;;  %v7173_v53 = vunpack.c.l.bf16 %v7291_v45 }
 0x41c   : > { %v4401_v50 = vpop.f32.mrf.mxu2 }
 0x41d   : > { %v4445_v42 = vadd.f32 %v4401_v50, %v4163_v29  ;;  %v4683_v34 = vpop.f32.mrf.mxu3  ;;  %v3884_v29 = vadd.f32 %v9309_v46, %v7173_v53 }
 0x41e   : > { %v4877_v32 = vpop.f32.mrf.mxu0 }
 0x41f   : > { %v4727_v31 = vadd.f32 %v4683_v34, %v4445_v42  ;;  %v10504_v34 = vld [vmem:[#allocation63_spill] sm:$0xff]  ;;  %v4165_v17 = vadd.f32 %v9508_v36, %v3884_v29  ;;  %v7030_v36 = vld [vmem:[#allocation8 + $0x200] sm:$0xff] }
 0x420   : > { %v5022_v63 = vpop.f32.mrf.mxu1  ;;  %5773 = vmatpush.bf16.msra.mxu1 %v7030_v36 }
 0x421   : > { %v9616_v25 = vadd.f32 %v5022_v63, %v9439_v21  ;;  %v9618_v37 = vadd.f32 %v4875_v5, %v4727_v31  ;;  %v10503_v21 = vld [vmem:[#allocation61_spill] sm:$0xff]  ;;  %v7421_v5 = vld [vmem:[#allocation2 + $0x38] sm:$0xff]  ;;  %v7174_v31 = vunpack.c.h.bf16 %v7291_v45 }
 0x423   : > { %5061 = vmatmul.bf16.gmra.mxu1 %v9444_v15 }
 0x424   : > { %v4403_v48 = vpop.f32.mrf.mxu2 }
 0x425   : > { %v4446_v47 = vadd.f32 %v4403_v48, %v4164_v1  ;;  %v4685_v16 = vpop.f32.mrf.mxu3 }
 0x426   : > { %v4880_v26 = vpop.f32.mrf.mxu0 }
 0x427   : > { %v4728_v6 = vadd.f32 %v4685_v16, %v4446_v47  ;;  %v3885_v47 = vadd.f32 %v9309_v46, %v7174_v31 }
 0x428   : > { %v5024_v50 = vpop.f32.mrf.mxu1 }
 0x429   : > { %v9624_v42 = vadd.f32 %v5024_v50, %v9450_v57  ;;  %5223 = vmatmul.bf16.gmra.mxu2 %v10503_v21  ;;  %5607 = vmatmul.bf16.gmra.mxu0 %v7421_v5  ;;  %v9627_v52 = vadd.f32 %v4877_v32, %v4728_v6  ;;  %v7292_v57 = vld [vmem:[%s7731_s8 + $0x78] sm:$0xff]   ;;  %v4166_v32 = vadd.f32 %v9519_v44, %v3885_v47 }
 0x42a   : > { %5415 = vmatmul.bf16.gmra.mxu3 %v10504_v34  ;;  %v7177_v6 = vunpack.c.l.bf16 %v7292_v57 }
 0x42c   : > { %v4406_v63 = vpop.f32.mrf.mxu2  ;;  %v3886_v31 = vadd.f32 %v9309_v46, %v7177_v6 }
 0x42d   : > { %v4447_v1 = vadd.f32 %v4406_v63, %v4165_v17  ;;  %v4688_v53 = vpop.f32.mrf.mxu3 }
 0x42e   : > { %v4882_v48 = vpop.f32.mrf.mxu0  ;;  %v4167_v47 = vadd.f32 %v9529_v41, %v3886_v31 }
 0x42f   : > { %v4729_v16 = vadd.f32 %v4688_v53, %v4447_v1  ;;  %v10506_v53 = vld [vmem:[#allocation62_spill] sm:$0xff] }
 0x430   : > { %v5027_v50 = vpop.f32.mrf.mxu1 }
 0x431   : > { %v9634_v21 = vadd.f32 %v5027_v50, %v9458_v8  ;;  %v9636_v5 = vadd.f32 %v4880_v26, %v4729_v16  ;;  %v10505_v26 = vld [vmem:[#allocation66_spill] sm:$0xff]  ;;  %v7178_v16 = vunpack.c.h.bf16 %v7292_v57 }
 0x433   : > { %5066 = vmatmul.bf16.gmra.mxu1 %v9462_v20 }
 0x434   : > { %v4408_v45 = vpop.f32.mrf.mxu2 }
 0x435   : > { %v4448_v29 = vadd.f32 %v4408_v45, %v4166_v32  ;;  %v4690_v34 = vpop.f32.mrf.mxu3  ;;  %v3887_v45 = vadd.f32 %v9309_v46, %v7178_v16  ;;  %v7422_v46 = vld [vmem:[%s9913_s4] ss:$0 sm:$0xff] }
 0x436   : > { %v4885_v17 = vpop.f32.mrf.mxu0 }
 0x437   : > { %v4730_v63 = vadd.f32 %v4690_v34, %v4448_v29 }
 0x438   : > { %v5029_v1 = vpop.f32.mrf.mxu1 }
 0x439   : > { %v9642_v8 = vadd.f32 %v5029_v1, %v9469_v33  ;;  %5228 = vmatmul.bf16.gmra.mxu2 %v10505_v26  ;;  %5612 = vmatmul.bf16.gmra.mxu0 %v9317_v22  ;;  %v9646_v44 = vadd.f32 %v4882_v48, %v4730_v63  ;;  %v7293_v33 = vld [vmem:[%s7731_s8 + $0x80] sm:$0xff]   ;;  %v4168_v48 = vadd.f32 %v9536_v38, %v3887_v45  ;;  %s7529_s8 = scalar_lea.hbm %s7528_s10, 128 }
 0x43a   : > { %5420 = vmatmul.bf16.gmra.mxu3 %v10506_v53  ;;  %v7181_v63 = vunpack.c.l.bf16 %v7293_v33  ;;  %v7182_v45 = vunpack.c.h.bf16 %v7293_v33  ;;  %p7530_p1 = scmp.ne.s32.totalorder %s7528_s10, %s7529_s8  ;;  %p7535_p9 = scmp.lt.s32.totalorder %s7533_s30, %s7529_s8 }
 0x43c   : > { %v4411_v50 = vpop.f32.mrf.mxu2  ;;  %p7531_p4 = pnand %p7530_p1, %p7694_p3  ;;  %p7536_p2 = por %p7535_p9, %p7534_p11 }
 0x43d   : > { %v4449_v32 = vadd.f32 %v4411_v50, %v4167_v47  ;;  %v4693_v6 = vpop.f32.mrf.mxu3  ;;  %v3888_v47 = vadd.f32 %v7422_v46, %v7181_v63 }
 0x43e   : > { %v4887_v36 = vpop.f32.mrf.mxu0  ;;  %p7532_p8 = pneg %p7531_p4 }
 0x43f   : > { %v4731_v29 = vadd.f32 %v4693_v6, %v4449_v32  ;;  %v10508_v32 = vld [vmem:[#allocation68_spill] sm:$0xff]  ;;  %v4169_v6 = vadd.f32 %v9545_v54, %v3888_v47 }
 0x440   : > { %v5032_v34 = vpop.f32.mrf.mxu1  ;;  %p7537_p10 = pnand %p7536_p2, %p7532_p8 }
 0x441   : > { %v9653_v1 = vadd.f32 %v5032_v34, %v9477_v35  ;;  %v9655_v22 = vadd.f32 %v4885_v17, %v4731_v29  ;;  %v10507_v17 = vld [vmem:[#allocation19_spill] sm:$0xff] }
 0x443   : > { %5071 = vmatmul.bf16.gmra.mxu1 %v9484_v13 }
 0x444   : > { %v4413_v41 = vpop.f32.mrf.mxu2 }
 0x445   : > { %v4450_v57 = vadd.f32 %v4413_v41, %v4168_v48  ;;  %v4695_v31 = vpop.f32.mrf.mxu3  ;;  %v3889_v41 = vadd.f32 %v7422_v46, %v7182_v45  ;;  %v10509_v46 = vld [vmem:[#allocation22_spill] sm:$0xff] }
 0x446   : > { %v4890_v53 = vpop.f32.mrf.mxu0 }
 0x447   : > { %v4732_v16 = vadd.f32 %v4695_v31, %v4450_v57 }
 0x448   : > { %v5034_v50 = vpop.f32.mrf.mxu1 }
 0x449   : > { %v9663_v35 = vadd.f32 %v5034_v50, %v9497_v7  ;;  %5233 = vmatmul.bf16.gmra.mxu2 %v10507_v17  ;;  %5617 = vmatmul.bf16.gmra.mxu0 %v9362_v62  ;;  %v9667_v38 = vadd.f32 %v4887_v36, %v4732_v16  ;;  %v4170_v62 = vadd.f32 %v9552_v12, %v3889_v41 }
 0x44a   : > { %5425 = vmatmul.bf16.gmra.mxu3 %v10508_v32 }
 0x44c   : > { %v4416_v29 = vpop.f32.mrf.mxu2 }
 0x44d   : > { %v4451_v34 = vadd.f32 %v4416_v29, %v4169_v6  ;;  %v4698_v48 = vpop.f32.mrf.mxu3 }
 0x44e   : > { %v4892_v63 = vpop.f32.mrf.mxu0 }
 0x44f   : > { %v4733_v57 = vadd.f32 %v4698_v48, %v4451_v34 }
 0x450   : > { %v5037_v31 = vpop.f32.mrf.mxu1 }
 0x451   : > { %v9672_v7 = vadd.f32 %v5037_v31, %v9510_v18  ;;  %v9674_v50 = vadd.f32 %v4890_v53, %v4733_v57  ;;  %v10510_v53 = vld [vmem:[#allocation70_spill] sm:$0xff] }
 0x453   : > { %5076 = vmatmul.bf16.gmra.mxu1 %v9515_v59 }
 0x454   : > { %v4418_v36 = vpop.f32.mrf.mxu2 }
 0x455   : > { %v4452_v16 = vadd.f32 %v4418_v36, %v4170_v62  ;;  %v4700_v54 = vpop.f32.mrf.mxu3 }
 0x456   : > { %v5583_v33 = vpop.f32.mrf.mxu0 }
 0x457   : > { %v4734_v47 = vadd.f32 %v4700_v54, %v4452_v16 }
 0x458   : > { %v5039_v32 = vpop.f32.mrf.mxu1 }
 0x459   : > { %v9679_v6 = vadd.f32 %v5039_v32, %v9523_v24  ;;  %5238 = vmatmul.bf16.gmra.mxu2 %v10509_v46  ;;  %5622 = vmatmul.bf16.gmra.mxu0 %v9406_v55  ;;  %v9683_v18 = vadd.f32 %v4892_v63, %v4734_v47  ;;  %v9690_v24 = vld [vmem:[#allocation2 + $0x80] sm:$0xff] }
 0x45a   : > { %5430 = vmatmul.bf16.gmra.mxu3 %v10510_v53 }
 0x45c   : > { %v5199_v12 = vpop.f32.mrf.mxu2 }
 0x45d   : > { %v5279_v45 = vadd.f32 %v5199_v12, %v9562_v11  ;;  %v5391_v29 = vpop.f32.mrf.mxu3 }
 0x45e   : > { %v5585_v34 = vpop.f32.mrf.mxu0 }
 0x45f   : > { %v5471_v48 = vadd.f32 %v5391_v29, %v5279_v45 }
 0x460   : > { %v5042_v41 = vpop.f32.mrf.mxu1 }
 0x461   : > { %v9688_v57 = vadd.f32 %v5042_v41, %v9531_v27  ;;  %v9692_v31 = vadd.f32 %v5583_v33, %v5471_v48 }
 0x463   : > { %5081 = vmatmul.bf16.gmra.mxu1 %v9690_v24 }
 0x464   : > { %v5201_v55 = vpop.f32.mrf.mxu2 }
 0x465   : > { %v5280_v63 = vadd.f32 %v5201_v55, %v9570_v3  ;;  %v5393_v62 = vpop.f32.mrf.mxu3  ;;  %v10511_v55 = vld [vmem:[#allocation39_spill] sm:$0xff] }
 0x466   : > { %v5588_v36 = vpop.f32.mrf.mxu0 }
 0x467   : > { %v5472_v16 = vadd.f32 %v5393_v62, %v5280_v63 }
 0x468   : > { %v5044_v11 = vpop.f32.mrf.mxu1 }
 0x469   : > { %v9697_v54 = vadd.f32 %v5044_v11, %v9539_v43  ;;  %5243 = vmatmul.bf16.gmra.mxu2 %v9206_v14  ;;  %5627 = vmatmul.bf16.gmra.mxu0 %v9425_v9  ;;  %v9701_v27 = vadd.f32 %v5585_v34, %v5472_v16 }
 0x46a   : > { %5435 = vmatmul.bf16.gmra.mxu3 %v9204_v19 }
 0x46c   : > { %v5204_v33 = vpop.f32.mrf.mxu2 }
 0x46d   : > { %v5281_v47 = vadd.f32 %v5204_v33, %v9580_v28  ;;  %v5396_v32 = vpop.f32.mrf.mxu3 }
 0x46e   : > { %v5590_v53 = vpop.f32.mrf.mxu0 }
 0x46f   : > { %v5473_v3 = vadd.f32 %v5396_v32, %v5281_v47 }
 0x470   : > { %v5047_v12 = vpop.f32.mrf.mxu1 }
 0x471   : > { %v9706_v45 = vadd.f32 %v5047_v12, %v9547_v0  ;;  %v9708_v43 = vadd.f32 %v5588_v36, %v5473_v3  ;;  %v10513_v12 = vld [vmem:[#allocation72_spill] sm:$0xff] }
 0x473   : > { %5774 = vmatmul.bf16.vlgmr.msra.gmra.mxu1 %v10494_v23 }
 0x474   : > { %v5206_v29 = vpop.f32.mrf.mxu2 }
 0x475   : > { %v5282_v9 = vadd.f32 %v5206_v29, %v9588_v58  ;;  %v5398_v34 = vpop.f32.mrf.mxu3 }
 0x476   : > { %v5593_v0 = vpop.f32.mrf.mxu0 }
 0x477   : > { %v5474_v48 = vadd.f32 %v5398_v34, %v5282_v9 }
 0x478   : > { %v5049_v19 = vpop.f32.mrf.mxu1 }
 0x479   : > { %v9713_v41 = vadd.f32 %v5049_v19, %v9555_v49  ;;  %5248 = vmatmul.bf16.gmra.mxu2 %v9235_v2  ;;  %5632 = vmatmul.bf16.gmra.mxu0 %v9444_v15  ;;  %v9717_v28 = vadd.f32 %v5590_v53, %v5474_v48 }
 0x47a   : > { %5440 = vmatmul.bf16.gmra.mxu3 %v10511_v55 }
 0x47c   : > { %v5209_v63 = vpop.f32.mrf.mxu2 }
 0x47d   : > { %v5283_v23 = vadd.f32 %v5209_v63, %v9598_v60  ;;  %v5401_v62 = vpop.f32.mrf.mxu3  ;;  %v10512_v60 = vld [vmem:[#allocation75_spill] sm:$0xff] }
 0x47e   : > { %v5595_v11 = vpop.f32.mrf.mxu0 }
 0x47f   : > { %v5475_v58 = vadd.f32 %v5401_v62, %v5283_v23 }
 0x480   : > { %v5052_v36 = vpop.f32.mrf.mxu1 }
 0x481   : > { %v9722_v16 = vadd.f32 %v5052_v36, %v9564_v56  ;;  %v9724_v49 = vadd.f32 %v5593_v0, %v5475_v58  ;;  %v10514_v0 = vld [vmem:[#allocation59_spill] sm:$0xff]  ;;  %v10515_v36 = vld [vmem:[#allocation40_spill] sm:$0xff] }
 0x483   : > { %5779 = vmatmul.bf16.gmra.mxu1 %v10497_v51 }
 0x484   : > { %v5211_v15 = vpop.f32.mrf.mxu2 }
 0x485   : > { %v5284_v33 = vadd.f32 %v5211_v15, %v9606_v4  ;;  %v5403_v47 = vpop.f32.mrf.mxu3 }
 0x486   : > { %v5598_v34 = vpop.f32.mrf.mxu0 }
 0x487   : > { %v5476_v32 = vadd.f32 %v5403_v47, %v5284_v33 }
 0x488   : > { %v5054_v3 = vpop.f32.mrf.mxu1 }
 0x489   : > { %v9729_v53 = vadd.f32 %v5054_v3, %v9573_v61  ;;  %5253 = vmatmul.bf16.gmra.mxu2 %v10512_v60  ;;  %5637 = vmatmul.bf16.gmra.mxu0 %v9462_v20  ;;  %v9733_v56 = vadd.f32 %v5595_v11, %v5476_v32  ;;  %v10516_v11 = vld [vmem:[#allocation24_spill] sm:$0xff]  ;;  %v10519_v3 = vld [vmem:[#allocation74_spill] sm:$0xff] }
 0x48a   : > { %5445 = vmatmul.bf16.gmra.mxu3 %v10513_v12 }
 0x48c   : > { %v5214_v29 = vpop.f32.mrf.mxu2 }
 0x48d   : > { %v5285_v51 = vadd.f32 %v5214_v29, %v9616_v25  ;;  %v5406_v9 = vpop.f32.mrf.mxu3  ;;  %v10520_v29 = vld [vmem:[#allocation61_spill] sm:$0xff] }
 0x48e   : > { %v5600_v62 = vpop.f32.mrf.mxu0 }
 0x48f   : > { %v5477_v4 = vadd.f32 %v5406_v9, %v5285_v51 }
 0x490   : > { %v5057_v48 = vpop.f32.mrf.mxu1 }
 0x491   : > { %v9738_v19 = vadd.f32 %v5057_v48, %v9582_v40  ;;  %v9740_v61 = vadd.f32 %v5598_v34, %v5477_v4  ;;  %v10525_v48 = vld [vmem:[#allocation81_spill] sm:$0xff] }
 0x493   : > { %5784 = vmatmul.bf16.gmra.mxu1 %v10514_v0 }
 0x494   : > { %v5216_v55 = vpop.f32.mrf.mxu2 }
 0x495   : > { %v5286_v20 = vadd.f32 %v5216_v55, %v9624_v42  ;;  %v5408_v63 = vpop.f32.mrf.mxu3  ;;  %v10517_v42 = vld [vmem:[#allocation21_spill] sm:$0xff]  ;;  %v10528_v55 = vld [vmem:[#allocation86_spill] sm:$0xff] }
 0x497   : > { %v5478_v23 = vadd.f32 %v5408_v63, %v5286_v20 }
 0x498   : > { %v5059_v58 = vpop.f32.mrf.mxu1 }
 0x499   : > { %v9745_v25 = vadd.f32 %v5059_v58, %v9591_v39  ;;  %5258 = vmatmul.bf16.gmra.mxu2 %v10515_v36  ;;  %5642 = vmatmul.bf16.gmra.mxu0 %v9484_v13  ;;  %v9749_v40 = vadd.f32 %v5600_v62, %v5478_v23  ;;  %v10518_v39 = vld [vmem:[#allocation73_spill] sm:$0xff] }
 0x49a   : > { %5450 = vmatmul.bf16.gmra.mxu3 %v10516_v11 }
 0x4a0   : > { %v5062_v15 = vpop.f32.mrf.mxu1 }
 0x4a1   : > { %v9753_v33 = vadd.f32 %v5062_v15, %v9600_v30  ;;  %v10521_v30 = vld [vmem:[#allocation76_spill] sm:$0xff] }
 0x4a2   : > { %v10522_v51 = vunpack.c.l.bf16 %v10521_v30 }
 0x4a3   : > { %5789 = vmatmul.bf16.gmra.mxu1 %v10517_v42  ;;  %v6965_v42 = vld [vmem:[#allocation2 + $0x88] sm:$0xff] }
 0x4a4   : > { %v3536_v9 = vrot.slane %v10522_v51, 7 }
 0x4a6   : > { %v3538_v20 = vsel %vm10529_vm3, %v3536_v9, %v10528_v55 }
 0x4a7   : > { %v3753_v58 = vpack.c.bf16 %v3538_v20, %v3538_v20 }
 0x4a8   : > { %v5064_v47 = vpop.f32.mrf.mxu1 }
 0x4a9   : > { %v9757_v32 = vadd.f32 %v5064_v47, %v9609_v10  ;;  %5263 = vmatmul.bf16.gmra.mxu2 %v10518_v39  ;;  %5647 = vmatmul.bf16.gmra.mxu0 %v9515_v59  ;;  %v10523_v10 = vld [vmem:[#allocation78_spill] sm:$0xff]  ;;  %v10524_v59 = vld [vmem:[#allocation83_spill] sm:$0xff]  ;;  %v5331_v15 = vunpack.c.l.b16 %v3753_v58 }
 0x4aa   : > { %5455 = vmatmul.bf16.gmra.mxu3 %v10519_v3 }
 0x4b0   : > { %v5067_v13 = vpop.f32.mrf.mxu1 }
 0x4b1   : > { %v9763_v12 = vadd.f32 %v5067_v13, %v9618_v37  ;;  %v3539_v37 = vsel %vm10527_vm2, %v10525_v48, %v3536_v9 }
 0x4b2   : > { %v3608_v23 = vsel %vm8966_vm9, 0.0, %v3539_v37  ;;  %vm10535_vm9 = vmmov %vm10479_vm1 }
 0x4b3   : > { %5794 = vmatmul.bf16.gmra.mxu1 %v10520_v29  ;;  %v10531_v29 = vld [vmem:[#allocation14_spill] sm:$0xff] }
 0x4b8   : > { %v5069_v34 = vpop.f32.mrf.mxu1 }
 0x4b9   : > { %v9769_v4 = vadd.f32 %v5069_v34, %v9627_v52  ;;  %5268 = vmatmul.bf16.gmra.mxu2 %v10523_v10  ;;  %5652 = vmatmul.bf16.gmra.mxu0 %v9690_v24  ;;  %v3752_v52 = vpack.c.bf16 %v3608_v23, %v3608_v23  ;;  %v5603_v23 = vpop.f32.mrf.mxu0 }
 0x4ba   : > { %5460 = vmatmul.bf16.gmra.mxu3 %v10524_v59 }
 0x4bb   : > { %v5330_v24 = vunpack.c.l.b16 %v3752_v52 }
 0x4bd   : > { %v5332_v3 = vpack.c.b16 %v5331_v15, %v5330_v24 }
 0x4c0   : > { %v5072_v62 = vpop.f32.mrf.mxu1 }
 0x4c1   : > { %v9783_v11 = vadd.f32 %v5072_v62, %v9636_v5  ;;  %v5605_v52 = vpop.f32.mrf.mxu0 }
 0x4c3   : > { %5799 = vmatmul.bf16.gmra.mxu1 %v10505_v26 }
 0x4c8   : > { %v5074_v47 = vpop.f32.mrf.mxu1 }
 0x4c9   : > { %v9787_v13 = vadd.f32 %v5074_v47, %v9646_v44  ;;  %5273 = vmatmul.bf16.gmra.mxu2 %v10531_v29  ;;  %5657 = vmatmul.bf16.gmra.mxu0 %v6965_v42 }
 0x4ca   : > { %5465 = vmatmul.bf16.gmra.mxu3 %v5332_v3 }
 0x4d0   : > { %v5077_v30 = vpop.f32.mrf.mxu1 }
 0x4d1   : > { %v9791_v51 = vadd.f32 %v5077_v30, %v9655_v22  ;;  %v5219_v22 = vpop.f32.mrf.mxu2  ;;  %v5608_v30 = vpop.f32.mrf.mxu0 }
 0x4d3   : > { %5804 = vmatmul.bf16.gmra.mxu1 %v10507_v17 }
 0x4d8   : > { %v5079_v5 = vpop.f32.mrf.mxu1 }
 0x4d9   : > { %v9795_v26 = vadd.f32 %v5079_v5, %v9667_v38 }
 0x4e0   : > { %v5082_v9 = vpop.f32.mrf.mxu1 }
 0x4e1   : > { %v9798_v34 = vadd.f32 %v5082_v9, %v9674_v50  ;;  %v5411_v50 = vpop.f32.mrf.mxu3 }
 0x4e3   : > { %5809 = vmatmul.bf16.gmra.mxu1 %v10509_v46  ;;  %v5221_v46 = vpop.f32.mrf.mxu2 }
 0x4e8   : > { %v5084_v44 = vpop.f32.mrf.mxu1 }
 0x4e9   : > { %v9802_v59 = vadd.f32 %v5084_v44, %v9683_v18 }
 0x4eb   : > { %v5224_v58 = vpop.f32.mrf.mxu2 }
 0x4f0   : > { %v5775_v48 = vpop.f32.mrf.mxu1 }
 0x4f1   : > { %v5855_v17 = vadd.f32 %v5775_v48, %v9692_v31 }
 0x4f3   : > { %5814 = vmatmul.bf16.gmra.mxu1 %v9206_v14  ;;  %v5887_v55 = vmax.f32 %v5855_v17, 0.0  ;;  %v5413_v14 = vpop.f32.mrf.mxu3  ;;  %v5226_v5 = vpop.f32.mrf.mxu2 }
 0x4f4   : > { %v5610_v17 = vpop.f32.mrf.mxu0 }
 0x4f8   : > { %v5777_v37 = vpop.f32.mrf.mxu1 }
 0x4f9   : > { %v5856_v38 = vadd.f32 %v5777_v37, %v9701_v27 }
 0x4fb   : > { %v5888_v20 = vmax.f32 %v5856_v38, 0.0  ;;  %v5416_v47 = vpop.f32.mrf.mxu3  ;;  %v5229_v38 = vpop.f32.mrf.mxu2 }
 0x4fd   : > { %v7186_v63 = vpack.c.bf16 %v5888_v20, %v5887_v55 }
 0x4ff   : > { %7187 = vst [vmem:[%s9808_s16] sm:$0xff] %v7186_v63   ;;  %v5613_v63 = vpop.f32.mrf.mxu0 }
 0x500   : > { %v5780_v18 = vpop.f32.mrf.mxu1 }
 0x501   : > { %v5857_v31 = vadd.f32 %v5780_v18, %v9708_v43 }
 0x503   : > { %5819 = vmatmul.bf16.gmra.mxu1 %v9235_v2  ;;  %v5889_v24 = vmax.f32 %v5857_v31, 0.0  ;;  %v5418_v44 = vpop.f32.mrf.mxu3  ;;  %v5231_v18 = vpop.f32.mrf.mxu2 }
 0x508   : > { %v5782_v62 = vpop.f32.mrf.mxu1 }
 0x509   : > { %v5858_v27 = vadd.f32 %v5782_v62, %v9717_v28 }
 0x50b   : > { %v5890_v15 = vmax.f32 %v5858_v27, 0.0  ;;  %v5421_v20 = vpop.f32.mrf.mxu3  ;;  %v5287_v27 = vadd.f32 %v5219_v22, %v9634_v21 }
 0x50d   : > { %v7191_v42 = vpack.c.bf16 %v5890_v15, %v5889_v24 }
 0x50f   : > { %7294 = vst [vmem:[%s9808_s16 + $0x8] sm:$0xff] %v7191_v42   ;;  %v5288_v42 = vadd.f32 %v5221_v46, %v9642_v8  ;;  %v5289_v46 = vadd.f32 %v5224_v58, %v9653_v1 }
 0x510   : > { %v5785_v3 = vpop.f32.mrf.mxu1 }
 0x511   : > { %v5859_v2 = vadd.f32 %v5785_v3, %v9724_v49 }
 0x513   : > { %5824 = vmatmul.bf16.gmra.mxu1 %v10512_v60  ;;  %v5891_v48 = vmax.f32 %v5859_v2, 0.0  ;;  %v5423_v15 = vpop.f32.mrf.mxu3  ;;  %v5479_v2 = vadd.f32 %v5411_v50, %v5287_v27 }
 0x518   : > { %v5787_v9 = vpop.f32.mrf.mxu1 }
 0x519   : > { %v5860_v43 = vadd.f32 %v5787_v9, %v9733_v56  ;;  %v5234_v9 = vpop.f32.mrf.mxu2 }
 0x51a   : > { %v5293_v0 = vadd.f32 %v5234_v9, %v9688_v57 }
 0x51b   : > { %v5892_v28 = vmax.f32 %v5860_v43, 0.0  ;;  %v5480_v43 = vadd.f32 %v5413_v14, %v5288_v42 }
 0x51d   : > { %v7196_v37 = vpack.c.bf16 %v5892_v28, %v5891_v48  ;;  %v5426_v28 = vpop.f32.mrf.mxu3 }
 0x51f   : > { %7295 = vst [vmem:[%s9808_s16 + $0x10] sm:$0xff] %v7196_v37  }
 0x520   : > { %v5790_v55 = vpop.f32.mrf.mxu1 }
 0x521   : > { %v5861_v60 = vadd.f32 %v5790_v55, %v9740_v61  ;;  %v5671_v61 = vadd.f32 %v5603_v23, %v5479_v2  ;;  %v5236_v8 = vpop.f32.mrf.mxu2 }
 0x523   : > { %5829 = vmatmul.bf16.gmra.mxu1 %v10515_v36  ;;  %v5893_v56 = vmax.f32 %v5861_v60, 0.0  ;;  %v5615_v36 = vpop.f32.mrf.mxu0 }
 0x528   : > { %v5792_v49 = vpop.f32.mrf.mxu1 }
 0x529   : > { %v5862_v31 = vadd.f32 %v5792_v49, %v9749_v40  ;;  %v5672_v40 = vadd.f32 %v5605_v52, %v5480_v43  ;;  %v5290_v49 = vadd.f32 %v5226_v5, %v9663_v35  ;;  %v5291_v35 = vadd.f32 %v5229_v38, %v9672_v7  ;;  %v10532_v43 = vld [vmem:[#allocation33_spill] sm:$0xff] }
 0x52b   : > { %v5894_v62 = vmax.f32 %v5862_v31, 0.0  ;;  %v9826_v21 = vpop.f32.mrf.mxu0  ;;  %v5481_v31 = vadd.f32 %v5416_v47, %v5289_v46  ;;  %v5482_v23 = vadd.f32 %v5418_v44, %v5290_v49  ;;  %v10533_v47 = vunpack.c.l.bf16 %v10532_v43 }
 0x52c   : > { %v5292_v44 = vadd.f32 %v5231_v18, %v9679_v6 }
 0x52d   : > { %v7201_v24 = vpack.c.bf16 %v5894_v62, %v5893_v56  ;;  %v5673_v56 = vadd.f32 %v5608_v30, %v5481_v31  ;;  %v5239_v62 = vpop.f32.mrf.mxu2 }
 0x52f   : > { %7296 = vst [vmem:[%s9808_s16 + $0x18] sm:$0xff] %v7201_v24   ;;  %v5674_v24 = vadd.f32 %v5610_v17, %v5482_v23 }
 0x530   : > { %v5795_v3 = vpop.f32.mrf.mxu1 }
 0x531   : > { %v5863_v48 = vadd.f32 %v5795_v3, %v5671_v61  ;;  %v3645_v61 = vrot.slane %v10533_v47, 1 }
 0x533   : > { %5834 = vmatmul.bf16.gmra.mxu1 %v10518_v39  ;;  %v5895_v22 = vmax.f32 %v5863_v48, 0.0  ;;  %v5428_v39 = vpop.f32.mrf.mxu3  ;;  %v5620_v52 = vpop.f32.mrf.mxu0 }
 0x535   : > { %v5241_v48 = vpop.f32.mrf.mxu2 }
 0x538   : > { %v5797_v37 = vpop.f32.mrf.mxu1 }
 0x539   : > { %v5864_v55 = vadd.f32 %v5797_v37, %v5672_v40  ;;  %v5483_v40 = vadd.f32 %v5421_v20, %v5291_v35  ;;  %v10534_v37 = vld [vmem:[#allocation56_spill] sm:$0xff] }
 0x53a   : > { %v3681_v17 = vsel %vm10535_vm9, %v3645_v61, %v10534_v37 }
 0x53b   : > { %v5896_v60 = vmax.f32 %v5864_v55, 0.0  ;;  %v5431_v58 = vpop.f32.mrf.mxu3  ;;  %v5484_v55 = vadd.f32 %v5423_v15, %v5292_v44  ;;  %v5675_v6 = vadd.f32 %v5613_v63, %v5483_v40 }
 0x53d   : > { %v7206_v50 = vpack.c.bf16 %v5896_v60, %v5895_v22  ;;  %v10536_v22 = vld [vmem:[#allocation26_spill] sm:$0xff]  ;;  %v3717_v60 = vsel %vm8978_vm10, 0.0, %v3681_v17  ;;  %v5244_v15 = vpop.f32.mrf.mxu2 }
 0x53e   : > { %v3646_v7 = vsel %vm10537_vm13, %v10536_v22, %v3645_v61  ;;  %v3789_v49 = vpack.c.bf16 %v3717_v60, %v3717_v60 }
 0x53f   : > { %7297 = vst [vmem:[%s9808_s16 + $0x20] sm:$0xff] %v7206_v50   ;;  %v5676_v50 = vadd.f32 %v5615_v36, %v5484_v55  ;;  %v3788_v20 = vpack.c.bf16 %v3646_v7, %v3646_v7  ;;  %v5485_v36 = vadd.f32 %v5426_v28, %v5293_v0  ;;  %v5296_v28 = vadd.f32 %v5241_v48, %v9713_v41 }
 0x540   : > { %v5800_v14 = vpop.f32.mrf.mxu1 }
 0x541   : > { %v5865_v27 = vadd.f32 %v5800_v14, %v5673_v56  ;;  %v5677_v47 = vadd.f32 %v9826_v21, %v5485_v36 }
 0x543   : > { %5839 = vmatmul.bf16.gmra.mxu1 %v10523_v10  ;;  %v5897_v2 = vmax.f32 %v5865_v27, 0.0  ;;  %v5623_v10 = vpop.f32.mrf.mxu0  ;;  %v5433_v18 = vpop.f32.mrf.mxu3  ;;  %v5714_v27 = vunpack.c.l.b16 %v3788_v20 }
 0x544   : > { %v5488_v7 = vadd.f32 %v5433_v18, %v5296_v28 }
 0x545   : > { %v5246_v43 = vpop.f32.mrf.mxu2 }
 0x546   : > { %v5298_v41 = vadd.f32 %v5246_v43, %v9729_v53 }
 0x548   : > { %v5802_v42 = vpop.f32.mrf.mxu1 }
 0x549   : > { %v5866_v3 = vadd.f32 %v5802_v42, %v5674_v24  ;;  %v5715_v24 = vunpack.c.l.b16 %v3789_v49 }
 0x54b   : > { %v5898_v1 = vmax.f32 %v5866_v3, 0.0  ;;  %v5625_v31 = vpop.f32.mrf.mxu0  ;;  %v5294_v3 = vadd.f32 %v5236_v8, %v9697_v54  ;;  %v5716_v63 = vpack.c.b16 %v5715_v24, %v5714_v27  ;;  %v5295_v54 = vadd.f32 %v5239_v62, %v9706_v45 }
 0x54c   : > { %v5297_v62 = vadd.f32 %v5244_v15, %v9722_v16 }
 0x54d   : > { %v7211_v5 = vpack.c.bf16 %v5898_v1, %v5897_v2  ;;  %v5436_v2 = vpop.f32.mrf.mxu3  ;;  %v5486_v35 = vadd.f32 %v5428_v39, %v5294_v3  ;;  %v5249_v55 = vpop.f32.mrf.mxu2  ;;  %v5487_v22 = vadd.f32 %v5431_v58, %v5295_v54 }
 0x54e   : > { %v5489_v48 = vadd.f32 %v5436_v2, %v5297_v62 }
 0x54f   : > { %7298 = vst [vmem:[%s9808_s16 + $0x28] sm:$0xff] %v7211_v5   ;;  %v5678_v44 = vadd.f32 %v5620_v52, %v5486_v35  ;;  %v5679_v38 = vadd.f32 %v5623_v10, %v5487_v22 }
 0x550   : > { %v5805_v30 = vpop.f32.mrf.mxu1 }
 0x551   : > { %v5867_v46 = vadd.f32 %v5805_v30, %v5675_v6  ;;  %v5680_v6 = vadd.f32 %v5625_v31, %v5488_v7 }
 0x553   : > { %5844 = vmatmul.bf16.gmra.mxu1 %v10531_v29  ;;  %v5899_v56 = vmax.f32 %v5867_v46, 0.0  ;;  %v5628_v5 = vpop.f32.mrf.mxu0 }
 0x555   : > { %v5438_v57 = vpop.f32.mrf.mxu3  ;;  %v5251_v46 = vpop.f32.mrf.mxu2 }
 0x556   : > { %v5300_v36 = vadd.f32 %v5251_v46, %v9745_v25 }
 0x558   : > { %v5807_v14 = vpop.f32.mrf.mxu1 }
 0x559   : > { %v5868_v23 = vadd.f32 %v5807_v14, %v5676_v50 }
 0x55b   : > { %v5900_v29 = vmax.f32 %v5868_v23, 0.0  ;;  %v5630_v8 = vpop.f32.mrf.mxu0 }
 0x55d   : > { %v7216_v42 = vpack.c.bf16 %v5900_v29, %v5899_v56  ;;  %v5441_v21 = vpop.f32.mrf.mxu3  ;;  %v5254_v10 = vpop.f32.mrf.mxu2  ;;  %v5490_v56 = vadd.f32 %v5438_v57, %v5298_v41  ;;  %v5681_v29 = vadd.f32 %v5628_v5, %v5489_v48 }
 0x55f   : > { %7299 = vst [vmem:[%s9808_s16 + $0x30] sm:$0xff] %v7216_v42   ;;  %v5682_v27 = vadd.f32 %v5630_v8, %v5490_v56 }
 0x560   : > { %v5810_v1 = vpop.f32.mrf.mxu1 }
 0x561   : > { %v5869_v61 = vadd.f32 %v5810_v1, %v5677_v47  ;;  %v5299_v1 = vadd.f32 %v5249_v55, %v9738_v19  ;;  %v5301_v19 = vadd.f32 %v5254_v10, %v9753_v33 }
 0x563   : > { %5849 = vmatmul.bf16.gmra.mxu1 %v5716_v63  ;;  %v5901_v9 = vmax.f32 %v5869_v61, 0.0  ;;  %v5633_v52 = vpop.f32.mrf.mxu0  ;;  %v5491_v35 = vadd.f32 %v5441_v21, %v5299_v1 }
 0x565   : > { %v5443_v23 = vpop.f32.mrf.mxu3  ;;  %v5256_v15 = vpop.f32.mrf.mxu2  ;;  %v5683_v61 = vadd.f32 %v5633_v52, %v5491_v35 }
 0x566   : > { %v5492_v5 = vadd.f32 %v5443_v23, %v5300_v36  ;;  %v5302_v25 = vadd.f32 %v5256_v15, %v9757_v32 }
 0x568   : > { %v5812_v30 = vpop.f32.mrf.mxu1 }
 0x569   : > { %v5870_v40 = vadd.f32 %v5812_v30, %v5678_v44 }
 0x56b   : > { %v5902_v37 = vmax.f32 %v5870_v40, 0.0  ;;  %v5635_v18 = vpop.f32.mrf.mxu0 }
 0x56c   : > { %v5684_v40 = vadd.f32 %v5635_v18, %v5492_v5 }
 0x56d   : > { %v7221_v17 = vpack.c.bf16 %v5902_v37, %v5901_v9  ;;  %v5446_v24 = vpop.f32.mrf.mxu3  ;;  %v5259_v44 = vpop.f32.mrf.mxu2 }
 0x56e   : > { %v5493_v22 = vadd.f32 %v5446_v24, %v5301_v19 }
 0x56f   : > { %7300 = vst [vmem:[%s9808_s16 + $0x38] sm:$0xff] %v7221_v17  }
 0x570   : > { %v5815_v39 = vpop.f32.mrf.mxu1 }
 0x571   : > { %v5871_v60 = vadd.f32 %v5815_v39, %v5679_v38 }
 0x573   : > { %v5903_v49 = vmax.f32 %v5871_v60, 0.0  ;;  %v5638_v3 = vpop.f32.mrf.mxu0 }
 0x574   : > { %v5685_v21 = vadd.f32 %v5638_v3, %v5493_v22 }
 0x575   : > { %v5448_v43 = vpop.f32.mrf.mxu3  ;;  %v5261_v28 = vpop.f32.mrf.mxu2 }
 0x576   : > { %v5494_v7 = vadd.f32 %v5448_v43, %v5302_v25  ;;  %v5304_v62 = vadd.f32 %v5261_v28, %v9769_v4 }
 0x578   : > { %v5817_v50 = vpop.f32.mrf.mxu1 }
 0x579   : > { %v5872_v20 = vadd.f32 %v5817_v50, %v5680_v6 }
 0x57b   : > { %v5904_v45 = vmax.f32 %v5872_v20, 0.0  ;;  %v5640_v47 = vpop.f32.mrf.mxu0 }
 0x57c   : > { %v5686_v60 = vadd.f32 %v5640_v47, %v5494_v7 }
 0x57d   : > { %v7226_v14 = vpack.c.bf16 %v5904_v45, %v5903_v49  ;;  %v5451_v8 = vpop.f32.mrf.mxu3  ;;  %v5264_v20 = vpop.f32.mrf.mxu2  ;;  %v5303_v45 = vadd.f32 %v5259_v44, %v9763_v12 }
 0x57e   : > { %v5305_v12 = vadd.f32 %v5264_v20, %v9783_v11 }
 0x57f   : > { %7301 = vst [vmem:[%s9808_s16 + $0x40] sm:$0xff] %v7226_v14   ;;  %v5495_v41 = vadd.f32 %v5451_v8, %v5303_v45 }
 0x580   : > { %v5820_v58 = vpop.f32.mrf.mxu1 }
 0x581   : > { %v5873_v31 = vadd.f32 %v5820_v58, %v5681_v29 }
 0x583   : > { %v5905_v63 = vmax.f32 %v5873_v31, 0.0  ;;  %v5643_v55 = vpop.f32.mrf.mxu0 }
 0x584   : > { %v5687_v10 = vadd.f32 %v5643_v55, %v5495_v41 }
 0x585   : > { %v5453_v38 = vpop.f32.mrf.mxu3  ;;  %v5266_v18 = vpop.f32.mrf.mxu2 }
 0x586   : > { %v5496_v58 = vadd.f32 %v5453_v38, %v5304_v62 }
 0x588   : > { %v5822_v0 = vpop.f32.mrf.mxu1 }
 0x589   : > { %v5874_v42 = vadd.f32 %v5822_v0, %v5682_v27 }
 0x58b   : > { %v5906_v16 = vmax.f32 %v5874_v42, 0.0  ;;  %v5645_v46 = vpop.f32.mrf.mxu0 }
 0x58c   : > { %v5688_v29 = vadd.f32 %v5645_v46, %v5496_v58 }
 0x58d   : > { %v7231_v53 = vpack.c.bf16 %v5906_v16, %v5905_v63  ;;  %v5456_v14 = vpop.f32.mrf.mxu3  ;;  %v5269_v63 = vpop.f32.mrf.mxu2  ;;  %v5306_v16 = vadd.f32 %v5266_v18, %v9787_v13 }
 0x58e   : > { %v5497_v1 = vadd.f32 %v5456_v14, %v5305_v12 }
 0x58f   : > { %7302 = vst [vmem:[%s9808_s16 + $0x48] sm:$0xff] %v7231_v53  }
 0x590   : > { %v5825_v2 = vpop.f32.mrf.mxu1 }
 0x591   : > { %v5875_v30 = vadd.f32 %v5825_v2, %v5683_v61 }
 0x593   : > { %v5907_v37 = vmax.f32 %v5875_v30, 0.0  ;;  %v5648_v48 = vpop.f32.mrf.mxu0 }
 0x594   : > { %v5689_v2 = vadd.f32 %v5648_v48, %v5497_v1 }
 0x595   : > { %v5458_v24 = vpop.f32.mrf.mxu3  ;;  %v5271_v47 = vpop.f32.mrf.mxu2 }
 0x596   : > { %v5498_v53 = vadd.f32 %v5458_v24, %v5306_v16  ;;  %v5308_v13 = vadd.f32 %v5271_v47, %v9795_v26 }
 0x598   : > { %v5827_v57 = vpop.f32.mrf.mxu1 }
 0x599   : > { %v5876_v9 = vadd.f32 %v5827_v57, %v5684_v40  ;;  %v5307_v40 = vadd.f32 %v5269_v63, %v9791_v51 }
 0x59b   : > { %v5908_v54 = vmax.f32 %v5876_v9, 0.0  ;;  %v5650_v3 = vpop.f32.mrf.mxu0 }
 0x59c   : > { %v5690_v5 = vadd.f32 %v5650_v3, %v5498_v53 }
 0x59d   : > { %v7236_v17 = vpack.c.bf16 %v5908_v54, %v5907_v37  ;;  %v5461_v36 = vpop.f32.mrf.mxu3  ;;  %v5274_v19 = vpop.f32.mrf.mxu2 }
 0x59e   : > { %v5499_v54 = vadd.f32 %v5461_v36, %v5307_v40  ;;  %v5309_v26 = vadd.f32 %v5274_v19, %v9798_v34 }
 0x59f   : > { %7303 = vst [vmem:[%s9808_s16 + $0x50] sm:$0xff] %v7236_v17  }
 0x5a0   : > { %v5830_v39 = vpop.f32.mrf.mxu1 }
 0x5a1   : > { %v5877_v52 = vadd.f32 %v5830_v39, %v5685_v21 }
 0x5a3   : > { %v5909_v49 = vmax.f32 %v5877_v52, 0.0  ;;  %v5653_v35 = vpop.f32.mrf.mxu0 }
 0x5a4   : > { %v5691_v25 = vadd.f32 %v5653_v35, %v5499_v54 }
 0x5a5   : > { %v5463_v9 = vpop.f32.mrf.mxu3  ;;  %v5276_v52 = vpop.f32.mrf.mxu2 }
 0x5a6   : > { %v5500_v17 = vadd.f32 %v5463_v9, %v5308_v13 }
 0x5a8   : > { %v5832_v6 = vpop.f32.mrf.mxu1 }
 0x5a9   : > { %v5878_v50 = vadd.f32 %v5832_v6, %v5686_v60  ;;  %v5310_v6 = vadd.f32 %v5276_v52, %v9802_v59 }
 0x5ab   : > { %v5910_v33 = vmax.f32 %v5878_v50, 0.0  ;;  %v5655_v8 = vpop.f32.mrf.mxu0 }
 0x5ac   : > { %v5692_v28 = vadd.f32 %v5655_v8, %v5500_v17 }
 0x5ad   : > { %v7241_v32 = vpack.c.bf16 %v5910_v33, %v5909_v49  ;;  %v5466_v39 = vpop.f32.mrf.mxu3 }
 0x5ae   : > { %v5501_v50 = vadd.f32 %v5466_v39, %v5309_v26 }
 0x5af   : > { %7304 = vst [vmem:[%s9808_s16 + $0x58] sm:$0xff] %v7241_v32  }
 0x5b0   : > { %v5835_v23 = vpop.f32.mrf.mxu1 }
 0x5b1   : > { %v5879_v56 = vadd.f32 %v5835_v23, %v5687_v10 }
 0x5b3   : > { %v5911_v0 = vmax.f32 %v5879_v56, 0.0  ;;  %v5658_v21 = vpop.f32.mrf.mxu0 }
 0x5b4   : > { %v5693_v45 = vadd.f32 %v5658_v21, %v5501_v50 }
 0x5b5   : > { %v5468_v20 = vpop.f32.mrf.mxu3 }
 0x5b6   : > { %v5502_v49 = vadd.f32 %v5468_v20, %v5310_v6 }
 0x5b8   : > { %v5837_v31 = vpop.f32.mrf.mxu1 }
 0x5b9   : > { %v5880_v27 = vadd.f32 %v5837_v31, %v5688_v29 }
 0x5bb   : > { %v5912_v42 = vmax.f32 %v5880_v27, 0.0  ;;  %v5660_v33 = vpop.f32.mrf.mxu0 }
 0x5bc   : > { %v5694_v32 = vadd.f32 %v5660_v33, %v5502_v49 }
 0x5bd   : > { %v7246_v4 = vpack.c.bf16 %v5912_v42, %v5911_v0 }
 0x5bf   : > { %7305 = vst [vmem:[%s9808_s16 + $0x60] sm:$0xff] %v7246_v4  }
 0x5c0   : > { %v5840_v15 = vpop.f32.mrf.mxu1 }
 0x5c1   : > { %v5881_v43 = vadd.f32 %v5840_v15, %v5689_v2 }
 0x5c3   : > { %v5913_v30 = vmax.f32 %v5881_v43, 0.0 }
 0x5c8   : > { %v5842_v61 = vpop.f32.mrf.mxu1 }
 0x5c9   : > { %v5882_v44 = vadd.f32 %v5842_v61, %v5690_v5 }
 0x5cb   : > { %v5914_v11 = vmax.f32 %v5882_v44, 0.0 }
 0x5cd   : > { %v7251_v57 = vpack.c.bf16 %v5914_v11, %v5913_v30 }
 0x5cf   : > { %7306 = vst [vmem:[%s9808_s16 + $0x68] sm:$0xff] %v7251_v57  }
 0x5d0   : > { %v5845_v37 = vpop.f32.mrf.mxu1 }
 0x5d1   : > { %v5883_v55 = vadd.f32 %v5845_v37, %v5691_v25 }
 0x5d3   : > { %v5915_v51 = vmax.f32 %v5883_v55, 0.0 }
 0x5d8   : > { %v5847_v22 = vpop.f32.mrf.mxu1 }
 0x5d9   : > { %v5884_v7 = vadd.f32 %v5847_v22, %v5692_v28 }
 0x5db   : > { %v5916_v38 = vmax.f32 %v5884_v7, 0.0 }
 0x5dd   : > { %v7256_v60 = vpack.c.bf16 %v5916_v38, %v5915_v51 }
 0x5df   : > { %7307 = vst [vmem:[%s9808_s16 + $0x70] sm:$0xff] %v7256_v60  }
 0x5e0   : > { %v5850_v46 = vpop.f32.mrf.mxu1 }
 0x5e1   : > { %v5885_v34 = vadd.f32 %v5850_v46, %v5693_v45 }
 0x5e3   : > { %v5917_v59 = vmax.f32 %v5885_v34, 0.0 }
 0x5e8   : > { %v5852_v62 = vpop.f32.mrf.mxu1 }
 0x5e9   : > { %v5886_v14 = vadd.f32 %v5852_v62, %v5694_v32 }
 0x5eb   : > { %v5918_v23 = vmax.f32 %v5886_v14, 0.0 }
 0x5ed   : > { %v7261_v41 = vpack.c.bf16 %v5918_v23, %v5917_v59 }
 0x5ef   : > { %7308 = vst [vmem:[%s9808_s16 + $0x78] sm:$0xff] %v7261_v41  }
 0x5f0   : > { %7540 = shalt.err (!%p7537_p10)
}
 0x5f1   : > { %s7590_s1 = smov 64   ;;  %s7591_s13 = smov 4  }
 0x5f2   : > { %7338 = dma.vmem_to_hbm [thread:$0]  (%p7694_p3), %s5997_s27, 2048, %s5999_s11, %s5984_s22, %s7590_s1, %s7590_s1, %s7591_s13  }
 0x5f3 PF: > { %s6013_s15 = sand.u32 1, %s7571_s18   ;;  %p10539_p12 = scmp.ge.s32.totalorder %s7583_s21, 2 }
 0x5f4   : > { %s6014_s16 = scalar_lea.sflag [#allocation5], %s6013_s15 }
 0x5f5   : > { %p7352_p13 = pnand %p10539_p12, %p7657_p6 }
 0x5f7   : > { %p7353_p0 = pneg %p7352_p13 }
 0x5f9   : > { %7566 = dma.done.wait (%p7353_p0), %s6014_s16, 2048  }
 0x5fa   : > { %7568 = vsyncadd (%p7353_p0), %s6014_s16, 4294965248  ;;  %p19_p5 = scmp.ge.s32.totalorder %s7684_s14, 4   ;;  %s10540_s18 = smov %s7575_s19 }
 0x5fb   : > { %s10541_s19 = smov %s7579_s20  ;;  %s10542_s20 = smov %s7700_s23 }
 0x5fc   : > { %s10543_s21 = smov %s7684_s14  ;;  %21 = sbr.rel (!%p19_p5) target bundleno = 8 (0x8), region = 112 }
 0x601   :  { %6020 = vsyncpa [#allocation4], 1 }
 0x602   :  { %6022 = vsyncpa [#allocation4 + $0x1], 1 }
 0x603   :  { %6023 = vsyncpa [#allocation7], 1 }
 0x604   :  { %6024 = vsyncpa [#allocation5], 1 }
 0x605   :  { %6026 = vsyncpa [#allocation5 + $0x1], 1 }

</bundles_post_ra>
